<compile_context>
chip_gen: v6e
topology: v6e:2x2x1
jax: 0.10.0
libtpu: 0.0.40
codegen_flags: <defaults>
</compile_context>

<pallas_src>
import functools

import numpy as np
import jax
import jax.numpy as jnp
from jax.experimental import pallas as pl
from jax.experimental.pallas import tpu as pltpu


# --------------------------- host-side helpers ------------------------------

def _bilinear_matrix(in_size, out_size):
    """Row-stochastic (out_size, in_size) matrix matching PyTorch
    F.interpolate(mode='bilinear', align_corners=False) along one axis."""
    m = np.zeros((out_size, in_size), dtype=np.float64)
    scale = in_size / out_size
    for y in range(out_size):
        s = max((y + 0.5) * scale - 0.5, 0.0)
        i0 = min(int(np.floor(s)), in_size - 1)
        i1 = i0 + 1 if i0 < in_size - 1 else i0
        frac = s - i0
        m[y, i0] += 1.0 - frac
        m[y, i1] += frac
    return m.astype(np.float32)


def _pick_row_tile(H, row_bytes, target=4 << 20):
    """Whole-H tile when it fits, else the largest multiple-of-8 divisor of H
    whose (rows x W*ch) block stays under `target` bytes."""
    if H * row_bytes <= target or H % 8 != 0:
        return H
    th = H
    for cand in range(8, H, 8):
        if H % cand == 0 and cand * row_bytes <= target:
            th = cand
    return th


# ----------------------------- Pallas kernels --------------------------------

def _head_kernel(x_ref, w1k_ref, wfk_ref, b1_ref, bf_ref, c1_ref, cf_ref):
    """conv1 (1x1) and conv_f (1x1, algebraically fused with conv1), applied as
    block-diagonal kron matmuls so stores are lane-dense (W*f lanes)."""
    x = x_ref[0].astype(jnp.bfloat16)                      # (th, W*C)
    c1 = jnp.dot(x, w1k_ref[...], preferred_element_type=jnp.float32)
    cf = jnp.dot(x, wfk_ref[...], preferred_element_type=jnp.float32)
    c1_ref[0] = (c1 + b1_ref[...]).astype(jnp.bfloat16)    # (th, W*f)
    cf_ref[0] = (cf + bf_ref[...]).astype(jnp.bfloat16)


def _mid_kernel(c1_ref, sh_ref, kc2_ref, b2_ref, r_ref, k3w_ref, b3_ref,
                mw_ref, c3w_ref, *, Hp, Wp, f):
    """Per-batch: conv2 (3x3/s2, VALID) + max_pool(7,3) + conv3 (3x3, pad 1)
    + W-axis bilinear interp, all held in VMEM.  No im2col, no HBM
    intermediates."""
    c1 = c1_ref[0]                                         # (H, W*f) bf16

    # conv2: c2 = sum_di (row_select_di @ c1) @ banded_kron_di  + b2
    c2 = None
    for di in range(3):
        rows = jnp.dot(sh_ref[di], c1,
                       preferred_element_type=jnp.float32)         # (H2, W*f)
        term = jnp.dot(rows.astype(jnp.bfloat16), kc2_ref[di],
                       preferred_element_type=jnp.float32)         # (H2, W2*f)
        c2 = term if c2 is None else c2 + term
    c2 = c2 + b2_ref[...]                                  # (H2, W2*f) f32

    # max_pool2d(kernel=7, stride=3), H-direction then W-direction (lane
    # groups of width f); the pooled map is tiny so static slices are fine.
    rmax = jnp.concatenate(
        [jnp.max(c2[3 * yo:3 * yo + 7, :], axis=0, keepdims=True)
         for yo in range(Hp)], axis=0)                     # (Hp, W2*f)
    cols = []
    for xo in range(Wp):
        wmax = rmax[:, (3 * xo) * f:(3 * xo + 1) * f]
        for k in range(1, 7):
            wmax = jnp.maximum(
                wmax, rmax[:, (3 * xo + k) * f:(3 * xo + k + 1) * f])
        cols.append(wmax)
    vmax = jnp.concatenate(cols, axis=1)                   # (Hp, Wp*f)

    # conv3 (pad 1): c3 = sum_di (row_shift_di @ vmax) @ banded_kron_di + b3
    vb = vmax.astype(jnp.bfloat16)
    c3 = None
    for di in range(3):
        rows = jnp.dot(r_ref[di], vb,
                       preferred_element_type=jnp.float32)          # (Hp, Wp*f)
        term = jnp.dot(rows.astype(jnp.bfloat16), k3w_ref[di],
                       preferred_element_type=jnp.float32)
        c3 = term if c3 is None else c3 + term
    c3 = c3 + b3_ref[...]                                  # (Hp, Wp*f)

    # W-axis bilinear interp (separable half): (Hp, Wp*f) @ (Wp*f, W*f)
    c3w = jnp.dot(c3.astype(jnp.bfloat16), mw_ref[...],
                  preferred_element_type=jnp.float32)
    c3w_ref[0] = c3w.astype(jnp.bfloat16)                  # (Hp, W*f)


def _tail_kernel(wh_ref, c3w_ref, cf_ref, x_ref, k4_ref, b4_ref, o_ref):
    """H-axis bilinear interp + conv4 (1x1, kron form) + sigmoid + gating,
    fused; all stores lane-dense (W*C lanes)."""
    c3u = jnp.dot(wh_ref[...], c3w_ref[0],
                  preferred_element_type=jnp.float32)      # (th, W*f)
    s = c3u + cf_ref[0].astype(jnp.float32)
    c4 = jnp.dot(s.astype(jnp.bfloat16), k4_ref[...],
                 preferred_element_type=jnp.float32) + b4_ref[...]
    m = jax.nn.sigmoid(c4)                                 # (th, W*C)
    o_ref[0] = (x_ref[0] * m).astype(o_ref.dtype)


# --------------------------------- wrapper -----------------------------------

def esa_forward(x_nchw, params):
    B, C, H, W = x_nchw.shape
    f = params['w1'].shape[1]
    H2, W2 = (H - 3) // 2 + 1, (W - 3) // 2 + 1
    Hp, Wp = (H2 - 7) // 3 + 1, (W2 - 7) // 3 + 1
    assert H2 >= 7 and W2 >= 7, "max_pool2d(7,3) needs the conv2 map >= 7x7"

    bf16 = jnp.bfloat16
    x_slab = (jnp.transpose(x_nchw, (0, 2, 3, 1))
              .reshape(B, H, W * C).astype(jnp.float32))   # (B, H, W*C)

    # ---- structural 0/1 matrices (numpy, trace-time constants) ----
    eye_w = np.eye(W, dtype=np.float32)
    sh = np.zeros((3, H2, H), np.float32)                  # stride-2 row select
    for di in range(3):
        sh[di, np.arange(H2), 2 * np.arange(H2) + di] = 1.0
    p2 = np.zeros((3, W, W2), np.float32)                  # stride-2 col select
    for dj in range(3):
        p2[dj, 2 * np.arange(W2) + dj, np.arange(W2)] = 1.0
    r3 = np.zeros((3, Hp, Hp), np.float32)                 # pad-1 row shift
    for di in range(3):
        src = np.arange(Hp) + di - 1
        ok = (src >= 0) & (src < Hp)
        r3[di, np.arange(Hp)[ok], src[ok]] = 1.0
    b3band = np.zeros((3, Wp, Wp), np.float32)             # pad-1 col band
    for dj in range(3):
        dst = np.arange(Wp) - dj + 1
        ok = (dst >= 0) & (dst < Wp)
        b3band[dj, np.arange(Wp)[ok], dst[ok]] = 1.0
    wh = _bilinear_matrix(Hp, H)                           # (H, Hp)
    ww = _bilinear_matrix(Wp, W)                           # (W, Wp)
    mw = np.kron(ww.T, np.eye(f, dtype=np.float32))        # (Wp*f, W*f)

    # ---- parameter-dependent kron / banded weight matrices ----
    w1, b1 = params['w1'], params['b1']
    wf, bfv = params['wf'], params['bf']
    w2, b2 = params['w2'], params['b2']                    # (3,3,f,f), (f,)
    w3, b3 = params['w3'], params['b3']
    w4, b4 = params['w4'], params['b4']

    w1k = jnp.kron(eye_w, w1).astype(bf16)                 # (W*C, W*f)
    wfk = jnp.kron(eye_w, w1 @ wf).astype(bf16)            # conv1+conv_f fused
    kc2 = jnp.stack(
        [sum(jnp.kron(p2[dj], w2[di, dj]) for dj in range(3))
         for di in range(3)]).astype(bf16)                 # (3, W*f, W2*f)
    k3w = jnp.stack(
        [sum(jnp.kron(b3band[dj], w3[di, dj]) for dj in range(3))
         for di in range(3)]).astype(bf16)                 # (3, Wp*f, Wp*f)
    k4 = jnp.kron(eye_w, w4).astype(bf16)                  # (W*f, W*C)

    b1row = jnp.tile(b1, W).reshape(1, W * f)
    bfrow = jnp.tile(b1 @ wf + bfv, W).reshape(1, W * f)
    b2row = jnp.tile(b2, W2).reshape(1, W2 * f)
    b3row = jnp.tile(b3, Wp).reshape(1, Wp * f)
    b4row = jnp.tile(b4, W).reshape(1, W * C)

    sh_b = jnp.asarray(sh, bf16)
    r3_b = jnp.asarray(r3, bf16)
    mw_b = jnp.asarray(mw, bf16)
    wh_b = jnp.asarray(wh, bf16)

    # ---- head: conv1 + conv_f, lane-dense (B, H, W*f) bf16 outputs ----
    th = _pick_row_tile(H, W * max(C, f) * 4)
    nH = H // th
    grid2 = (B, nH)
    psem2 = ("parallel", "parallel")

    c1_slab, cf_slab = pl.pallas_call(
        _head_kernel,
        out_shape=(jax.ShapeDtypeStruct((B, H, W * f), bf16),
                   jax.ShapeDtypeStruct((B, H, W * f), bf16)),
        grid=grid2,
        in_specs=[pl.BlockSpec((1, th, W * C), lambda b, i: (b, i, 0)),
                  pl.BlockSpec((W * C, W * f), lambda b, i: (0, 0)),
                  pl.BlockSpec((W * C, W * f), lambda b, i: (0, 0)),
                  pl.BlockSpec((1, W * f), lambda b, i: (0, 0)),
                  pl.BlockSpec((1, W * f), lambda b, i: (0, 0))],
        out_specs=(pl.BlockSpec((1, th, W * f), lambda b, i: (b, i, 0)),
                   pl.BlockSpec((1, th, W * f), lambda b, i: (b, i, 0))),
        compiler_params=pltpu.CompilerParams(dimension_semantics=psem2),
        cost_estimate=pl.CostEstimate(
            flops=4 * B * H * (W * C) * (W * f),
            transcendentals=0,
            bytes_accessed=4 * B * H * W * C + 4 * B * H * W * f
                           + 4 * (W * C) * (W * f)),
    )(x_slab, w1k, wfk, b1row, bfrow)

    # ---- mid: conv2 + max_pool(7,3) + conv3 + W-axis interp, per batch ----
    mid = functools.partial(_mid_kernel, Hp=Hp, Wp=Wp, f=f)
    c3w = pl.pallas_call(
        mid,
        out_shape=jax.ShapeDtypeStruct((B, Hp, W * f), bf16),
        grid=(B,),
        in_specs=[pl.BlockSpec((1, H, W * f), lambda b: (b, 0, 0)),
                  pl.BlockSpec((3, H2, H), lambda b: (0, 0, 0)),
                  pl.BlockSpec((3, W * f, W2 * f), lambda b: (0, 0, 0)),
                  pl.BlockSpec((1, W2 * f), lambda b: (0, 0)),
                  pl.BlockSpec((3, Hp, Hp), lambda b: (0, 0, 0)),
                  pl.BlockSpec((3, Wp * f, Wp * f), lambda b: (0, 0, 0)),
                  pl.BlockSpec((1, Wp * f), lambda b: (0, 0)),
                  pl.BlockSpec((Wp * f, W * f), lambda b: (0, 0))],
        out_specs=pl.BlockSpec((1, Hp, W * f), lambda b: (b, 0, 0)),
        compiler_params=pltpu.CompilerParams(
            dimension_semantics=("parallel",)),
    )(c1_slab, sh_b, kc2, b2row, r3_b, k3w, b3row, mw_b)

    # ---- tail: H-axis interp + conv4 + sigmoid + x * m ----
    out_slab = pl.pallas_call(
        _tail_kernel,
        out_shape=jax.ShapeDtypeStruct((B, H, W * C), jnp.float32),
        grid=grid2,
        in_specs=[pl.BlockSpec((th, Hp), lambda b, i: (i, 0)),
                  pl.BlockSpec((1, Hp, W * f), lambda b, i: (b, 0, 0)),
                  pl.BlockSpec((1, th, W * f), lambda b, i: (b, i, 0)),
                  pl.BlockSpec((1, th, W * C), lambda b, i: (b, i, 0)),
                  pl.BlockSpec((W * f, W * C), lambda b, i: (0, 0)),
                  pl.BlockSpec((1, W * C), lambda b, i: (0, 0))],
        out_specs=pl.BlockSpec((1, th, W * C), lambda b, i: (b, i, 0)),
        compiler_params=pltpu.CompilerParams(dimension_semantics=psem2),
        cost_estimate=pl.CostEstimate(
            flops=2 * B * H * (W * f) * (Hp + W * C) + 4 * B * H * W * C,
            transcendentals=B * H * W * C,
            bytes_accessed=8 * B * H * W * C + 2 * B * H * W * f
                           + 2 * (W * f) * (W * C)),
    )(wh_b, c3w, cf_slab, x_slab, k4, b4row)

    return out_slab.reshape(B, H, W, C).transpose(0, 3, 1, 2)   # back to NCHW


# ----------------------- plain-JAX reference (check) -------------------------

def esa_reference(x_nchw, params):
    B, C, H, W = x_nchw.shape
    f = params['w1'].shape[1]
    x = jnp.transpose(x_nchw, (0, 2, 3, 1))

    def conv(z, w_hwio, b, stride=1, pad=0):
        out = jax.lax.conv_general_dilated(
            z, w_hwio, (stride, stride), [(pad, pad), (pad, pad)],
            dimension_numbers=('NHWC', 'HWIO', 'NHWC'),
            precision=jax.lax.Precision.HIGHEST)
        return out + b

    c1_ = conv(x, params['w1'].reshape(1, 1, C, f), params['b1'])
    cf = conv(c1_, params['wf'].reshape(1, 1, f, f), params['bf'])
    c1 = conv(c1_, params['w2'], params['b2'], stride=2)
    v_max = jax.lax.reduce_window(c1, -jnp.inf, jax.lax.max,
                                  (1, 7, 7, 1), (1, 3, 3, 1), 'VALID')
    c3 = conv(v_max, params['w3'], params['b3'], pad=1)
    Hp, Wp = c3.shape[1], c3.shape[2]
    c3u = jnp.einsum('yi,xj,bijc->byxc',
                     jnp.asarray(_bilinear_matrix(Hp, H)),
                     jnp.asarray(_bilinear_matrix(Wp, W)), c3,
                     precision=jax.lax.Precision.HIGHEST)
    c4 = conv(c3u + cf, params['w4'].reshape(1, 1, f, C), params['b4'])
    m = jax.nn.sigmoid(c4)
    return jnp.transpose(x * m, (0, 3, 1, 2))


def init_params(key, n_feats, f):
    ks = jax.random.split(key, 10)

    def w(k, shape, fan_in):
        return jax.random.normal(k, shape, jnp.float32) / np.sqrt(fan_in)

    return {
        'w1': w(ks[0], (n_feats, f), n_feats),
        'b1': 0.01 * jax.random.normal(ks[1], (f,), jnp.float32),
        'wf': w(ks[2], (f, f), f),
        'bf': 0.01 * jax.random.normal(ks[3], (f,), jnp.float32),
        'w2': w(ks[4], (3, 3, f, f), 9 * f),          # HWIO
        'b2': 0.01 * jax.random.normal(ks[5], (f,), jnp.float32),
        'w3': w(ks[6], (3, 3, f, f), 9 * f),
        'b3': 0.01 * jax.random.normal(ks[7], (f,), jnp.float32),
        'w4': w(ks[8], (f, n_feats), f),
        'b4': 0.01 * jax.random.normal(ks[9], (n_feats,), jnp.float32),
    }


# ----------------------------------- main ------------------------------------

if __name__ == "__main__":
    # H, W >= 17 so the 7x7 / stride-3 max-pool has a valid window (as in the
    # PyTorch module); small shapes otherwise.
    B, n_feats, H, W = 2, 32, 24, 24          # x: (B, n_feats, H, W), NCHW
    f = 16                                    # esa_channels

    key = jax.random.PRNGKey(0)
    kx, kp = jax.random.split(key)
    x = jax.random.normal(kx, (B, n_feats, H, W), jnp.float32)
    params = init_params(kp, n_feats, f)

    fwd = jax.jit(esa_forward)
    out = jax.block_until_ready(fwd(x, params))

    # bf16 MXU operands + bf16 activation storage (f32 accumulation) => looser
    # tolerance vs the all-f32 HIGHEST-precision reference.
    ref = esa_reference(x, params)
    np.testing.assert_allclose(np.asarray(out), np.asarray(ref),
                               rtol=3e-2, atol=5e-2)
    assert out.shape == (B, n_feats, H, W)
    print("KERNEL_OK")
</pallas_src>

<mosaic_0001>
module attributes {stable_mosaic.version = 11 : i64} {
  func.func @_head_kernel(%arg0: i32, %arg1: i32, %arg2: memref<1x24x768xf32, #tpu.memory_space<vmem>>, %arg3: memref<768x384xbf16, #tpu.memory_space<vmem>>, %arg4: memref<768x384xbf16, #tpu.memory_space<vmem>>, %arg5: memref<1x384xf32, #tpu.memory_space<vmem>>, %arg6: memref<1x384xf32, #tpu.memory_space<vmem>>, %arg7: memref<1x24x384xbf16, #tpu.memory_space<vmem>>, %arg8: memref<1x24x384xbf16, #tpu.memory_space<vmem>>) attributes {dimension_semantics = [#tpu.dimension_semantics<parallel>, #tpu.dimension_semantics<parallel>], iteration_bounds = array<i64: 2, 1>, scalar_prefetch = 0 : i64, scratch_operands = 0 : i64, tpu.core_type = #tpu.core_type<tc>, window_params = [{transform_indices = @transform_0, window_bounds = array<i64: 1, 24, 768>}, {pipeline_mode = #tpu.pipeline_mode<synchronous>, transform_indices = @transform_1, window_bounds = array<i64: 768, 384>}, {pipeline_mode = #tpu.pipeline_mode<synchronous>, transform_indices = @transform_2, window_bounds = array<i64: 768, 384>}, {pipeline_mode = #tpu.pipeline_mode<synchronous>, transform_indices = @transform_3, window_bounds = array<i64: 1, 384>}, {pipeline_mode = #tpu.pipeline_mode<synchronous>, transform_indices = @transform_4, window_bounds = array<i64: 1, 384>}, {transform_indices = @transform_5, window_bounds = array<i64: 1, 24, 384>}, {transform_indices = @transform_6, window_bounds = array<i64: 1, 24, 384>}]} {
    %c0 = arith.constant 0 : index
    %c0_0 = arith.constant 0 : index
    %c0_1 = arith.constant 0 : index
    %0 = vector.load %arg2[%c0, %c0_0, %c0_1] : memref<1x24x768xf32, #tpu.memory_space<vmem>>, vector<1x24x768xf32>
    %1 = vector.shape_cast %0 : vector<1x24x768xf32> to vector<24x768xf32>
    %2 = arith.truncf %1 : vector<24x768xf32> to vector<24x768xbf16>
    %c0_2 = arith.constant 0 : index
    %c0_3 = arith.constant 0 : index
    %3 = vector.load %arg3[%c0_2, %c0_3] : memref<768x384xbf16, #tpu.memory_space<vmem>>, vector<768x384xbf16>
    %cst = arith.constant dense<0.000000e+00> : vector<24x384xf32>
    %4 = tpu.matmul %2, %3, %cst {dimension_numbers = #tpu.dot_dimension_numbers<[1], [0], [0], [1], [0, 0, 1, 1], [], []>} : vector<24x768xbf16>, vector<768x384xbf16>, vector<24x384xf32> -> vector<24x384xf32>
    %c0_4 = arith.constant 0 : index
    %c0_5 = arith.constant 0 : index
    %5 = vector.load %arg4[%c0_4, %c0_5] : memref<768x384xbf16, #tpu.memory_space<vmem>>, vector<768x384xbf16>
    %cst_6 = arith.constant dense<0.000000e+00> : vector<24x384xf32>
    %6 = tpu.matmul %2, %5, %cst_6 {dimension_numbers = #tpu.dot_dimension_numbers<[1], [0], [0], [1], [0, 0, 1, 1], [], []>} : vector<24x768xbf16>, vector<768x384xbf16>, vector<24x384xf32> -> vector<24x384xf32>
    %c0_7 = arith.constant 0 : index
    %c0_8 = arith.constant 0 : index
    %7 = vector.load %arg5[%c0_7, %c0_8] : memref<1x384xf32, #tpu.memory_space<vmem>>, vector<1x384xf32>
    %8 = vector.broadcast %7 : vector<1x384xf32> to vector<24x384xf32>
    %9 = arith.addf %4, %8 : vector<24x384xf32>
    %10 = arith.truncf %9 : vector<24x384xf32> to vector<24x384xbf16>
    %c0_9 = arith.constant 0 : index
    %c0_10 = arith.constant 0 : index
    %c0_11 = arith.constant 0 : index
    %11 = vector.load %arg7[%c0_9, %c0_10, %c0_11] : memref<1x24x384xbf16, #tpu.memory_space<vmem>>, vector<1x24x384xbf16>
    %12 = vector.shape_cast %11 : vector<1x24x384xbf16> to vector<24x384xbf16>
    %13 = vector.shape_cast %10 : vector<24x384xbf16> to vector<1x24x384xbf16>
    tpu.vector_store %arg7[%c0_9, %c0_10, %c0_11], %13 {strides = array<i32>} : memref<1x24x384xbf16, #tpu.memory_space<vmem>>, vector<1x24x384xbf16>,
    %c0_12 = arith.constant 0 : index
    %c0_13 = arith.constant 0 : index
    %14 = vector.load %arg6[%c0_12, %c0_13] : memref<1x384xf32, #tpu.memory_space<vmem>>, vector<1x384xf32>
    %15 = vector.broadcast %14 : vector<1x384xf32> to vector<24x384xf32>
    %16 = arith.addf %6, %15 : vector<24x384xf32>
    %17 = arith.truncf %16 : vector<24x384xf32> to vector<24x384xbf16>
    %c0_14 = arith.constant 0 : index
    %c0_15 = arith.constant 0 : index
    %c0_16 = arith.constant 0 : index
    %18 = vector.load %arg8[%c0_14, %c0_15, %c0_16] : memref<1x24x384xbf16, #tpu.memory_space<vmem>>, vector<1x24x384xbf16>
    %19 = vector.shape_cast %18 : vector<1x24x384xbf16> to vector<24x384xbf16>
    %20 = vector.shape_cast %17 : vector<24x384xbf16> to vector<1x24x384xbf16>
    tpu.vector_store %arg8[%c0_14, %c0_15, %c0_16], %20 {strides = array<i32>} : memref<1x24x384xbf16, #tpu.memory_space<vmem>>, vector<1x24x384xbf16>,
    return
  }
  func.func @transform_0(%arg0: i32, %arg1: i32) -> (i32, i32, i32) {
    %c0_i32 = arith.constant 0 : i32
    %c0_i32_0 = arith.constant 0 : i32
    return %arg0, %arg1, %c0_i32 : i32, i32, i32
  }
  func.func @transform_1(%arg0: i32, %arg1: i32) -> (i32, i32) {
    %c0_i32 = arith.constant 0 : i32
    %c0_i32_0 = arith.constant 0 : i32
    %c0_i32_1 = arith.constant 0 : i32
    return %c0_i32, %c0_i32_0 : i32, i32
  }
  func.func @transform_2(%arg0: i32, %arg1: i32) -> (i32, i32) {
    %c0_i32 = arith.constant 0 : i32
    %c0_i32_0 = arith.constant 0 : i32
    %c0_i32_1 = arith.constant 0 : i32
    return %c0_i32, %c0_i32_0 : i32, i32
  }
  func.func @transform_3(%arg0: i32, %arg1: i32) -> (i32, i32) {
    %c0_i32 = arith.constant 0 : i32
    %c0_i32_0 = arith.constant 0 : i32
    %c0_i32_1 = arith.constant 0 : i32
    return %c0_i32, %c0_i32_0 : i32, i32
  }
  func.func @transform_4(%arg0: i32, %arg1: i32) -> (i32, i32) {
    %c0_i32 = arith.constant 0 : i32
    %c0_i32_0 = arith.constant 0 : i32
    %c0_i32_1 = arith.constant 0 : i32
    return %c0_i32, %c0_i32_0 : i32, i32
  }
  func.func @transform_5(%arg0: i32, %arg1: i32) -> (i32, i32, i32) {
    %c0_i32 = arith.constant 0 : i32
    %c0_i32_0 = arith.constant 0 : i32
    return %arg0, %arg1, %c0_i32 : i32, i32, i32
  }
  func.func @transform_6(%arg0: i32, %arg1: i32) -> (i32, i32, i32) {
    %c0_i32 = arith.constant 0 : i32
    %c0_i32_0 = arith.constant 0 : i32
    return %arg0, %arg1, %c0_i32 : i32, i32, i32
  }
}

module attributes {stable_mosaic.version = 11 : i64} {
  func.func @_mid_kernel(%arg0: i32, %arg1: memref<1x24x384xbf16, #tpu.memory_space<vmem>>, %arg2: memref<3x11x24xbf16, #tpu.memory_space<vmem>>, %arg3: memref<3x384x176xbf16, #tpu.memory_space<vmem>>, %arg4: memref<1x176xf32, #tpu.memory_space<vmem>>, %arg5: memref<3x2x2xbf16, #tpu.memory_space<vmem>>, %arg6: memref<3x32x32xbf16, #tpu.memory_space<vmem>>, %arg7: memref<1x32xf32, #tpu.memory_space<vmem>>, %arg8: memref<32x384xbf16, #tpu.memory_space<vmem>>, %arg9: memref<1x2x384xbf16, #tpu.memory_space<vmem>>) attributes {dimension_semantics = [#tpu.dimension_semantics<parallel>], iteration_bounds = array<i64: 2>, scalar_prefetch = 0 : i64, scratch_operands = 0 : i64, tpu.core_type = #tpu.core_type<tc>, window_params = [{transform_indices = @transform_0, window_bounds = array<i64: 1, 24, 384>}, {pipeline_mode = #tpu.pipeline_mode<synchronous>, transform_indices = @transform_1, window_bounds = array<i64: 3, 11, 24>}, {pipeline_mode = #tpu.pipeline_mode<synchronous>, transform_indices = @transform_2, window_bounds = array<i64: 3, 384, 176>}, {pipeline_mode = #tpu.pipeline_mode<synchronous>, transform_indices = @transform_3, window_bounds = array<i64: 1, 176>}, {pipeline_mode = #tpu.pipeline_mode<synchronous>, transform_indices = @transform_4, window_bounds = array<i64: 3, 2, 2>}, {pipeline_mode = #tpu.pipeline_mode<synchronous>, transform_indices = @transform_5, window_bounds = array<i64: 3, 32, 32>}, {pipeline_mode = #tpu.pipeline_mode<synchronous>, transform_indices = @transform_6, window_bounds = array<i64: 1, 32>}, {pipeline_mode = #tpu.pipeline_mode<synchronous>, transform_indices = @transform_7, window_bounds = array<i64: 32, 384>}, {transform_indices = @transform_8, window_bounds = array<i64: 1, 2, 384>}]} {
    %c0 = arith.constant 0 : index
    %c0_0 = arith.constant 0 : index
    %c0_1 = arith.constant 0 : index
    %0 = vector.load %arg1[%c0, %c0_0, %c0_1] : memref<1x24x384xbf16, #tpu.memory_space<vmem>>, vector<1x24x384xbf16>
    %1 = vector.shape_cast %0 : vector<1x24x384xbf16> to vector<24x384xbf16>
    %c0_2 = arith.constant 0 : index
    %c0_3 = arith.constant 0 : index
    %c0_4 = arith.constant 0 : index
    %2 = vector.load %arg2[%c0_2, %c0_3, %c0_4] : memref<3x11x24xbf16, #tpu.memory_space<vmem>>, vector<1x11x24xbf16>
    %3 = vector.shape_cast %2 : vector<1x11x24xbf16> to vector<11x24xbf16>
    %cst = arith.constant dense<0.000000e+00> : vector<11x384xf32>
    %4 = tpu.matmul %3, %1, %cst {dimension_numbers = #tpu.dot_dimension_numbers<[1], [0], [0], [1], [0, 0, 1, 1], [], []>} : vector<11x24xbf16>, vector<24x384xbf16>, vector<11x384xf32> -> vector<11x384xf32>
    %5 = arith.truncf %4 : vector<11x384xf32> to vector<11x384xbf16>
    %c0_5 = arith.constant 0 : index
    %c0_6 = arith.constant 0 : index
    %c0_7 = arith.constant 0 : index
    %6 = vector.load %arg3[%c0_5, %c0_6, %c0_7] : memref<3x384x176xbf16, #tpu.memory_space<vmem>>, vector<1x384x176xbf16>
    %7 = vector.shape_cast %6 : vector<1x384x176xbf16> to vector<384x176xbf16>
    %cst_8 = arith.constant dense<0.000000e+00> : vector<11x176xf32>
    %8 = tpu.matmul %5, %7, %cst_8 {dimension_numbers = #tpu.dot_dimension_numbers<[1], [0], [0], [1], [0, 0, 1, 1], [], []>} : vector<11x384xbf16>, vector<384x176xbf16>, vector<11x176xf32> -> vector<11x176xf32>
    %c1 = arith.constant 1 : index
    %c0_9 = arith.constant 0 : index
    %c0_10 = arith.constant 0 : index
    %9 = vector.load %arg2[%c1, %c0_9, %c0_10] : memref<3x11x24xbf16, #tpu.memory_space<vmem>>, vector<1x11x24xbf16>
    %10 = vector.shape_cast %9 : vector<1x11x24xbf16> to vector<11x24xbf16>
    %cst_11 = arith.constant dense<0.000000e+00> : vector<11x384xf32>
    %11 = tpu.matmul %10, %1, %cst_11 {dimension_numbers = #tpu.dot_dimension_numbers<[1], [0], [0], [1], [0, 0, 1, 1], [], []>} : vector<11x24xbf16>, vector<24x384xbf16>, vector<11x384xf32> -> vector<11x384xf32>
    %12 = arith.truncf %11 : vector<11x384xf32> to vector<11x384xbf16>
    %c1_12 = arith.constant 1 : index
    %c0_13 = arith.constant 0 : index
    %c0_14 = arith.constant 0 : index
    %13 = vector.load %arg3[%c1_12, %c0_13, %c0_14] : memref<3x384x176xbf16, #tpu.memory_space<vmem>>, vector<1x384x176xbf16>
    %14 = vector.shape_cast %13 : vector<1x384x176xbf16> to vector<384x176xbf16>
    %cst_15 = arith.constant dense<0.000000e+00> : vector<11x176xf32>
    %15 = tpu.matmul %12, %14, %cst_15 {dimension_numbers = #tpu.dot_dimension_numbers<[1], [0], [0], [1], [0, 0, 1, 1], [], []>} : vector<11x384xbf16>, vector<384x176xbf16>, vector<11x176xf32> -> vector<11x176xf32>
    %16 = arith.addf %8, %15 : vector<11x176xf32>
    %c2 = arith.constant 2 : index
    %c0_16 = arith.constant 0 : index
    %c0_17 = arith.constant 0 : index
    %17 = vector.load %arg2[%c2, %c0_16, %c0_17] : memref<3x11x24xbf16, #tpu.memory_space<vmem>>, vector<1x11x24xbf16>
    %18 = vector.shape_cast %17 : vector<1x11x24xbf16> to vector<11x24xbf16>
    %cst_18 = arith.constant dense<0.000000e+00> : vector<11x384xf32>
    %19 = tpu.matmul %18, %1, %cst_18 {dimension_numbers = #tpu.dot_dimension_numbers<[1], [0], [0], [1], [0, 0, 1, 1], [], []>} : vector<11x24xbf16>, vector<24x384xbf16>, vector<11x384xf32> -> vector<11x384xf32>
    %20 = arith.truncf %19 : vector<11x384xf32> to vector<11x384xbf16>
    %c2_19 = arith.constant 2 : index
    %c0_20 = arith.constant 0 : index
    %c0_21 = arith.constant 0 : index
    %21 = vector.load %arg3[%c2_19, %c0_20, %c0_21] : memref<3x384x176xbf16, #tpu.memory_space<vmem>>, vector<1x384x176xbf16>
    %22 = vector.shape_cast %21 : vector<1x384x176xbf16> to vector<384x176xbf16>
    %cst_22 = arith.constant dense<0.000000e+00> : vector<11x176xf32>
    %23 = tpu.matmul %20, %22, %cst_22 {dimension_numbers = #tpu.dot_dimension_numbers<[1], [0], [0], [1], [0, 0, 1, 1], [], []>} : vector<11x384xbf16>, vector<384x176xbf16>, vector<11x176xf32> -> vector<11x176xf32>
    %24 = arith.addf %16, %23 : vector<11x176xf32>
    %c0_23 = arith.constant 0 : index
    %c0_24 = arith.constant 0 : index
    %25 = vector.load %arg4[%c0_23, %c0_24] : memref<1x176xf32, #tpu.memory_space<vmem>>, vector<1x176xf32>
    %26 = vector.broadcast %25 : vector<1x176xf32> to vector<11x176xf32>
    %27 = arith.addf %24, %26 : vector<11x176xf32>
    %28 = vector.extract_strided_slice %27 {offsets = [0, 0], sizes = [7, 176], strides = [1, 1]} : vector<11x176xf32> to vector<7x176xf32>
    %cst_25 = arith.constant dense<0xFF800000> : vector<176xf32>
    %29 = vector.multi_reduction <maximumf>, %28, %cst_25 [0] : vector<7x176xf32> to vector<176xf32>
    %30 = vector.shape_cast %29 : vector<176xf32> to vector<1x176xf32>
    %31 = vector.extract_strided_slice %27 {offsets = [3, 0], sizes = [7, 176], strides = [1, 1]} : vector<11x176xf32> to vector<7x176xf32>
    %cst_26 = arith.constant dense<0xFF800000> : vector<176xf32>
    %32 = vector.multi_reduction <maximumf>, %31, %cst_26 [0] : vector<7x176xf32> to vector<176xf32>
    %33 = vector.shape_cast %32 : vector<176xf32> to vector<1x176xf32>
    %34 = tpu.concatenate %30, %33 in 0 : vector<1x176xf32>, vector<1x176xf32> -> vector<2x176xf32>
    %35 = vector.extract_strided_slice %34 {offsets = [0, 0], sizes = [2, 16], strides = [1, 1]} : vector<2x176xf32> to vector<2x16xf32>
    %36 = vector.extract_strided_slice %34 {offsets = [0, 16], sizes = [2, 16], strides = [1, 1]} : vector<2x176xf32> to vector<2x16xf32>
    %37 = arith.maximumf %35, %36 : vector<2x16xf32>
    %38 = vector.extract_strided_slice %34 {offsets = [0, 32], sizes = [2, 16], strides = [1, 1]} : vector<2x176xf32> to vector<2x16xf32>
    %39 = arith.maximumf %37, %38 : vector<2x16xf32>
    %40 = vector.extract_strided_slice %34 {offsets = [0, 48], sizes = [2, 16], strides = [1, 1]} : vector<2x176xf32> to vector<2x16xf32>
    %41 = arith.maximumf %39, %40 : vector<2x16xf32>
    %42 = vector.extract_strided_slice %34 {offsets = [0, 64], sizes = [2, 16], strides = [1, 1]} : vector<2x176xf32> to vector<2x16xf32>
    %43 = arith.maximumf %41, %42 : vector<2x16xf32>
    %44 = vector.extract_strided_slice %34 {offsets = [0, 80], sizes = [2, 16], strides = [1, 1]} : vector<2x176xf32> to vector<2x16xf32>
    %45 = arith.maximumf %43, %44 : vector<2x16xf32>
    %46 = vector.extract_strided_slice %34 {offsets = [0, 96], sizes = [2, 16], strides = [1, 1]} : vector<2x176xf32> to vector<2x16xf32>
    %47 = arith.maximumf %45, %46 : vector<2x16xf32>
    %48 = vector.extract_strided_slice %34 {offsets = [0, 48], sizes = [2, 16], strides = [1, 1]} : vector<2x176xf32> to vector<2x16xf32>
    %49 = vector.extract_strided_slice %34 {offsets = [0, 64], sizes = [2, 16], strides = [1, 1]} : vector<2x176xf32> to vector<2x16xf32>
    %50 = arith.maximumf %48, %49 : vector<2x16xf32>
    %51 = vector.extract_strided_slice %34 {offsets = [0, 80], sizes = [2, 16], strides = [1, 1]} : vector<2x176xf32> to vector<2x16xf32>
    %52 = arith.maximumf %50, %51 : vector<2x16xf32>
    %53 = vector.extract_strided_slice %34 {offsets = [0, 96], sizes = [2, 16], strides = [1, 1]} : vector<2x176xf32> to vector<2x16xf32>
    %54 = arith.maximumf %52, %53 : vector<2x16xf32>
    %55 = vector.extract_strided_slice %34 {offsets = [0, 112], sizes = [2, 16], strides = [1, 1]} : vector<2x176xf32> to vector<2x16xf32>
    %56 = arith.maximumf %54, %55 : vector<2x16xf32>
    %57 = vector.extract_strided_slice %34 {offsets = [0, 128], sizes = [2, 16], strides = [1, 1]} : vector<2x176xf32> to vector<2x16xf32>
    %58 = arith.maximumf %56, %57 : vector<2x16xf32>
    %59 = vector.extract_strided_slice %34 {offsets = [0, 144], sizes = [2, 16], strides = [1, 1]} : vector<2x176xf32> to vector<2x16xf32>
    %60 = arith.maximumf %58, %59 : vector<2x16xf32>
    %61 = tpu.concatenate %47, %60 in 1 : vector<2x16xf32>, vector<2x16xf32> -> vector<2x32xf32>
    %62 = arith.truncf %61 : vector<2x32xf32> to vector<2x32xbf16>
    %c0_27 = arith.constant 0 : index
    %c0_28 = arith.constant 0 : index
    %c0_29 = arith.constant 0 : index
    %63 = vector.load %arg5[%c0_27, %c0_28, %c0_29] : memref<3x2x2xbf16, #tpu.memory_space<vmem>>, vector<1x2x2xbf16>
    %64 = vector.shape_cast %63 : vector<1x2x2xbf16> to vector<2x2xbf16>
    %cst_30 = arith.constant dense<0.000000e+00> : vector<2x32xf32>
    %65 = tpu.matmul %64, %62, %cst_30 {dimension_numbers = #tpu.dot_dimension_numbers<[1], [0], [0], [1], [0, 0, 1, 1], [], []>} : vector<2x2xbf16>, vector<2x32xbf16>, vector<2x32xf32> -> vector<2x32xf32>
    %66 = arith.truncf %65 : vector<2x32xf32> to vector<2x32xbf16>
    %c0_31 = arith.constant 0 : index
    %c0_32 = arith.constant 0 : index
    %c0_33 = arith.constant 0 : index
    %67 = vector.load %arg6[%c0_31, %c0_32, %c0_33] : memref<3x32x32xbf16, #tpu.memory_space<vmem>>, vector<1x32x32xbf16>
    %68 = vector.shape_cast %67 : vector<1x32x32xbf16> to vector<32x32xbf16>
    %cst_34 = arith.constant dense<0.000000e+00> : vector<2x32xf32>
    %69 = tpu.matmul %66, %68, %cst_34 {dimension_numbers = #tpu.dot_dimension_numbers<[1], [0], [0], [1], [0, 0, 1, 1], [], []>} : vector<2x32xbf16>, vector<32x32xbf16>, vector<2x32xf32> -> vector<2x32xf32>
    %c1_35 = arith.constant 1 : index
    %c0_36 = arith.constant 0 : index
    %c0_37 = arith.constant 0 : index
    %70 = vector.load %arg5[%c1_35, %c0_36, %c0_37] : memref<3x2x2xbf16, #tpu.memory_space<vmem>>, vector<1x2x2xbf16>
    %71 = vector.shape_cast %70 : vector<1x2x2xbf16> to vector<2x2xbf16>
    %cst_38 = arith.constant dense<0.000000e+00> : vector<2x32xf32>
    %72 = tpu.matmul %71, %62, %cst_38 {dimension_numbers = #tpu.dot_dimension_numbers<[1], [0], [0], [1], [0, 0, 1, 1], [], []>} : vector<2x2xbf16>, vector<2x32xbf16>, vector<2x32xf32> -> vector<2x32xf32>
    %73 = arith.truncf %72 : vector<2x32xf32> to vector<2x32xbf16>
    %c1_39 = arith.constant 1 : index
    %c0_40 = arith.constant 0 : index
    %c0_41 = arith.constant 0 : index
    %74 = vector.load %arg6[%c1_39, %c0_40, %c0_41] : memref<3x32x32xbf16, #tpu.memory_space<vmem>>, vector<1x32x32xbf16>
    %75 = vector.shape_cast %74 : vector<1x32x32xbf16> to vector<32x32xbf16>
    %cst_42 = arith.constant dense<0.000000e+00> : vector<2x32xf32>
    %76 = tpu.matmul %73, %75, %cst_42 {dimension_numbers = #tpu.dot_dimension_numbers<[1], [0], [0], [1], [0, 0, 1, 1], [], []>} : vector<2x32xbf16>, vector<32x32xbf16>, vector<2x32xf32> -> vector<2x32xf32>
    %77 = arith.addf %69, %76 : vector<2x32xf32>
    %c2_43 = arith.constant 2 : index
    %c0_44 = arith.constant 0 : index
    %c0_45 = arith.constant 0 : index
    %78 = vector.load %arg5[%c2_43, %c0_44, %c0_45] : memref<3x2x2xbf16, #tpu.memory_space<vmem>>, vector<1x2x2xbf16>
    %79 = vector.shape_cast %78 : vector<1x2x2xbf16> to vector<2x2xbf16>
    %cst_46 = arith.constant dense<0.000000e+00> : vector<2x32xf32>
    %80 = tpu.matmul %79, %62, %cst_46 {dimension_numbers = #tpu.dot_dimension_numbers<[1], [0], [0], [1], [0, 0, 1, 1], [], []>} : vector<2x2xbf16>, vector<2x32xbf16>, vector<2x32xf32> -> vector<2x32xf32>
    %81 = arith.truncf %80 : vector<2x32xf32> to vector<2x32xbf16>
    %c2_47 = arith.constant 2 : index
    %c0_48 = arith.constant 0 : index
    %c0_49 = arith.constant 0 : index
    %82 = vector.load %arg6[%c2_47, %c0_48, %c0_49] : memref<3x32x32xbf16, #tpu.memory_space<vmem>>, vector<1x32x32xbf16>
    %83 = vector.shape_cast %82 : vector<1x32x32xbf16> to vector<32x32xbf16>
    %cst_50 = arith.constant dense<0.000000e+00> : vector<2x32xf32>
    %84 = tpu.matmul %81, %83, %cst_50 {dimension_numbers = #tpu.dot_dimension_numbers<[1], [0], [0], [1], [0, 0, 1, 1], [], []>} : vector<2x32xbf16>, vector<32x32xbf16>, vector<2x32xf32> -> vector<2x32xf32>
    %85 = arith.addf %77, %84 : vector<2x32xf32>
    %c0_51 = arith.constant 0 : index
    %c0_52 = arith.constant 0 : index
    %86 = vector.load %arg7[%c0_51, %c0_52] : memref<1x32xf32, #tpu.memory_space<vmem>>, vector<1x32xf32>
    %87 = vector.broadcast %86 : vector<1x32xf32> to vector<2x32xf32>
    %88 = arith.addf %85, %87 : vector<2x32xf32>
    %89 = arith.truncf %88 : vector<2x32xf32> to vector<2x32xbf16>
    %c0_53 = arith.constant 0 : index
    %c0_54 = arith.constant 0 : index
    %90 = vector.load %arg8[%c0_53, %c0_54] : memref<32x384xbf16, #tpu.memory_space<vmem>>, vector<32x384xbf16>
    %cst_55 = arith.constant dense<0.000000e+00> : vector<2x384xf32>
    %91 = tpu.matmul %89, %90, %cst_55 {dimension_numbers = #tpu.dot_dimension_numbers<[1], [0], [0], [1], [0, 0, 1, 1], [], []>} : vector<2x32xbf16>, vector<32x384xbf16>, vector<2x384xf32> -> vector<2x384xf32>
    %92 = arith.truncf %91 : vector<2x384xf32> to vector<2x384xbf16>
    %c0_56 = arith.constant 0 : index
    %c0_57 = arith.constant 0 : index
    %c0_58 = arith.constant 0 : index
    %93 = vector.load %arg9[%c0_56, %c0_57, %c0_58] : memref<1x2x384xbf16, #tpu.memory_space<vmem>>, vector<1x2x384xbf16>
    %94 = vector.shape_cast %93 : vector<1x2x384xbf16> to vector<2x384xbf16>
    %95 = vector.shape_cast %92 : vector<2x384xbf16> to vector<1x2x384xbf16>
    tpu.vector_store %arg9[%c0_56, %c0_57, %c0_58], %95 {strides = array<i32>} : memref<1x2x384xbf16, #tpu.memory_space<vmem>>, vector<1x2x384xbf16>,
    return
  }
  func.func @transform_0(%arg0: i32) -> (i32, i32, i32) {
    %c0_i32 = arith.constant 0 : i32
    %c0_i32_0 = arith.constant 0 : i32
    %c0_i32_1 = arith.constant 0 : i32
    return %arg0, %c0_i32, %c0_i32_0 : i32, i32, i32
  }
  func.func @transform_1(%arg0: i32) -> (i32, i32, i32) {
    %c0_i32 = arith.constant 0 : i32
    %c0_i32_0 = arith.constant 0 : i32
    %c0_i32_1 = arith.constant 0 : i32
    %c0_i32_2 = arith.constant 0 : i32
    return %c0_i32, %c0_i32_0, %c0_i32_1 : i32, i32, i32
  }
  func.func @transform_2(%arg0: i32) -> (i32, i32, i32) {
    %c0_i32 = arith.constant 0 : i32
    %c0_i32_0 = arith.constant 0 : i32
    %c0_i32_1 = arith.constant 0 : i32
    %c0_i32_2 = arith.constant 0 : i32
    return %c0_i32, %c0_i32_0, %c0_i32_1 : i32, i32, i32
  }
  func.func @transform_3(%arg0: i32) -> (i32, i32) {
    %c0_i32 = arith.constant 0 : i32
    %c0_i32_0 = arith.constant 0 : i32
    %c0_i32_1 = arith.constant 0 : i32
    return %c0_i32, %c0_i32_0 : i32, i32
  }
  func.func @transform_4(%arg0: i32) -> (i32, i32, i32) {
    %c0_i32 = arith.constant 0 : i32
    %c0_i32_0 = arith.constant 0 : i32
    %c0_i32_1 = arith.constant 0 : i32
    %c0_i32_2 = arith.constant 0 : i32
    return %c0_i32, %c0_i32_0, %c0_i32_1 : i32, i32, i32
  }
  func.func @transform_5(%arg0: i32) -> (i32, i32, i32) {
    %c0_i32 = arith.constant 0 : i32
    %c0_i32_0 = arith.constant 0 : i32
    %c0_i32_1 = arith.constant 0 : i32
    %c0_i32_2 = arith.constant 0 : i32
    return %c0_i32, %c0_i32_0, %c0_i32_1 : i32, i32, i32
  }
  func.func @transform_6(%arg0: i32) -> (i32, i32) {
    %c0_i32 = arith.constant 0 : i32
    %c0_i32_0 = arith.constant 0 : i32
    %c0_i32_1 = arith.constant 0 : i32
    return %c0_i32, %c0_i32_0 : i32, i32
  }
  func.func @transform_7(%arg0: i32) -> (i32, i32) {
    %c0_i32 = arith.constant 0 : i32
    %c0_i32_0 = arith.constant 0 : i32
    %c0_i32_1 = arith.constant 0 : i32
    return %c0_i32, %c0_i32_0 : i32, i32
  }
  func.func @transform_8(%arg0: i32) -> (i32, i32, i32) {
    %c0_i32 = arith.constant 0 : i32
    %c0_i32_0 = arith.constant 0 : i32
    %c0_i32_1 = arith.constant 0 : i32
    return %arg0, %c0_i32, %c0_i32_0 : i32, i32, i32
  }
}

module attributes {stable_mosaic.version = 11 : i64} {
  func.func @_tail_kernel(%arg0: i32, %arg1: i32, %arg2: memref<24x2xbf16, #tpu.memory_space<vmem>>, %arg3: memref<1x2x384xbf16, #tpu.memory_space<vmem>>, %arg4: memref<1x24x384xbf16, #tpu.memory_space<vmem>>, %arg5: memref<1x24x768xf32, #tpu.memory_space<vmem>>, %arg6: memref<384x768xbf16, #tpu.memory_space<vmem>>, %arg7: memref<1x768xf32, #tpu.memory_space<vmem>>, %arg8: memref<1x24x768xf32, #tpu.memory_space<vmem>>) attributes {dimension_semantics = [#tpu.dimension_semantics<parallel>, #tpu.dimension_semantics<parallel>], iteration_bounds = array<i64: 2, 1>, scalar_prefetch = 0 : i64, scratch_operands = 0 : i64, tpu.core_type = #tpu.core_type<tc>, window_params = [{transform_indices = @transform_0, window_bounds = array<i64: 24, 2>}, {transform_indices = @transform_1, window_bounds = array<i64: 1, 2, 384>}, {transform_indices = @transform_2, window_bounds = array<i64: 1, 24, 384>}, {transform_indices = @transform_3, window_bounds = array<i64: 1, 24, 768>}, {pipeline_mode = #tpu.pipeline_mode<synchronous>, transform_indices = @transform_4, window_bounds = array<i64: 384, 768>}, {pipeline_mode = #tpu.pipeline_mode<synchronous>, transform_indices = @transform_5, window_bounds = array<i64: 1, 768>}, {transform_indices = @transform_6, window_bounds = array<i64: 1, 24, 768>}]} {
    %c0 = arith.constant 0 : index
    %c0_0 = arith.constant 0 : index
    %0 = vector.load %arg2[%c0, %c0_0] : memref<24x2xbf16, #tpu.memory_space<vmem>>, vector<24x2xbf16>
    %c0_1 = arith.constant 0 : index
    %c0_2 = arith.constant 0 : index
    %c0_3 = arith.constant 0 : index
    %1 = vector.load %arg3[%c0_1, %c0_2, %c0_3] : memref<1x2x384xbf16, #tpu.memory_space<vmem>>, vector<1x2x384xbf16>
    %2 = vector.shape_cast %1 : vector<1x2x384xbf16> to vector<2x384xbf16>
    %cst = arith.constant dense<0.000000e+00> : vector<24x384xf32>
    %3 = tpu.matmul %0, %2, %cst {dimension_numbers = #tpu.dot_dimension_numbers<[1], [0], [0], [1], [0, 0, 1, 1], [], []>} : vector<24x2xbf16>, vector<2x384xbf16>, vector<24x384xf32> -> vector<24x384xf32>
    %c0_4 = arith.constant 0 : index
    %c0_5 = arith.constant 0 : index
    %c0_6 = arith.constant 0 : index
    %4 = vector.load %arg4[%c0_4, %c0_5, %c0_6] : memref<1x24x384xbf16, #tpu.memory_space<vmem>>, vector<1x24x384xbf16>
    %5 = vector.shape_cast %4 : vector<1x24x384xbf16> to vector<24x384xbf16>
    %6 = arith.extf %5 : vector<24x384xbf16> to vector<24x384xf32>
    %7 = arith.addf %3, %6 : vector<24x384xf32>
    %8 = arith.truncf %7 : vector<24x384xf32> to vector<24x384xbf16>
    %c0_7 = arith.constant 0 : index
    %c0_8 = arith.constant 0 : index
    %9 = vector.load %arg6[%c0_7, %c0_8] : memref<384x768xbf16, #tpu.memory_space<vmem>>, vector<384x768xbf16>
    %cst_9 = arith.constant dense<0.000000e+00> : vector<24x768xf32>
    %10 = tpu.matmul %8, %9, %cst_9 {dimension_numbers = #tpu.dot_dimension_numbers<[1], [0], [0], [1], [0, 0, 1, 1], [], []>} : vector<24x384xbf16>, vector<384x768xbf16>, vector<24x768xf32> -> vector<24x768xf32>
    %c0_10 = arith.constant 0 : index
    %c0_11 = arith.constant 0 : index
    %11 = vector.load %arg7[%c0_10, %c0_11] : memref<1x768xf32, #tpu.memory_space<vmem>>, vector<1x768xf32>
    %12 = vector.broadcast %11 : vector<1x768xf32> to vector<24x768xf32>
    %13 = arith.addf %10, %12 : vector<24x768xf32>
    %14 = arith.negf %13 : vector<24x768xf32>
    %15 = math.exp %14 : vector<24x768xf32>
    %cst_12 = arith.constant 1.000000e+00 : f32
    %16 = vector.broadcast %cst_12 : f32 to vector<24x768xf32>
    %17 = arith.addf %16, %15 : vector<24x768xf32>
    %18 = arith.divf %16, %17 : vector<24x768xf32>
    %c0_13 = arith.constant 0 : index
    %c0_14 = arith.constant 0 : index
    %c0_15 = arith.constant 0 : index
    %19 = vector.load %arg5[%c0_13, %c0_14, %c0_15] : memref<1x24x768xf32, #tpu.memory_space<vmem>>, vector<1x24x768xf32>
    %20 = vector.shape_cast %19 : vector<1x24x768xf32> to vector<24x768xf32>
    %21 = arith.mulf %20, %18 : vector<24x768xf32>
    %c0_16 = arith.constant 0 : index
    %c0_17 = arith.constant 0 : index
    %c0_18 = arith.constant 0 : index
    %22 = vector.load %arg8[%c0_16, %c0_17, %c0_18] : memref<1x24x768xf32, #tpu.memory_space<vmem>>, vector<1x24x768xf32>
    %23 = vector.shape_cast %22 : vector<1x24x768xf32> to vector<24x768xf32>
    %24 = vector.shape_cast %21 : vector<24x768xf32> to vector<1x24x768xf32>
    tpu.vector_store %arg8[%c0_16, %c0_17, %c0_18], %24 {strides = array<i32>} : memref<1x24x768xf32, #tpu.memory_space<vmem>>, vector<1x24x768xf32>,
    return
  }
  func.func @transform_0(%arg0: i32, %arg1: i32) -> (i32, i32) {
    %c0_i32 = arith.constant 0 : i32
    %c0_i32_0 = arith.constant 0 : i32
    return %arg1, %c0_i32 : i32, i32
  }
  func.func @transform_1(%arg0: i32, %arg1: i32) -> (i32, i32, i32) {
    %c0_i32 = arith.constant 0 : i32
    %c0_i32_0 = arith.constant 0 : i32
    %c0_i32_1 = arith.constant 0 : i32
    return %arg0, %c0_i32, %c0_i32_0 : i32, i32, i32
  }
  func.func @transform_2(%arg0: i32, %arg1: i32) -> (i32, i32, i32) {
    %c0_i32 = arith.constant 0 : i32
    %c0_i32_0 = arith.constant 0 : i32
    return %arg0, %arg1, %c0_i32 : i32, i32, i32
  }
  func.func @transform_3(%arg0: i32, %arg1: i32) -> (i32, i32, i32) {
    %c0_i32 = arith.constant 0 : i32
    %c0_i32_0 = arith.constant 0 : i32
    return %arg0, %arg1, %c0_i32 : i32, i32, i32
  }
  func.func @transform_4(%arg0: i32, %arg1: i32) -> (i32, i32) {
    %c0_i32 = arith.constant 0 : i32
    %c0_i32_0 = arith.constant 0 : i32
    %c0_i32_1 = arith.constant 0 : i32
    return %c0_i32, %c0_i32_0 : i32, i32
  }
  func.func @transform_5(%arg0: i32, %arg1: i32) -> (i32, i32) {
    %c0_i32 = arith.constant 0 : i32
    %c0_i32_0 = arith.constant 0 : i32
    %c0_i32_1 = arith.constant 0 : i32
    return %c0_i32, %c0_i32_0 : i32, i32
  }
  func.func @transform_6(%arg0: i32, %arg1: i32) -> (i32, i32, i32) {
    %c0_i32 = arith.constant 0 : i32
    %c0_i32_0 = arith.constant 0 : i32
    return %arg0, %arg1, %c0_i32 : i32, i32, i32
  }
}

</mosaic_0001>

<bundles_post_ra>
// kernel: tile.28
= control target key start
LH: loop header
LB: loop body
LE: loop exit
PB: predicated region body
PF: predicated region fallthrough
CT: control target
= control target key end

     0   :  { %s34_s0 = inlined_call_operand.vmem [shape: f32[16], index: 0, kind: input, shape index: {}]   ;;  %s35_s1 = inlined_call_operand.vmem [shape: f32[24,16], index: 1, kind: output, shape index: {}]  }
   0x1   :  { %v4_v0 = vld [vmem:[%s34_s0] ss:$0 sm:$0xff] }
   0x2   :  { %5 = vst [vmem:[%s35_s1] sm:$0xff] %v4_v0  ;;  %10 = vst [vmem:[%s35_s1 + $0x8] sm:$0xff] %v4_v0 }
   0x3   :  { %11 = vst [vmem:[%s35_s1 + $0x10] sm:$0xff] %v4_v0 }

// kernel: tile.29
= control target key start
LH: loop header
LB: loop body
LE: loop exit
PB: predicated region body
PF: predicated region fallthrough
CT: control target
= control target key end

     0   :  { %s85_s8 = smov 112   ;;  %s86_s11 = smov 80   ;;  %vm3_vm0 = vcmask 130048   ;;  %vm9_vm1 = vcmask 1048448   ;;  %vm15_vm2 = vcmask 917248   ;;  %vm21_vm3 = vcmask 786048   ;;  %s135_s0 = inlined_call_operand.vmem [shape: f32[24,16], index: 0, kind: input, shape index: {}]   ;;  %s136_s1 = inlined_call_operand.vmem [shape: f32[1,384], index: 1, kind: output, shape index: {}]  }
   0x1   :  { %v69_v0 = vld [vmem:[%s135_s0 + $0x7] ss:$8 sm:$0x7]   ;;  %v71_v1 = vld [vmem:[%s135_s0 + $0x5] ss:$8 sm:$0x7]  }
   0x2   :  { %7 = vrot.lane.b32.xlu0 %v69_v0, %s85_s8  ;;  %19 = vrot.lane.b32.xlu1 %v71_v1, %s86_s11  ;;  %v70_v2 = vld [vmem:[%s135_s0 + $0x6] ss:$8 sm:$0x7]   ;;  %v72_v3 = vld [vmem:[%s135_s0 + $0x4] ss:$8 sm:$0x7]  }
   0x3   :  { %s87_s16 = smov 96   ;;  %v2_v4 = vld [vmem:[%s135_s0] ss:$8 sm:$0x7]   ;;  %s88_s19 = smov 64   ;;  %vm27_vm4 = vcmask 654848  }
   0x4   :  { %v73_v5 = vld [vmem:[%s135_s0 + $0x3] ss:$8 sm:$0x7]   ;;  %4 = vst.msk [vmem:[#allocation0] ss:$8 sm:$0x7] %vm3_vm0, %v2_v4  }
   0x5   :  { %v74_v6 = vld [vmem:[%s135_s0 + $0x2] ss:$8 sm:$0x7]   ;;  %s89_s24 = smov 48   ;;  %s90_s25 = smov 32   ;;  %vm33_vm5 = vcmask 523648  }
   0x6   :  { %13 = vrot.lane.b32.xlu0 %v70_v2, %s87_s16  ;;  %25 = vrot.lane.b32.xlu1 %v72_v3, %s88_s19  ;;  %v75_v7 = vld [vmem:[%s135_s0 + $0x1] ss:$8 sm:$0x7]   ;;  %s91_s0 = smov 16   ;;  %vm39_vm6 = vcmask 392448   ;;  %vm45_vm7 = vcmask 261248  }
   0xa   :  { %31 = vrot.lane.b32.xlu0 %v73_v5, %s89_s24  ;;  %37 = vrot.lane.b32.xlu1 %v74_v6, %s90_s25 }
   0xe   :  { %43 = vrot.lane.b32.xlu0 %v75_v7, %s91_s0 }
  0x74   :  { %v8_v8 = vpop.permute.xlu0 %7   ;;  %v20_v9 = vpop.permute.xlu1 %19  }
  0x75   :  { %10 = vst.msk [vmem:[#allocation0] ss:$8 sm:$0x7] %vm9_vm1, %v8_v8  }
  0x78   :  { %v14_v10 = vpop.permute.xlu0 %13   ;;  %v26_v11 = vpop.permute.xlu1 %25  }
  0x79   :  { %16 = vst.msk [vmem:[#allocation0] ss:$8 sm:$0x7] %vm15_vm2, %v14_v10  }
  0x7a   :  { %22 = vst.msk [vmem:[#allocation0] ss:$8 sm:$0x7] %vm21_vm3, %v20_v9  }
  0x7b   :  { %28 = vst.msk [vmem:[#allocation0] ss:$8 sm:$0x7] %vm27_vm4, %v26_v11  }
  0x7c   :  { %v32_v12 = vpop.permute.xlu0 %31   ;;  %v38_v13 = vpop.permute.xlu1 %37  }
  0x7d   :  { %34 = vst.msk [vmem:[#allocation0] ss:$8 sm:$0x7] %vm33_vm5, %v32_v12  }
  0x7e   :  { %40 = vst.msk [vmem:[#allocation0] ss:$8 sm:$0x7] %vm39_vm6, %v38_v13  }
  0x80   :  { %v44_v14 = vpop.permute.xlu0 %43  }
  0x81   :  { %46 = vst.msk [vmem:[#allocation0] ss:$8 sm:$0x7] %vm45_vm7, %v44_v14  }
  0x88   :  { %v51_v15 = vld [vmem:[#allocation0] sm:$0x1]  ;;  %v56_v16 = vld [vmem:[#allocation0 + $0x8] sm:$0x1]  ;;  %v62_v17 = vld [vmem:[#allocation0 + $0x10] sm:$0x1] }
  0x89   :  { %54 = vst [vmem:[%s136_s1] sm:$0x1] %v51_v15  ;;  %76 = vst [vmem:[%s136_s1 + $0x1] sm:$0x1] %v56_v16 }
  0x8a   :  { %77 = vst [vmem:[%s136_s1 + $0x2] sm:$0x1] %v62_v17 }

// kernel: esa_forward.3
= control target key start
LH: loop header
LB: loop body
LE: loop exit
PB: predicated region body
PF: predicated region fallthrough
CT: control target
= control target key end

     0   :  { %s4090_s21 = smov 0   ;;  %s4092_s22 = smov 0   ;;  %s5181_s0 = inlined_call_operand.vmem [shape: f32[2,24,768], index: 0, kind: input, shape index: {}]   ;;  %s5182_s1 = inlined_call_operand.vmem [shape: bf16[768,384], index: 1, kind: input, shape index: {}]   ;;  %s5183_s2 = inlined_call_operand.vmem [shape: bf16[768,384], index: 2, kind: input, shape index: {}]   ;;  %s5184_s3 = inlined_call_operand.vmem [shape: f32[1,384], index: 3, kind: input, shape index: {}]   ;;  %s5185_s4 = inlined_call_operand.vmem [shape: f32[1,384], index: 4, kind: input, shape index: {}]   ;;  %s5186_s5 = inlined_call_operand.vmem [shape: bf16[2,24,384], index: 5, kind: output, shape index: {0}]   ;;  %s5187_s6 = inlined_call_operand.vmem [shape: bf16[2,24,384], index: 6, kind: output, shape index: {1}]  }
   0x1   :  { %s4094_s23 = smov 0  }
   0x2 LB: > { %s29_s24 = sadd.s32 1, %s4049_s22  ;;  %p3135_p0 = scmp.ge.s32.totalorder %s4053_s23, 1  ;;  %s4053_s23 = sphi %s4094_s23, %s17_s23   ;;  %s4049_s22 = sphi %s4092_s22, %s5189_s22   ;;  %s4045_s21 = sphi %s4090_s21, %s5188_s21  }
   0x3   : > { %p31_p1 = scmp.ge.s32.totalorder %s29_s24, 2  ;;  %p239_p2 = scmp.lt.s32.totalorder %s4053_s23, 3 }
   0x5   : > { %s5191_s24 = smov (%p31_p1, %s29_s24), 0  ;;  %p240_p3 = pnand %p3135_p0, %p239_p2 }
   0x6   : > { %p290_p4 = scmp.lt.s32.totalorder (!%p240_p3), %s4045_s21, 1 }
   0x7   : > { %243 = sbr.rel (%p240_p3) target bundleno = 513 (0x201), region = 40 }
   0xc   : > { %v3647_v0 = vld [vmem:[%s5182_s1 + $0xac] ss:$12 sps:$4 sm:$0xff]   ;;  %v3651_v2 = vld [vmem:[%s5182_s1 + $0xa8] ss:$12 sps:$4 sm:$0xff]   ;;  %v3657_v6 = vld [vmem:[%s5182_s1 + $0x90] ss:$12 sps:$4 sm:$0xff]  }
   0xd   : > { %v3649_v1 = vld [vmem:[%s5182_s1 + $0x22c] ss:$12 sps:$4 sm:$0xff]   ;;  %1522 = vmatprep.subr.bf16.mxu0 %v3647_v0  ;;  %v3652_v3 = vld [vmem:[%s5182_s1 + $0x228] ss:$12 sps:$4 sm:$0xff]   ;;  %v3658_v7 = vld [vmem:[%s5182_s1 + $0x210] ss:$12 sps:$4 sm:$0xff]  }
   0xe   : > { %1573 = vmatprep.subr.bf16.mxu1 %v3649_v1  ;;  %v3653_v4 = vld [vmem:[%s5182_s1 + $0x94] ss:$12 sps:$4 sm:$0xff]   ;;  %1523 = vmatpush1.bf16.msra.mxu0 %v3651_v2  ;;  %v3659_v8 = vld [vmem:[%s5182_s1 + $0x7c] ss:$12 sps:$4 sm:$0xff]   ;;  %v3663_v10 = vld [vmem:[%s5182_s1 + $0x78] ss:$12 sps:$4 sm:$0xff]  }
   0xf   : > { %1574 = vmatpush1.bf16.msra.mxu1 %v3652_v3  ;;  %v3655_v5 = vld [vmem:[%s5182_s1 + $0x214] ss:$12 sps:$4 sm:$0xff]   ;;  %1524 = vmatprep.subr.bf16.mxu0 %v3653_v4  ;;  %v3661_v9 = vld [vmem:[%s5182_s1 + $0x1fc] ss:$12 sps:$4 sm:$0xff]   ;;  %v3664_v11 = vld [vmem:[%s5182_s1 + $0x1f8] ss:$12 sps:$4 sm:$0xff]  }
  0x10   : > { %1575 = vmatprep.subr.bf16.mxu1 %v3655_v5  ;;  %v3665_v12 = vld [vmem:[%s5182_s1 + $0x64] ss:$12 sps:$4 sm:$0xff]   ;;  %v3669_v14 = vld [vmem:[%s5182_s1 + $0x60] ss:$12 sps:$4 sm:$0xff]   ;;  %v3675_v18 = vld [vmem:[%s5182_s1 + $0x48] ss:$12 sps:$4 sm:$0xff]  }
  0x11   : > { %v3667_v13 = vld [vmem:[%s5182_s1 + $0x1e4] ss:$12 sps:$4 sm:$0xff]   ;;  %v3670_v15 = vld [vmem:[%s5182_s1 + $0x1e0] ss:$12 sps:$4 sm:$0xff]   ;;  %v3676_v19 = vld [vmem:[%s5182_s1 + $0x1c8] ss:$12 sps:$4 sm:$0xff]  }
  0x12   : > { %1525 = vmatpush1.bf16.msra.mxu0 %v3657_v6  ;;  %v3671_v16 = vld [vmem:[%s5182_s1 + $0x4c] ss:$12 sps:$4 sm:$0xff]   ;;  %v3677_v20 = vld [vmem:[%s5182_s1 + $0x34] ss:$12 sps:$4 sm:$0xff]   ;;  %v3681_v22 = vld [vmem:[%s5182_s1 + $0x30] ss:$12 sps:$4 sm:$0xff]  }
  0x13   : > { %1576 = vmatpush1.bf16.msra.mxu1 %v3658_v7  ;;  %1526 = vmatprep.subr.bf16.mxu0 %v3659_v8  ;;  %v3673_v17 = vld [vmem:[%s5182_s1 + $0x1cc] ss:$12 sps:$4 sm:$0xff]   ;;  %v3679_v21 = vld [vmem:[%s5182_s1 + $0x1b4] ss:$12 sps:$4 sm:$0xff]   ;;  %v3682_v23 = vld [vmem:[%s5182_s1 + $0x1b0] ss:$12 sps:$4 sm:$0xff]  }
  0x14   : > { %1577 = vmatprep.subr.bf16.mxu1 %v3661_v9  ;;  %v3683_v24 = vld [vmem:[%s5182_s1 + $0x1c] ss:$12 sps:$4 sm:$0xff]   ;;  %v3687_v26 = vld [vmem:[%s5182_s1 + $0x18] ss:$12 sps:$4 sm:$0xff]   ;;  %v3693_v30 = vld [vmem:[%s5182_s1] ss:$12 sps:$4 sm:$0xff]  }
  0x15   : > { %v3685_v25 = vld [vmem:[%s5182_s1 + $0x19c] ss:$12 sps:$4 sm:$0xff]   ;;  %v3688_v27 = vld [vmem:[%s5182_s1 + $0x198] ss:$12 sps:$4 sm:$0xff]   ;;  %v3694_v31 = vld [vmem:[%s5182_s1 + $0x180] ss:$12 sps:$4 sm:$0xff]  }
  0x16   : > { %1527 = vmatpush1.bf16.msra.mxu0 %v3663_v10  ;;  %v3689_v28 = vld [vmem:[%s5182_s1 + $0x4] ss:$12 sps:$4 sm:$0xff]   ;;  %v3695_v32 = vld [vmem:[%s5182_s1 + $0x16c] ss:$12 sps:$4 sm:$0xff]   ;;  %v3699_v34 = vld [vmem:[%s5182_s1 + $0x168] ss:$12 sps:$4 sm:$0xff]  }
  0x17   : > { %1578 = vmatpush1.bf16.msra.mxu1 %v3664_v11  ;;  %1528 = vmatprep.subr.bf16.mxu0 %v3665_v12  ;;  %v3691_v29 = vld [vmem:[%s5182_s1 + $0x184] ss:$12 sps:$4 sm:$0xff]   ;;  %v3697_v33 = vld [vmem:[%s5182_s1 + $0x2ec] ss:$12 sps:$4 sm:$0xff]   ;;  %v3700_v35 = vld [vmem:[%s5182_s1 + $0x2e8] ss:$12 sps:$4 sm:$0xff]  }
  0x18   : > { %1579 = vmatprep.subr.bf16.mxu1 %v3667_v13  ;;  %s5193_s21 = smov (!%p290_p4, %s4045_s21), 1  ;;  %v3701_v36 = vld [vmem:[%s5182_s1 + $0x154] ss:$12 sps:$4 sm:$0xff]   ;;  %v3705_v38 = vld [vmem:[%s5182_s1 + $0x150] ss:$12 sps:$4 sm:$0xff]  }
  0x19   : > { %v3703_v37 = vld [vmem:[%s5182_s1 + $0x2d4] ss:$12 sps:$4 sm:$0xff]   ;;  %s3621_s19 = smul.u32 144, %s5193_s21  ;;  %v3706_v39 = vld [vmem:[%s5182_s1 + $0x2d0] ss:$12 sps:$4 sm:$0xff]  }
  0x1a   : > { %1529 = vmatpush1.bf16.msra.mxu0 %v3669_v14  ;;  %v3707_v40 = vld [vmem:[%s5182_s1 + $0x13c] ss:$12 sps:$4 sm:$0xff]   ;;  %v3711_v42 = vld [vmem:[%s5182_s1 + $0x138] ss:$12 sps:$4 sm:$0xff]   ;;  %v3717_v50 = vld [vmem:[%s5182_s1 + $0x120] ss:$12 sps:$4 sm:$0xff]  }
  0x1b   : > { %1580 = vmatpush1.bf16.msra.mxu1 %v3670_v15  ;;  %1530 = vmatprep.subr.bf16.mxu0 %v3671_v16  ;;  %v3709_v41 = vld [vmem:[%s5182_s1 + $0x2bc] ss:$12 sps:$4 sm:$0xff]   ;;  %v3712_v43 = vld [vmem:[%s5182_s1 + $0x2b8] ss:$12 sps:$4 sm:$0xff]   ;;  %s4250_s12 = scalar_lea.vmem %s5181_s0, %s3621_s19  ;;  %v3718_v51 = vld [vmem:[%s5182_s1 + $0x2a0] ss:$12 sps:$4 sm:$0xff]  }
  0x1c   : > { %1581 = vmatprep.subr.bf16.mxu1 %v3673_v17  ;;  %v3713_v44 = vld [vmem:[%s5182_s1 + $0x124] ss:$12 sps:$4 sm:$0xff]   ;;  %v324_v46 = vld [vmem:[%s4250_s12 + $0x8] sm:$0xff]  ;;  %v330_v47 = vld [vmem:[%s4250_s12 + $0x38] sm:$0xff]  ;;  %s3622_s11 = smul.u32 36, %s5193_s21 }
  0x1d   : > { %v3715_v45 = vld [vmem:[%s5182_s1 + $0x2a4] ss:$12 sps:$4 sm:$0xff]   ;;  %v326_v48 = vld [vmem:[%s4250_s12 + $0x18] sm:$0xff]  ;;  %v332_v49 = vld [vmem:[%s4250_s12 + $0x48] sm:$0xff]  ;;  %v4271_v53 = vpack.c.bf16 %v330_v47, %v324_v46 }
  0x1e   : > { %1531 = vmatpush1.bf16.msra.mxu0 %v3675_v18  ;;  %v3719_v52 = vld [vmem:[%s5182_s1 + $0x10c] ss:$12 sps:$4 sm:$0xff]   ;;  %v4273_v54 = vpack.c.bf16 %v332_v49, %v326_v48  ;;  %v3723_v56 = vld [vmem:[%s5182_s1 + $0x108] ss:$12 sps:$4 sm:$0xff]   ;;  %v3729_v60 = vld [vmem:[%s5182_s1 + $0xf0] ss:$12 sps:$4 sm:$0xff]   ;;  %s5130_s15 = scalar_lea.vmem %s5186_s5, %s3622_s11  ;;  %s5162_s20 = scalar_lea.vmem %s5187_s6, %s3622_s11 }
  0x1f   : > { %1582 = vmatpush1.bf16.msra.mxu1 %v3676_v19  ;;  %1532 = vmatprep.subr.bf16.mxu0 %v3677_v20  ;;  %v3721_v55 = vld [vmem:[%s5182_s1 + $0x28c] ss:$12 sps:$4 sm:$0xff]   ;;  %v3724_v57 = vld [vmem:[%s5182_s1 + $0x288] ss:$12 sps:$4 sm:$0xff]   ;;  %v3730_v61 = vld [vmem:[%s5182_s1 + $0x270] ss:$12 sps:$4 sm:$0xff]  }
  0x20   : > { %1583 = vmatprep.subr.bf16.mxu1 %v3679_v21  ;;  %1554 = vmatprep.mubr.bf16.mxu0 %v4271_v53  ;;  %v3725_v58 = vld [vmem:[%s5182_s1 + $0xf4] ss:$12 sps:$4 sm:$0xff]   ;;  %v3731_v62 = vld [vmem:[%s5182_s1 + $0xdc] ss:$12 sps:$4 sm:$0xff]   ;;  %v3735_v0 = vld [vmem:[%s5182_s1 + $0xd8] ss:$12 sps:$4 sm:$0xff]  }
  0x21   : > { %1605 = vmatprep.mubr.bf16.mxu1 %v4273_v54  ;;  %v3727_v59 = vld [vmem:[%s5182_s1 + $0x274] ss:$12 sps:$4 sm:$0xff]   ;;  %v3733_v63 = vld [vmem:[%s5182_s1 + $0x25c] ss:$12 sps:$4 sm:$0xff]   ;;  %v3736_v1 = vld [vmem:[%s5182_s1 + $0x258] ss:$12 sps:$4 sm:$0xff]  }
  0x22   : > { %1533 = vmatpush1.bf16.msra.mxu0 %v3681_v22  ;;  %v3737_v2 = vld [vmem:[%s5182_s1 + $0xc4] ss:$12 sps:$4 sm:$0xff]   ;;  %v3741_v4 = vld [vmem:[%s5182_s1 + $0xc0] ss:$12 sps:$4 sm:$0xff]   ;;  %v3743_v14 = vld [vmem:[%s5182_s1 + $0x3a8] ss:$12 sps:$4 sm:$0xff]  }
  0x23   : > { %1584 = vmatpush1.bf16.msra.mxu1 %v3682_v23  ;;  %1534 = vmatprep.subr.bf16.mxu0 %v3683_v24  ;;  %v3739_v3 = vld [vmem:[%s5182_s1 + $0x244] ss:$12 sps:$4 sm:$0xff]   ;;  %v3742_v5 = vld [vmem:[%s5182_s1 + $0x240] ss:$12 sps:$4 sm:$0xff]   ;;  %v338_v15 = vld [vmem:[%s4250_s12 + $0x78] sm:$0xff] }
  0x24   : > { %1585 = vmatprep.subr.bf16.mxu1 %v3685_v25  ;;  %v323_v6 = vld [vmem:[%s4250_s12] sm:$0xff]  ;;  %v329_v7 = vld [vmem:[%s4250_s12 + $0x30] sm:$0xff]  ;;  %v3745_v10 = vld [vmem:[%s5182_s1 + $0x3ac] ss:$12 sps:$4 sm:$0xff]   ;;  %v4355_v21 = vpack.c.bf16 %v338_v15, %v338_v15 }
  0x25   : > { %v325_v8 = vld [vmem:[%s4250_s12 + $0x10] sm:$0xff]  ;;  %v331_v9 = vld [vmem:[%s4250_s12 + $0x40] sm:$0xff]  ;;  %v4332_v12 = vpack.c.bf16 %v329_v7, %v323_v6  ;;  %v336_v22 = vld [vmem:[%s4250_s12 + $0x68] sm:$0xff] }
  0x26   : > { %1535 = vmatpush1.bf16.msra.mxu0 %v3687_v26  ;;  %v3746_v11 = vld [vmem:[%s5182_s1 + $0x170] ss:$12 sps:$4 sm:$0xff]   ;;  %v4334_v13 = vpack.c.bf16 %v331_v9, %v325_v8  ;;  %v3750_v17 = vld [vmem:[%s5182_s1 + $0x394] ss:$12 sps:$4 sm:$0xff]   ;;  %v3751_v18 = vld [vmem:[%s5182_s1 + $0x158] ss:$12 sps:$4 sm:$0xff]   ;;  %v4364_v25 = vpack.c.bf16 %v336_v22, %v336_v22 }
  0x27   : > { %1586 = vmatpush1.bf16.msra.mxu1 %v3688_v27  ;;  %1536 = vmatprep.subr.bf16.mxu0 %v3689_v28  ;;  %v3747_v16 = vld [vmem:[%s5182_s1 + $0xb0] ss:$12 sps:$4 sm:$0xff]   ;;  %v3752_v20 = vld [vmem:[%s5182_s1 + $0x98] ss:$12 sps:$4 sm:$0xff]   ;;  %v3756_v27 = vld [vmem:[%s5182_s1 + $0x140] ss:$12 sps:$4 sm:$0xff]  }
  0x28   : > { %1587 = vmatprep.subr.bf16.mxu1 %v3691_v29  ;;  %v3748_v19 = vld [vmem:[%s5182_s1 + $0x390] ss:$12 sps:$4 sm:$0xff]   ;;  %v335_v26 = vld [vmem:[%s4250_s12 + $0x60] sm:$0xff]  ;;  %v3781_v49 = vld [vmem:[%s5182_s1 + $0xc8] ss:$12 sps:$4 sm:$0xff]  }
  0x29   : > { %v3755_v23 = vld [vmem:[%s5182_s1 + $0x37c] ss:$12 sps:$4 sm:$0xff]   ;;  %v337_v24 = vld [vmem:[%s4250_s12 + $0x70] sm:$0xff]  ;;  %v3753_v28 = vld [vmem:[%s5182_s1 + $0x378] ss:$12 sps:$4 sm:$0xff]  }
  0x2a   : > { %1537 = vmatpush1.bf16.msra.mxu0 %v3693_v30  ;;  %v3757_v29 = vld [vmem:[%s5182_s1 + $0x80] ss:$12 sps:$4 sm:$0xff]   ;;  %v4378_v30 = vpack.c.bf16 %v337_v24, %v337_v24  ;;  %v3773_v46 = vld [vmem:[%s5182_s1 + $0x318] ss:$12 sps:$4 sm:$0xff]   ;;  %v3801_v6 = vld [vmem:[%s5182_s1 + $0x2a8] ss:$12 sps:$4 sm:$0xff]  }
  0x2b   : > { %1588 = vmatpush1.bf16.msra.mxu1 %v3694_v31  ;;  %1538 = vmatprep.subr.bf16.mxu0 %v3695_v32  ;;  %v4380_v31 = vpack.c.bf16 %v335_v26, %v335_v26  ;;  %v3760_v32 = vld [vmem:[%s5182_s1 + $0x364] ss:$12 sps:$4 sm:$0xff]   ;;  %v3777_v47 = vld [vmem:[%s5182_s1 + $0x20] ss:$12 sps:$4 sm:$0xff]   ;;  %v3802_v8 = vld [vmem:[%s5182_s1 + $0x1e8] ss:$12 sps:$4 sm:$0xff]  }
  0x2c   : > { %1589 = vmatprep.subr.bf16.mxu1 %v3697_v33  ;;  %v3761_v33 = vld [vmem:[%s5182_s1 + $0x128] ss:$12 sps:$4 sm:$0xff]   ;;  %v3780_v48 = vld [vmem:[%s5182_s1 + $0x304] ss:$12 sps:$4 sm:$0xff]   ;;  %v3798_v7 = vld [vmem:[%s5182_s1 + $0x420] ss:$12 sps:$4 sm:$0xff]  }
  0x2d   : > { %v3805_v9 = vld [vmem:[%s5182_s1 + $0x40c] ss:$12 sps:$4 sm:$0xff]   ;;  %v3810_v15 = vld [vmem:[%s5182_s1 + $0x3f4] ss:$12 sps:$4 sm:$0xff]   ;;  %v3820_v24 = vld [vmem:[%s5182_s1 + $0x3c4] ss:$12 sps:$4 sm:$0xff]  }
  0x2e   : > { %1539 = vmatpush2.bf16.msra.mxu0 %v3699_v34  ;;  %v3758_v34 = vld [vmem:[%s5182_s1 + $0x360] ss:$12 sps:$4 sm:$0xff]   ;;  %v3813_v22 = vld [vmem:[%s5182_s1 + $0x3d8] ss:$12 sps:$4 sm:$0xff]   ;;  %v3821_v26 = vld [vmem:[%s5182_s1 + $0x248] ss:$12 sps:$4 sm:$0xff]  }
  0x2f   : > { %1590 = vmatpush2.bf16.msra.mxu1 %v3700_v35  ;;  %1540 = vmatprep.subr.bf16.mxu0 %v3701_v36  ;;  %v3762_v35 = vld [vmem:[%s5182_s1 + $0x68] ss:$12 sps:$4 sm:$0xff]   ;;  %v3765_v36 = vld [vmem:[%s5182_s1 + $0x34c] ss:$12 sps:$4 sm:$0xff]  }
  0x30   : > { %1591 = vmatprep.subr.bf16.mxu1 %v3703_v37  ;;  %v3766_v37 = vld [vmem:[%s5182_s1 + $0x110] ss:$12 sps:$4 sm:$0xff]  }
  0x32   : > { %1541 = vmatpush2.bf16.msra.mxu0 %v3705_v38  ;;  %v3763_v38 = vld [vmem:[%s5182_s1 + $0x348] ss:$12 sps:$4 sm:$0xff]  }
  0x33   : > { %1592 = vmatpush2.bf16.msra.mxu1 %v3706_v39  ;;  %1542 = vmatprep.subr.bf16.mxu0 %v3707_v40  ;;  %v3767_v39 = vld [vmem:[%s5182_s1 + $0x50] ss:$12 sps:$4 sm:$0xff]   ;;  %v3770_v40 = vld [vmem:[%s5182_s1 + $0x334] ss:$12 sps:$4 sm:$0xff]  }
  0x34   : > { %1593 = vmatprep.subr.bf16.mxu1 %v3709_v41  ;;  %v3771_v41 = vld [vmem:[%s5182_s1 + $0xf8] ss:$12 sps:$4 sm:$0xff]  }
  0x36   : > { %1543 = vmatpush2.bf16.msra.mxu0 %v3711_v42  ;;  %v3768_v42 = vld [vmem:[%s5182_s1 + $0x330] ss:$12 sps:$4 sm:$0xff]  }
  0x37   : > { %1594 = vmatpush2.bf16.msra.mxu1 %v3712_v43  ;;  %1544 = vmatprep.subr.bf16.mxu0 %v3713_v44  ;;  %v3772_v43 = vld [vmem:[%s5182_s1 + $0x38] ss:$12 sps:$4 sm:$0xff]   ;;  %v3775_v44 = vld [vmem:[%s5182_s1 + $0x31c] ss:$12 sps:$4 sm:$0xff]  }
  0x38   : > { %1595 = vmatprep.subr.bf16.mxu1 %v3715_v45  ;;  %v3776_v45 = vld [vmem:[%s5182_s1 + $0xe0] ss:$12 sps:$4 sm:$0xff]  }
  0x3a   : > { %1545 = vmatpush2.bf16.msra.mxu0 %v3717_v50  ;;  %v3778_v50 = vld [vmem:[%s5182_s1 + $0x300] ss:$12 sps:$4 sm:$0xff]  }
  0x3b   : > { %1596 = vmatpush2.bf16.msra.mxu1 %v3718_v51  ;;  %1546 = vmatprep.subr.bf16.mxu0 %v3719_v52  ;;  %v3782_v51 = vld [vmem:[%s5182_s1 + $0x8] ss:$12 sps:$4 sm:$0xff]   ;;  %v3785_v52 = vld [vmem:[%s5182_s1 + $0x46c] ss:$12 sps:$4 sm:$0xff]  }
  0x3c   : > { %1597 = vmatprep.subr.bf16.mxu1 %v3721_v55  ;;  %v3786_v55 = vld [vmem:[%s5182_s1 + $0x2f0] ss:$12 sps:$4 sm:$0xff]  }
  0x3e   : > { %1547 = vmatpush2.bf16.msra.mxu0 %v3723_v56  ;;  %v3783_v56 = vld [vmem:[%s5182_s1 + $0x468] ss:$12 sps:$4 sm:$0xff]  }
  0x3f   : > { %1598 = vmatpush2.bf16.msra.mxu1 %v3724_v57  ;;  %1548 = vmatprep.subr.bf16.mxu0 %v3725_v58  ;;  %v3787_v57 = vld [vmem:[%s5182_s1 + $0x230] ss:$12 sps:$4 sm:$0xff]   ;;  %v3790_v58 = vld [vmem:[%s5182_s1 + $0x454] ss:$12 sps:$4 sm:$0xff]  }
  0x40   : > { %1599 = vmatprep.subr.bf16.mxu1 %v3727_v59  ;;  %v3791_v59 = vld [vmem:[%s5182_s1 + $0x2d8] ss:$12 sps:$4 sm:$0xff]  }
  0x42   : > { %1549 = vmatpush2.bf16.msra.mxu0 %v3729_v60  ;;  %v3788_v60 = vld [vmem:[%s5182_s1 + $0x450] ss:$12 sps:$4 sm:$0xff]  }
  0x43   : > { %1600 = vmatpush2.bf16.msra.mxu1 %v3730_v61  ;;  %1550 = vmatprep.subr.bf16.mxu0 %v3731_v62  ;;  %v3792_v61 = vld [vmem:[%s5182_s1 + $0x218] ss:$12 sps:$4 sm:$0xff]   ;;  %v3795_v62 = vld [vmem:[%s5182_s1 + $0x43c] ss:$12 sps:$4 sm:$0xff]  }
  0x44   : > { %1601 = vmatprep.subr.bf16.mxu1 %v3733_v63  ;;  %v328_v63 = vld [vmem:[%s4250_s12 + $0x28] sm:$0xff] }
  0x46   : > { %1551 = vmatpush2.bf16.msra.mxu0 %v3735_v0  ;;  %v334_v0 = vld [vmem:[%s4250_s12 + $0x58] sm:$0xff] }
  0x47   : > { %1602 = vmatpush2.bf16.msra.mxu1 %v3736_v1  ;;  %1552 = vmatprep.subr.bf16.mxu0 %v3737_v2  ;;  %v3796_v1 = vld [vmem:[%s5182_s1 + $0x2c0] ss:$12 sps:$4 sm:$0xff]   ;;  %v4478_v2 = vpack.c.bf16 %v334_v0, %v328_v63  ;;  %v3852_v63 = vld [vmem:[%s5182_s1 + $0x338] ss:$12 sps:$4 sm:$0xff]  }
  0x48   : > { %1603 = vmatprep.subr.bf16.mxu1 %v3739_v3  ;;  %v3793_v3 = vld [vmem:[%s5182_s1 + $0x438] ss:$12 sps:$4 sm:$0xff]   ;;  %v3853_v0 = vld [vmem:[%s5182_s1 + $0x3e0] ss:$12 sps:$4 sm:$0xff]  }
  0x4a   : > { %1553 = vmatpush2.bf16.msra.mxu0 %v3741_v4  ;;  %v3797_v4 = vld [vmem:[%s5182_s1 + $0x200] ss:$12 sps:$4 sm:$0xff]  }
  0x4b   : > { %1604 = vmatpush2.bf16.msra.mxu1 %v3742_v5  ;;  %1624 = vmatprep.subr.bf16.mxu0 %v3745_v10  ;;  %v3800_v5 = vld [vmem:[%s5182_s1 + $0x424] ss:$12 sps:$4 sm:$0xff]  }
  0x4c   : > { %3453 = vmatprep.subr.bf16.mxu1 %v3746_v11  ;;  %v3806_v10 = vld [vmem:[%s5182_s1 + $0x290] ss:$12 sps:$4 sm:$0xff]   ;;  %v3803_v11 = vld [vmem:[%s5182_s1 + $0x408] ss:$12 sps:$4 sm:$0xff]  }
  0x4d   : > { %1555 = vmatmul.mubr.bf16.vlgmr.msra.gmra.mxu0 %v4332_v12 }
  0x4e   : > { %1606 = vmatmul.mubr.bf16.vlgmr.msra.gmra.mxu1 %v4334_v13  ;;  %1625 = vmatpush1.bf16.msra.mxu0 %v3743_v14  ;;  %v3807_v14 = vld [vmem:[%s5182_s1 + $0x1d0] ss:$12 sps:$4 sm:$0xff]  }
  0x4f   : > { %3454 = vmatpush3.bf16.msra.mxu1 %v3747_v16  ;;  %1626 = vmatprep.subr.bf16.mxu0 %v3750_v17  ;;  %v3811_v16 = vld [vmem:[%s5182_s1 + $0x278] ss:$12 sps:$4 sm:$0xff]   ;;  %v3808_v17 = vld [vmem:[%s5182_s1 + $0x3f0] ss:$12 sps:$4 sm:$0xff]  }
  0x50   : > { %3455 = vmatprep.subr.bf16.mxu1 %v3751_v18  ;;  %1615 = vmatprep.mubr.bf16.mxu1 %v4355_v21  ;;  %v3812_v18 = vld [vmem:[%s5182_s1 + $0x1b8] ss:$12 sps:$4 sm:$0xff]  }
  0x51   : > { %1564 = vmatprep.mubr.bf16.mxu0 %v4364_v25 }
  0x52   : > { %1627 = vmatpush1.bf16.msra.mxu0 %v3748_v19  ;;  %v3815_v19 = vld [vmem:[%s5182_s1 + $0x3dc] ss:$12 sps:$4 sm:$0xff]  }
  0x53   : > { %3456 = vmatpush3.bf16.msra.mxu1 %v3752_v20  ;;  %1628 = vmatprep.subr.bf16.mxu0 %v3755_v23  ;;  %v3816_v20 = vld [vmem:[%s5182_s1 + $0x260] ss:$12 sps:$4 sm:$0xff]  }
  0x54   : > { %3457 = vmatprep.subr.bf16.mxu1 %v3756_v27  ;;  %v3817_v23 = vld [vmem:[%s5182_s1 + $0x1a0] ss:$12 sps:$4 sm:$0xff]  }
  0x55   : > { %1565 = vmatmul.mubr.bf16.gmra.mxu0 %v4380_v31  ;;  %v3818_v27 = vld [vmem:[%s5182_s1 + $0x3c0] ss:$12 sps:$4 sm:$0xff]  }
  0x56   : > { %1616 = vmatmul.mubr.bf16.gmra.mxu1 %v4378_v30  ;;  %1629 = vmatpush1.bf16.msra.mxu0 %v3753_v28  ;;  %v3822_v28 = vld [vmem:[%s5182_s1 + $0x188] ss:$12 sps:$4 sm:$0xff]  }
  0x57   : > { %3458 = vmatpush3.bf16.msra.mxu1 %v3757_v29  ;;  %1630 = vmatprep.subr.bf16.mxu0 %v3760_v32  ;;  %v327_v29 = vld [vmem:[%s4250_s12 + $0x20] sm:$0xff]  ;;  %v333_v32 = vld [vmem:[%s4250_s12 + $0x50] sm:$0xff] }
  0x58   : > { %3459 = vmatprep.subr.bf16.mxu1 %v3761_v33  ;;  %1707 = vmatprep.mubr.bf16.mxu1 %v4271_v53  ;;  %v3823_v33 = vld [vmem:[%s5182_s1 + $0x470] ss:$12 sps:$4 sm:$0xff]  }
  0x59   : > { %1656 = vmatprep.mubr.bf16.mxu0 %v4478_v2 }
  0x5a   : > { %1631 = vmatpush1.bf16.msra.mxu0 %v3758_v34  ;;  %v3826_v34 = vld [vmem:[%s5183_s2 + $0xac] ss:$12 sps:$4 sm:$0xff]  }
  0x5b   : > { %3460 = vmatpush3.bf16.msra.mxu1 %v3762_v35  ;;  %1632 = vmatprep.subr.bf16.mxu0 %v3765_v36  ;;  %v4558_v35 = vpack.c.bf16 %v333_v32, %v327_v29  ;;  %v3824_v36 = vld [vmem:[%s5183_s2 + $0xa8] ss:$12 sps:$4 sm:$0xff]   ;;  %v3889_v29 = vld [vmem:[%s5183_s2 + $0x10c] ss:$12 sps:$4 sm:$0xff]  }
  0x5c   : > { %3461 = vmatprep.subr.bf16.mxu1 %v3766_v37  ;;  %v340_v37 = vld [vmem:[%s4250_s12 + $0x88] sm:$0xff] }
  0x5d   : > { %v3892_v32 = vld [vmem:[%s5183_s2 + $0x1cc] ss:$12 sps:$4 sm:$0xff]  }
  0x5e   : > { %1633 = vmatpush1.bf16.msra.mxu0 %v3763_v38  ;;  %v3827_v38 = vld [vmem:[%s5182_s1 + $0x3b0] ss:$12 sps:$4 sm:$0xff]  }
  0x5f   : > { %3462 = vmatpush3.bf16.msra.mxu1 %v3767_v39  ;;  %1634 = vmatprep.subr.bf16.mxu0 %v3770_v40  ;;  %v3828_v39 = vld [vmem:[%s5182_s1 + $0x458] ss:$12 sps:$4 sm:$0xff]   ;;  %v3831_v40 = vld [vmem:[%s5183_s2 + $0x94] ss:$12 sps:$4 sm:$0xff]  }
  0x60   : > { %3463 = vmatprep.subr.bf16.mxu1 %v3771_v41  ;;  %v4573_v41 = vpack.c.bf16 %v340_v37, %v340_v37  ;;  %v3898_v37 = vld [vmem:[%s5183_s2 + $0x1b4] ss:$12 sps:$4 sm:$0xff]  }
  0x62   : > { %1635 = vmatpush1.bf16.msra.mxu0 %v3768_v42  ;;  %v3829_v42 = vld [vmem:[%s5183_s2 + $0x90] ss:$12 sps:$4 sm:$0xff]  }
  0x63   : > { %3464 = vmatpush3.bf16.msra.mxu1 %v3772_v43  ;;  %1636 = vmatprep.subr.bf16.mxu0 %v3775_v44  ;;  %v3832_v43 = vld [vmem:[%s5182_s1 + $0x398] ss:$12 sps:$4 sm:$0xff]  }
  0x64   : > { %3465 = vmatprep.subr.bf16.mxu1 %v3776_v45  ;;  %v339_v44 = vld [vmem:[%s4250_s12 + $0x80] sm:$0xff] }
  0x65   : > { %v3833_v45 = vld [vmem:[%s5182_s1 + $0x440] ss:$12 sps:$4 sm:$0xff]  }
  0x66   : > { %1637 = vmatpush1.bf16.msra.mxu0 %v3773_v46  ;;  %v3836_v46 = vld [vmem:[%s5183_s2 + $0x7c] ss:$12 sps:$4 sm:$0xff]  }
  0x67   : > { %3466 = vmatpush3.bf16.msra.mxu1 %v3777_v47  ;;  %1638 = vmatprep.subr.bf16.mxu0 %v3780_v48  ;;  %v4592_v47 = vpack.c.bf16 %v339_v44, %v339_v44  ;;  %v3834_v48 = vld [vmem:[%s5183_s2 + $0x78] ss:$12 sps:$4 sm:$0xff]  }
  0x68   : > { %3467 = vmatprep.subr.bf16.mxu1 %v3781_v49  ;;  %v3837_v49 = vld [vmem:[%s5182_s1 + $0x380] ss:$12 sps:$4 sm:$0xff]   ;;  %v3902_v44 = vld [vmem:[%s5183_s2 + $0x198] ss:$12 sps:$4 sm:$0xff]  }
  0x6a   : > { %1639 = vmatpush1.bf16.msra.mxu0 %v3778_v50  ;;  %v3838_v50 = vld [vmem:[%s5182_s1 + $0x428] ss:$12 sps:$4 sm:$0xff]  }
  0x6b   : > { %3468 = vmatpush3.bf16.msra.mxu1 %v3782_v51  ;;  %1640 = vmatprep.subr.bf16.mxu0 %v3785_v52  ;;  %v3841_v51 = vld [vmem:[%s5183_s2 + $0x64] ss:$12 sps:$4 sm:$0xff]   ;;  %v3839_v52 = vld [vmem:[%s5183_s2 + $0x60] ss:$12 sps:$4 sm:$0xff]  }
  0x6c   : > { %3481 = vmatprep.subr.bf16.mxu1 %v3786_v55  ;;  %v3842_v55 = vld [vmem:[%s5182_s1 + $0x368] ss:$12 sps:$4 sm:$0xff]  }
  0x6e   : > { %1708 = vmatmul.mubr.bf16.vlgmr.msra.gmra.mxu1 %v4332_v12  ;;  %1641 = vmatpush2.bf16.msra.mxu0 %v3783_v56  ;;  %v3843_v56 = vld [vmem:[%s5182_s1 + $0x410] ss:$12 sps:$4 sm:$0xff]  }
  0x6f   : > { %3482 = vmatpush3.bf16.msra.mxu1 %v3787_v57  ;;  %1642 = vmatprep.subr.bf16.mxu0 %v3790_v58  ;;  %v3846_v57 = vld [vmem:[%s5183_s2 + $0x4c] ss:$12 sps:$4 sm:$0xff]   ;;  %v3844_v58 = vld [vmem:[%s5183_s2 + $0x48] ss:$12 sps:$4 sm:$0xff]  }
  0x70   : > { %3483 = vmatprep.subr.bf16.mxu1 %v3791_v59  ;;  %1715 = vmatprep.mubr.bf16.mxu1 %v4364_v25  ;;  %v3847_v59 = vld [vmem:[%s5182_s1 + $0x350] ss:$12 sps:$4 sm:$0xff]  }
  0x72   : > { %1643 = vmatpush2.bf16.msra.mxu0 %v3788_v60  ;;  %v3848_v60 = vld [vmem:[%s5182_s1 + $0x3f8] ss:$12 sps:$4 sm:$0xff]  }
  0x73   : > { %3484 = vmatpush3.bf16.msra.mxu1 %v3792_v61  ;;  %1644 = vmatprep.subr.bf16.mxu0 %v3795_v62  ;;  %v3851_v61 = vld [vmem:[%s5183_s2 + $0x34] ss:$12 sps:$4 sm:$0xff]   ;;  %v3849_v62 = vld [vmem:[%s5183_s2 + $0x30] ss:$12 sps:$4 sm:$0xff]  }
  0x74   : > { %3485 = vmatprep.subr.bf16.mxu1 %v3796_v1  ;;  %v3856_v1 = vld [vmem:[%s5183_s2 + $0x1c] ss:$12 sps:$4 sm:$0xff]  }
  0x76   : > { %1716 = vmatmul.mubr.bf16.gmra.mxu1 %v4380_v31  ;;  %1645 = vmatpush2.bf16.msra.mxu0 %v3793_v3  ;;  %v3854_v3 = vld [vmem:[%s5183_s2 + $0x18] ss:$12 sps:$4 sm:$0xff]  }
  0x77   : > { %3486 = vmatpush3.bf16.msra.mxu1 %v3797_v4  ;;  %1646 = vmatprep.subr.bf16.mxu0 %v3800_v5  ;;  %v3857_v4 = vld [vmem:[%s5182_s1 + $0x320] ss:$12 sps:$4 sm:$0xff]   ;;  %v3858_v5 = vld [vmem:[%s5182_s1 + $0x3c8] ss:$12 sps:$4 sm:$0xff]  }
  0x78   : > { %3487 = vmatprep.subr.bf16.mxu1 %v3801_v6  ;;  %1755 = vmatprep.mubr.bf16.mxu1 %v4273_v54  ;;  %v3861_v6 = vld [vmem:[%s5183_s2 + $0x4] ss:$12 sps:$4 sm:$0xff]  }
  0x7a   : > { %1647 = vmatpush2.bf16.msra.mxu0 %v3798_v7  ;;  %v3859_v7 = vld [vmem:[%s5183_s2] ss:$12 sps:$4 sm:$0xff]  }
  0x7b   : > { %3488 = vmatpush3.bf16.msra.mxu1 %v3802_v8  ;;  %1648 = vmatprep.subr.bf16.mxu0 %v3805_v9  ;;  %v3862_v8 = vld [vmem:[%s5182_s1 + $0x308] ss:$12 sps:$4 sm:$0xff]   ;;  %v3865_v9 = vld [vmem:[%s5183_s2 + $0x16c] ss:$12 sps:$4 sm:$0xff]  }
  0x7c   : > { %3489 = vmatprep.subr.bf16.mxu1 %v3806_v10  ;;  %v3868_v10 = vld [vmem:[%s5183_s2 + $0x22c] ss:$12 sps:$4 sm:$0xff]  }
  0x7e   : > { %1649 = vmatpush2.bf16.msra.mxu0 %v3803_v11  ;;  %v3863_v11 = vld [vmem:[%s5183_s2 + $0x168] ss:$12 sps:$4 sm:$0xff]  }
  0x7f   : > { %3490 = vmatpush3.bf16.msra.mxu1 %v3807_v14  ;;  %1650 = vmatprep.subr.bf16.mxu0 %v3810_v15  ;;  %v3866_v14 = vld [vmem:[%s5183_s2 + $0x228] ss:$12 sps:$4 sm:$0xff]  }
  0x80   : > { %3491 = vmatprep.subr.bf16.mxu1 %v3811_v16  ;;  %v3871_v15 = vld [vmem:[%s5183_s2 + $0x154] ss:$12 sps:$4 sm:$0xff]  }
  0x81   : > { %v3874_v16 = vld [vmem:[%s5183_s2 + $0x214] ss:$12 sps:$4 sm:$0xff]  }
  0x82   : > { %1651 = vmatpush2.bf16.msra.mxu0 %v3808_v17  ;;  %v3869_v17 = vld [vmem:[%s5183_s2 + $0x150] ss:$12 sps:$4 sm:$0xff]  }
  0x83   : > { %3492 = vmatpush3.bf16.msra.mxu1 %v3812_v18  ;;  %1652 = vmatprep.subr.bf16.mxu0 %v3815_v19  ;;  %v3872_v18 = vld [vmem:[%s5183_s2 + $0x210] ss:$12 sps:$4 sm:$0xff]  }
  0x84   : > { %3493 = vmatprep.subr.bf16.mxu1 %v3816_v20  ;;  %v3877_v19 = vld [vmem:[%s5183_s2 + $0x13c] ss:$12 sps:$4 sm:$0xff]  }
  0x85   : > { %v3880_v20 = vld [vmem:[%s5183_s2 + $0x1fc] ss:$12 sps:$4 sm:$0xff]  }
  0x86   : > { %1653 = vmatpush2.bf16.msra.mxu0 %v3813_v22  ;;  %v3875_v22 = vld [vmem:[%s5183_s2 + $0x138] ss:$12 sps:$4 sm:$0xff]  }
  0x87   : > { %3494 = vmatpush3.bf16.msra.mxu1 %v3817_v23  ;;  %1654 = vmatprep.subr.bf16.mxu0 %v3820_v24  ;;  %v3878_v23 = vld [vmem:[%s5183_s2 + $0x1f8] ss:$12 sps:$4 sm:$0xff]  }
  0x88   : > { %3495 = vmatprep.subr.bf16.mxu1 %v3821_v26  ;;  %v3883_v24 = vld [vmem:[%s5183_s2 + $0x124] ss:$12 sps:$4 sm:$0xff]  }
  0x89   : > { %v3886_v26 = vld [vmem:[%s5183_s2 + $0x1e4] ss:$12 sps:$4 sm:$0xff]  }
  0x8a   : > { %1655 = vmatpush2.bf16.msra.mxu0 %v3818_v27  ;;  %v3881_v27 = vld [vmem:[%s5183_s2 + $0x120] ss:$12 sps:$4 sm:$0xff]  }
  0x8b   : > { %3496 = vmatpush3.bf16.msra.mxu1 %v3822_v28  ;;  %3509 = vmatprep.subr.bf16.mxu0 %v3823_v33  ;;  %v3884_v28 = vld [vmem:[%s5183_s2 + $0x1e0] ss:$12 sps:$4 sm:$0xff]   ;;  %v3887_v33 = vld [vmem:[%s5183_s2 + $0x108] ss:$12 sps:$4 sm:$0xff]  }
  0x8c   : > { %2643 = vmatprep.subr.bf16.mxu1 %v3826_v34  ;;  %v3890_v34 = vld [vmem:[%s5183_s2 + $0x1c8] ss:$12 sps:$4 sm:$0xff]  }
  0x8d   : > { %1657 = vmatmul.mubr.bf16.vlgmr.msra.gmra.mxu0 %v4558_v35 }
  0x8e   : > { %1756 = vmatmul.mubr.bf16.vlgmr.msra.gmra.mxu1 %v4334_v13  ;;  %3510 = vmatpush3.bf16.msra.mxu0 %v3827_v38  ;;  %v3893_v38 = vld [vmem:[%s5183_s2 + $0xf0] ss:$12 sps:$4 sm:$0xff]  }
  0x8f   : > { %2644 = vmatpush1.bf16.msra.mxu1 %v3824_v36  ;;  %3511 = vmatprep.subr.bf16.mxu0 %v3828_v39  ;;  %v3895_v36 = vld [vmem:[%s5183_s2 + $0xf4] ss:$12 sps:$4 sm:$0xff]   ;;  %v3896_v39 = vld [vmem:[%s5183_s2 + $0x1b0] ss:$12 sps:$4 sm:$0xff]  }
  0x90   : > { %2645 = vmatprep.subr.bf16.mxu1 %v3831_v40  ;;  %1666 = vmatprep.mubr.bf16.mxu0 %v4573_v41  ;;  %v3901_v40 = vld [vmem:[%s5183_s2 + $0xdc] ss:$12 sps:$4 sm:$0xff]  }
  0x91   : > { %1763 = vmatprep.mubr.bf16.mxu1 %v4355_v21 }
  0x92   : > { %3512 = vmatpush3.bf16.msra.mxu0 %v3832_v43  ;;  %v3899_v43 = vld [vmem:[%s5183_s2 + $0xd8] ss:$12 sps:$4 sm:$0xff]  }
  0x93   : > { %2646 = vmatpush1.bf16.msra.mxu1 %v3829_v42  ;;  %3513 = vmatprep.subr.bf16.mxu0 %v3833_v45  ;;  %v3904_v42 = vld [vmem:[%s5183_s2 + $0x19c] ss:$12 sps:$4 sm:$0xff]   ;;  %v3907_v45 = vld [vmem:[%s5183_s2 + $0xc4] ss:$12 sps:$4 sm:$0xff]  }
  0x94   : > { %2647 = vmatprep.subr.bf16.mxu1 %v3836_v46  ;;  %v3910_v46 = vld [vmem:[%s5183_s2 + $0x184] ss:$12 sps:$4 sm:$0xff]  }
  0x95   : > { %1667 = vmatmul.mubr.bf16.gmra.mxu0 %v4592_v47 }
  0x96   : > { %1764 = vmatmul.mubr.bf16.gmra.mxu1 %v4378_v30  ;;  %3514 = vmatpush3.bf16.msra.mxu0 %v3837_v49  ;;  %v3908_v49 = vld [vmem:[%s5183_s2 + $0x180] ss:$12 sps:$4 sm:$0xff]  }
  0x97   : > { %2648 = vmatpush1.bf16.msra.mxu1 %v3834_v48  ;;  %3515 = vmatprep.subr.bf16.mxu0 %v3838_v50  ;;  %v3905_v48 = vld [vmem:[%s5183_s2 + $0xc0] ss:$12 sps:$4 sm:$0xff]  }
  0x98   : > { %2649 = vmatprep.subr.bf16.mxu1 %v3841_v51  ;;  %1803 = vmatprep.mubr.bf16.mxu0 %v4478_v2  ;;  %v3913_v50 = vld [vmem:[%s5183_s2 + $0x2ec] ss:$12 sps:$4 sm:$0xff]  }
  0x99   : > { %2675 = vmatprep.mubr.bf16.mxu1 %v4271_v53  ;;  %v3916_v51 = vld [vmem:[%s5183_s2 + $0x3ac] ss:$12 sps:$4 sm:$0xff]  }
  0x9a   : > { %3516 = vmatpush3.bf16.msra.mxu0 %v3842_v55  ;;  %v3914_v55 = vld [vmem:[%s5183_s2 + $0x3a8] ss:$12 sps:$4 sm:$0xff]  }
  0x9b   : > { %2650 = vmatpush1.bf16.msra.mxu1 %v3839_v52  ;;  %3517 = vmatprep.subr.bf16.mxu0 %v3843_v56  ;;  %v3911_v52 = vld [vmem:[%s5183_s2 + $0x2e8] ss:$12 sps:$4 sm:$0xff]  }
  0x9c   : > { %2651 = vmatprep.subr.bf16.mxu1 %v3846_v57  ;;  %v3919_v56 = vld [vmem:[%s5183_s2 + $0x2d4] ss:$12 sps:$4 sm:$0xff]  }
  0x9d   : > { %v3922_v57 = vld [vmem:[%s5183_s2 + $0x394] ss:$12 sps:$4 sm:$0xff]  }
  0x9e   : > { %3518 = vmatpush3.bf16.msra.mxu0 %v3847_v59  ;;  %v3920_v59 = vld [vmem:[%s5183_s2 + $0x390] ss:$12 sps:$4 sm:$0xff]  }
  0x9f   : > { %2652 = vmatpush1.bf16.msra.mxu1 %v3844_v58  ;;  %3519 = vmatprep.subr.bf16.mxu0 %v3848_v60  ;;  %v3917_v58 = vld [vmem:[%s5183_s2 + $0x2d0] ss:$12 sps:$4 sm:$0xff]  }
  0xa0   : > { %2653 = vmatprep.subr.bf16.mxu1 %v3851_v61  ;;  %v3925_v60 = vld [vmem:[%s5183_s2 + $0x2bc] ss:$12 sps:$4 sm:$0xff]  }
  0xa1   : > { %v3928_v61 = vld [vmem:[%s5183_s2 + $0x37c] ss:$12 sps:$4 sm:$0xff]  }
  0xa2   : > { %3520 = vmatpush3.bf16.msra.mxu0 %v3852_v63  ;;  %v3926_v63 = vld [vmem:[%s5183_s2 + $0x378] ss:$12 sps:$4 sm:$0xff]  }
  0xa3   : > { %2654 = vmatpush1.bf16.msra.mxu1 %v3849_v62  ;;  %3521 = vmatprep.subr.bf16.mxu0 %v3853_v0  ;;  %v3923_v62 = vld [vmem:[%s5183_s2 + $0x2b8] ss:$12 sps:$4 sm:$0xff]  }
  0xa4   : > { %2655 = vmatprep.subr.bf16.mxu1 %v3856_v1  ;;  %v3931_v0 = vld [vmem:[%s5183_s2 + $0x2a4] ss:$12 sps:$4 sm:$0xff]  }
  0xa5   : > { %v3934_v1 = vld [vmem:[%s5183_s2 + $0x364] ss:$12 sps:$4 sm:$0xff]  }
  0xa6   : > { %3522 = vmatpush3.bf16.msra.mxu0 %v3857_v4  ;;  %v3932_v4 = vld [vmem:[%s5183_s2 + $0x360] ss:$12 sps:$4 sm:$0xff]  }
  0xa7   : > { %2656 = vmatpush1.bf16.msra.mxu1 %v3854_v3  ;;  %3523 = vmatprep.subr.bf16.mxu0 %v3858_v5  ;;  %v3929_v3 = vld [vmem:[%s5183_s2 + $0x2a0] ss:$12 sps:$4 sm:$0xff]  }
  0xa8   : > { %2657 = vmatprep.subr.bf16.mxu1 %v3861_v6  ;;  %v3937_v5 = vld [vmem:[%s5183_s2 + $0x28c] ss:$12 sps:$4 sm:$0xff]  }
  0xa9   : > { %v3940_v6 = vld [vmem:[%s5183_s2 + $0x34c] ss:$12 sps:$4 sm:$0xff]  }
  0xaa   : > { %3524 = vmatpush3.bf16.msra.mxu0 %v3862_v8  ;;  %v3938_v8 = vld [vmem:[%s5183_s2 + $0x348] ss:$12 sps:$4 sm:$0xff]  }
  0xab   : > { %2658 = vmatpush1.bf16.msra.mxu1 %v3859_v7  ;;  %2694 = vmatprep.subr.bf16.mxu0 %v3868_v10  ;;  %v3935_v7 = vld [vmem:[%s5183_s2 + $0x288] ss:$12 sps:$4 sm:$0xff]  }
  0xac   : > { %2659 = vmatprep.subr.bf16.mxu1 %v3865_v9  ;;  %v3943_v9 = vld [vmem:[%s5183_s2 + $0x274] ss:$12 sps:$4 sm:$0xff]  }
  0xad   : > { %1804 = vmatmul.mubr.bf16.vlgmr.msra.gmra.mxu0 %v4558_v35  ;;  %v3946_v10 = vld [vmem:[%s5183_s2 + $0x334] ss:$12 sps:$4 sm:$0xff]  }
  0xae   : > { %2695 = vmatpush1.bf16.msra.mxu0 %v3866_v14  ;;  %1811 = vmatprep.mubr.bf16.mxu0 %v4573_v41  ;;  %v3944_v14 = vld [vmem:[%s5183_s2 + $0x330] ss:$12 sps:$4 sm:$0xff]  }
  0xaf   : > { %2660 = vmatpush2.bf16.msra.mxu1 %v3863_v11  ;;  %2696 = vmatprep.subr.bf16.mxu0 %v3874_v16  ;;  %v3941_v11 = vld [vmem:[%s5183_s2 + $0x270] ss:$12 sps:$4 sm:$0xff]  }
  0xb0   : > { %2661 = vmatprep.subr.bf16.mxu1 %v3871_v15  ;;  %v3949_v15 = vld [vmem:[%s5183_s2 + $0x25c] ss:$12 sps:$4 sm:$0xff]  }
  0xb1   : > { %v3952_v16 = vld [vmem:[%s5183_s2 + $0x31c] ss:$12 sps:$4 sm:$0xff]  }
  0xb2   : > { %2697 = vmatpush1.bf16.msra.mxu0 %v3872_v18  ;;  %v3950_v18 = vld [vmem:[%s5183_s2 + $0x318] ss:$12 sps:$4 sm:$0xff]  }
  0xb3   : > { %2662 = vmatpush2.bf16.msra.mxu1 %v3869_v17  ;;  %2698 = vmatprep.subr.bf16.mxu0 %v3880_v20  ;;  %v3947_v17 = vld [vmem:[%s5183_s2 + $0x258] ss:$12 sps:$4 sm:$0xff]  }
  0xb4   : > { %2663 = vmatprep.subr.bf16.mxu1 %v3877_v19  ;;  %v3955_v19 = vld [vmem:[%s5183_s2 + $0x244] ss:$12 sps:$4 sm:$0xff]  }
  0xb5   : > { %1812 = vmatmul.mubr.bf16.gmra.mxu0 %v4592_v47  ;;  %v3958_v20 = vld [vmem:[%s5183_s2 + $0x304] ss:$12 sps:$4 sm:$0xff]  }
  0xb6   : > { %2699 = vmatpush1.bf16.msra.mxu0 %v3878_v23  ;;  %2726 = vmatprep.mubr.bf16.mxu0 %v4273_v54  ;;  %v3956_v23 = vld [vmem:[%s5183_s2 + $0x300] ss:$12 sps:$4 sm:$0xff]  }
  0xb7   : > { %2664 = vmatpush2.bf16.msra.mxu1 %v3875_v22  ;;  %2700 = vmatprep.subr.bf16.mxu0 %v3886_v26  ;;  %v3953_v22 = vld [vmem:[%s5183_s2 + $0x240] ss:$12 sps:$4 sm:$0xff]   ;;  %v3962_v26 = vld [vmem:[%s5183_s2 + $0x170] ss:$12 sps:$4 sm:$0xff]  }
  0xb8   : > { %2665 = vmatprep.subr.bf16.mxu1 %v3883_v24  ;;  %v3961_v24 = vld [vmem:[%s5183_s2 + $0x46c] ss:$12 sps:$4 sm:$0xff]  }
  0xba   : > { %2701 = vmatpush1.bf16.msra.mxu0 %v3884_v28  ;;  %v3963_v28 = vld [vmem:[%s5183_s2 + $0xb0] ss:$12 sps:$4 sm:$0xff]  }
  0xbb   : > { %2666 = vmatpush2.bf16.msra.mxu1 %v3881_v27  ;;  %2702 = vmatprep.subr.bf16.mxu0 %v3892_v32  ;;  %v3959_v27 = vld [vmem:[%s5183_s2 + $0x468] ss:$12 sps:$4 sm:$0xff]   ;;  %v3967_v32 = vld [vmem:[%s5183_s2 + $0x158] ss:$12 sps:$4 sm:$0xff]  }
  0xbc   : > { %2667 = vmatprep.subr.bf16.mxu1 %v3889_v29  ;;  %v3966_v29 = vld [vmem:[%s5183_s2 + $0x454] ss:$12 sps:$4 sm:$0xff]  }
  0xbe   : > { %2703 = vmatpush1.bf16.msra.mxu0 %v3890_v34  ;;  %v3968_v34 = vld [vmem:[%s5183_s2 + $0x98] ss:$12 sps:$4 sm:$0xff]  }
  0xbf   : > { %2668 = vmatpush2.bf16.msra.mxu1 %v3887_v33  ;;  %2704 = vmatprep.subr.bf16.mxu0 %v3898_v37  ;;  %v3964_v33 = vld [vmem:[%s5183_s2 + $0x450] ss:$12 sps:$4 sm:$0xff]   ;;  %v3972_v37 = vld [vmem:[%s5183_s2 + $0x140] ss:$12 sps:$4 sm:$0xff]  }
  0xc0   : > { %2669 = vmatprep.subr.bf16.mxu1 %v3895_v36  ;;  %v3971_v36 = vld [vmem:[%s5183_s2 + $0x43c] ss:$12 sps:$4 sm:$0xff]  }
  0xc2   : > { %2705 = vmatpush1.bf16.msra.mxu0 %v3896_v39  ;;  %v3973_v39 = vld [vmem:[%s5183_s2 + $0x80] ss:$12 sps:$4 sm:$0xff]  }
  0xc3   : > { %2670 = vmatpush2.bf16.msra.mxu1 %v3893_v38  ;;  %2706 = vmatprep.subr.bf16.mxu0 %v3904_v42  ;;  %v3969_v38 = vld [vmem:[%s5183_s2 + $0x438] ss:$12 sps:$4 sm:$0xff]   ;;  %v3977_v42 = vld [vmem:[%s5183_s2 + $0x128] ss:$12 sps:$4 sm:$0xff]  }
  0xc4   : > { %2671 = vmatprep.subr.bf16.mxu1 %v3901_v40  ;;  %v3976_v40 = vld [vmem:[%s5183_s2 + $0x424] ss:$12 sps:$4 sm:$0xff]  }
  0xc6   : > { %2707 = vmatpush1.bf16.msra.mxu0 %v3902_v44  ;;  %v3978_v44 = vld [vmem:[%s5183_s2 + $0x68] ss:$12 sps:$4 sm:$0xff]  }
  0xc7   : > { %2672 = vmatpush2.bf16.msra.mxu1 %v3899_v43  ;;  %2708 = vmatprep.subr.bf16.mxu0 %v3910_v46  ;;  %v3974_v43 = vld [vmem:[%s5183_s2 + $0x420] ss:$12 sps:$4 sm:$0xff]   ;;  %v3982_v46 = vld [vmem:[%s5183_s2 + $0x110] ss:$12 sps:$4 sm:$0xff]  }
  0xc8   : > { %2673 = vmatprep.subr.bf16.mxu1 %v3907_v45  ;;  %v3981_v45 = vld [vmem:[%s5183_s2 + $0x40c] ss:$12 sps:$4 sm:$0xff]  }
  0xca   : > { %2709 = vmatpush1.bf16.msra.mxu0 %v3908_v49  ;;  %v3983_v49 = vld [vmem:[%s5183_s2 + $0x50] ss:$12 sps:$4 sm:$0xff]  }
  0xcb   : > { %2674 = vmatpush2.bf16.msra.mxu1 %v3905_v48  ;;  %2710 = vmatprep.subr.bf16.mxu0 %v3913_v50  ;;  %v3979_v48 = vld [vmem:[%s5183_s2 + $0x408] ss:$12 sps:$4 sm:$0xff]  }
  0xcc   : > { %2745 = vmatprep.subr.bf16.mxu1 %v3916_v51  ;;  %v3986_v50 = vld [vmem:[%s5183_s2 + $0x3f4] ss:$12 sps:$4 sm:$0xff]   ;;  %v3984_v51 = vld [vmem:[%s5183_s2 + $0x3f0] ss:$12 sps:$4 sm:$0xff]  }
  0xce   : > { %2676 = vmatmul.mubr.bf16.vlgmr.msra.gmra.mxu1 %v4332_v12  ;;  %2711 = vmatpush2.bf16.msra.mxu0 %v3911_v52  ;;  %v3988_v52 = vld [vmem:[%s5183_s2 + $0x38] ss:$12 sps:$4 sm:$0xff]  }
  0xcf   : > { %2746 = vmatpush1.bf16.msra.mxu1 %v3914_v55  ;;  %2712 = vmatprep.subr.bf16.mxu0 %v3919_v56  ;;  %v3991_v55 = vld [vmem:[%s5183_s2 + $0x3dc] ss:$12 sps:$4 sm:$0xff]   ;;  %v3992_v56 = vld [vmem:[%s5183_s2 + $0xe0] ss:$12 sps:$4 sm:$0xff]  }
  0xd0   : > { %2747 = vmatprep.subr.bf16.mxu1 %v3922_v57  ;;  %2685 = vmatprep.mubr.bf16.mxu1 %v4364_v25  ;;  %v3989_v57 = vld [vmem:[%s5183_s2 + $0x3d8] ss:$12 sps:$4 sm:$0xff]  }
  0xd2   : > { %2713 = vmatpush2.bf16.msra.mxu0 %v3917_v58  ;;  %v3993_v58 = vld [vmem:[%s5183_s2 + $0x20] ss:$12 sps:$4 sm:$0xff]  }
  0xd3   : > { %2748 = vmatpush1.bf16.msra.mxu1 %v3920_v59  ;;  %2714 = vmatprep.subr.bf16.mxu0 %v3925_v60  ;;  %v3996_v59 = vld [vmem:[%s5183_s2 + $0x3c4] ss:$12 sps:$4 sm:$0xff]   ;;  %v3997_v60 = vld [vmem:[%s5183_s2 + $0xc8] ss:$12 sps:$4 sm:$0xff]  }
  0xd4   : > { %2749 = vmatprep.subr.bf16.mxu1 %v3928_v61  ;;  %v3994_v61 = vld [vmem:[%s5183_s2 + $0x3c0] ss:$12 sps:$4 sm:$0xff]  }
  0xd6   : > { %2686 = vmatmul.mubr.bf16.gmra.mxu1 %v4380_v31  ;;  %2715 = vmatpush2.bf16.msra.mxu0 %v3923_v62  ;;  %v3998_v62 = vld [vmem:[%s5183_s2 + $0x8] ss:$12 sps:$4 sm:$0xff]  }
  0xd7   : > { %2750 = vmatpush1.bf16.msra.mxu1 %v3926_v63  ;;  %2716 = vmatprep.subr.bf16.mxu0 %v3931_v0  ;;  %v3999_v63 = vld [vmem:[%s5183_s2 + $0x2f0] ss:$12 sps:$4 sm:$0xff]  }
  0xd8   : > { %2751 = vmatprep.subr.bf16.mxu1 %v3934_v1  ;;  %2777 = vmatprep.mubr.bf16.mxu1 %v4478_v2  ;;  %v4000_v0 = vld [vmem:[%s5183_s2 + $0x470] ss:$12 sps:$4 sm:$0xff]  }
  0xd9   : > { %v4001_v1 = vld [vmem:[%s5183_s2 + $0x230] ss:$12 sps:$4 sm:$0xff]  }
  0xda   : > { %2717 = vmatpush2.bf16.msra.mxu0 %v3929_v3  ;;  %v4002_v3 = vld [vmem:[%s5183_s2 + $0x3b0] ss:$12 sps:$4 sm:$0xff]  }
  0xdb   : > { %2752 = vmatpush1.bf16.msra.mxu1 %v3932_v4  ;;  %2718 = vmatprep.subr.bf16.mxu0 %v3937_v5  ;;  %v4003_v4 = vld [vmem:[%s5183_s2 + $0x2d8] ss:$12 sps:$4 sm:$0xff]  }
  0xdc   : > { %2753 = vmatprep.subr.bf16.mxu1 %v3940_v6  ;;  %v4004_v5 = vld [vmem:[%s5183_s2 + $0x458] ss:$12 sps:$4 sm:$0xff]  }
  0xde   : > { %2719 = vmatpush2.bf16.msra.mxu0 %v3935_v7 }
  0xdf   : > { %2754 = vmatpush1.bf16.msra.mxu1 %v3938_v8  ;;  %2720 = vmatprep.subr.bf16.mxu0 %v3943_v9  ;;  %v4005_v8 = vld [vmem:[%s5183_s2 + $0x218] ss:$12 sps:$4 sm:$0xff]  }
  0xe0   : > { %2755 = vmatprep.subr.bf16.mxu1 %v3946_v10  ;;  %v4006_v9 = vld [vmem:[%s5183_s2 + $0x398] ss:$12 sps:$4 sm:$0xff]  }
  0xe2   : > { %2721 = vmatpush2.bf16.msra.mxu0 %v3941_v11 }
  0xe3   : > { %2756 = vmatpush1.bf16.msra.mxu1 %v3944_v14  ;;  %2722 = vmatprep.subr.bf16.mxu0 %v3949_v15  ;;  %v4008_v14 = vld [vmem:[%s5183_s2 + $0x440] ss:$12 sps:$4 sm:$0xff]  }
  0xe4   : > { %2757 = vmatprep.subr.bf16.mxu1 %v3952_v16 }
  0xe6   : > { %2723 = vmatpush2.bf16.msra.mxu0 %v3947_v17  ;;  %v4009_v17 = vld [vmem:[%s5183_s2 + $0x200] ss:$12 sps:$4 sm:$0xff]  }
  0xe7   : > { %2758 = vmatpush1.bf16.msra.mxu1 %v3950_v18  ;;  %2724 = vmatprep.subr.bf16.mxu0 %v3955_v19  ;;  %v4010_v18 = vld [vmem:[%s5183_s2 + $0x380] ss:$12 sps:$4 sm:$0xff]  }
  0xe8   : > { %2759 = vmatprep.subr.bf16.mxu1 %v3958_v20 }
  0xea   : > { %2725 = vmatpush2.bf16.msra.mxu0 %v3953_v22  ;;  %v4012_v22 = vld [vmem:[%s5183_s2 + $0x428] ss:$12 sps:$4 sm:$0xff]  }
  0xeb   : > { %2760 = vmatpush1.bf16.msra.mxu1 %v3956_v23  ;;  %3537 = vmatprep.subr.bf16.mxu0 %v3962_v26  ;;  %v4013_v26 = vld [vmem:[%s5183_s2 + $0x1e8] ss:$12 sps:$4 sm:$0xff]  }
  0xec   : > { %2761 = vmatprep.subr.bf16.mxu1 %v3961_v24 }
  0xed   : > { %2727 = vmatmul.mubr.bf16.vlgmr.msra.gmra.mxu0 %v4334_v13 }
  0xee   : > { %3538 = vmatpush3.bf16.msra.mxu0 %v3963_v28  ;;  %2736 = vmatprep.mubr.bf16.mxu0 %v4355_v21  ;;  %v4016_v28 = vld [vmem:[%s5183_s2 + $0x410] ss:$12 sps:$4 sm:$0xff]  }
  0xef   : > { %2762 = vmatpush2.bf16.msra.mxu1 %v3959_v27  ;;  %3539 = vmatprep.subr.bf16.mxu0 %v3967_v32  ;;  %v4014_v27 = vld [vmem:[%s5183_s2 + $0x368] ss:$12 sps:$4 sm:$0xff]  }
  0xf0   : > { %2763 = vmatprep.subr.bf16.mxu1 %v3966_v29 }
  0xf2   : > { %3540 = vmatpush3.bf16.msra.mxu0 %v3968_v34 }
  0xf3   : > { %2764 = vmatpush2.bf16.msra.mxu1 %v3964_v33  ;;  %3541 = vmatprep.subr.bf16.mxu0 %v3972_v37  ;;  %v4018_v37 = vld [vmem:[%s5183_s2 + $0x350] ss:$12 sps:$4 sm:$0xff]  }
  0xf4   : > { %2765 = vmatprep.subr.bf16.mxu1 %v3971_v36  ;;  %v4017_v36 = vld [vmem:[%s5183_s2 + $0x1d0] ss:$12 sps:$4 sm:$0xff]  }
  0xf5   : > { %2737 = vmatmul.mubr.bf16.gmra.mxu0 %v4378_v30 }
  0xf6   : > { %3542 = vmatpush3.bf16.msra.mxu0 %v3973_v39  ;;  %2828 = vmatprep.mubr.bf16.mxu0 %v4271_v53  ;;  %v3987_v53 = vld [vmem:[%s5183_s2 + $0xf8] ss:$12 sps:$4 sm:$0xff]  }
  0xf7   : > { %2766 = vmatpush2.bf16.msra.mxu1 %v3969_v38  ;;  %3543 = vmatprep.subr.bf16.mxu0 %v3977_v42  ;;  %v4022_v42 = vld [vmem:[%s5183_s2 + $0x338] ss:$12 sps:$4 sm:$0xff]  }
  0xf8   : > { %2767 = vmatprep.subr.bf16.mxu1 %v3976_v40  ;;  %v4021_v40 = vld [vmem:[%s5183_s2 + $0x1b8] ss:$12 sps:$4 sm:$0xff]  }
  0xfa   : > { %3544 = vmatpush3.bf16.msra.mxu0 %v3978_v44  ;;  %v4024_v44 = vld [vmem:[%s5183_s2 + $0x3e0] ss:$12 sps:$4 sm:$0xff]  }
  0xfb   : > { %2768 = vmatpush2.bf16.msra.mxu1 %v3974_v43  ;;  %3545 = vmatprep.subr.bf16.mxu0 %v3982_v46  ;;  %v4023_v43 = vld [vmem:[%s5183_s2 + $0x260] ss:$12 sps:$4 sm:$0xff]  }
  0xfc   : > { %2769 = vmatprep.subr.bf16.mxu1 %v3981_v45  ;;  %v4025_v45 = vld [vmem:[%s5183_s2 + $0x1a0] ss:$12 sps:$4 sm:$0xff]  }
  0xfd   : > { %v4026_v46 = vld [vmem:[%s5183_s2 + $0x320] ss:$12 sps:$4 sm:$0xff]  }
  0xfe   : > { %3546 = vmatpush3.bf16.msra.mxu0 %v3983_v49  ;;  %v4028_v49 = vld [vmem:[%s5183_s2 + $0x3c8] ss:$12 sps:$4 sm:$0xff]  }
  0xff   : > { %2770 = vmatpush2.bf16.msra.mxu1 %v3979_v48  ;;  %3547 = vmatprep.subr.bf16.mxu0 %v3987_v53  ;;  %v4027_v48 = vld [vmem:[%s5183_s2 + $0x248] ss:$12 sps:$4 sm:$0xff]  }
 0x100   : > { %2771 = vmatprep.subr.bf16.mxu1 %v3986_v50  ;;  %v4029_v50 = vld [vmem:[%s5183_s2 + $0x188] ss:$12 sps:$4 sm:$0xff]  }
 0x101   : > { %v4030_v53 = vld [vmem:[%s5183_s2 + $0x308] ss:$12 sps:$4 sm:$0xff]  }
 0x102   : > { %3548 = vmatpush3.bf16.msra.mxu0 %v3988_v52 }
 0x103   : > { %2772 = vmatpush2.bf16.msra.mxu1 %v3984_v51  ;;  %3549 = vmatprep.subr.bf16.mxu0 %v3992_v56 }
 0x104   : > { %2773 = vmatprep.subr.bf16.mxu1 %v3991_v55 }
 0x106   : > { %3550 = vmatpush3.bf16.msra.mxu0 %v3993_v58 }
 0x107   : > { %2774 = vmatpush2.bf16.msra.mxu1 %v3989_v57  ;;  %3551 = vmatprep.subr.bf16.mxu0 %v3997_v60 }
 0x108   : > { %2775 = vmatprep.subr.bf16.mxu1 %v3996_v59  ;;  %v739_v59 = vlaneseq }
 0x10a   : > { %3552 = vmatpush3.bf16.msra.mxu0 %v3998_v62  ;;  %v5106_v60 = vshrl.u32 %v739_v59, 7 }
 0x10b   : > { %2776 = vmatpush2.bf16.msra.mxu1 %v3994_v61  ;;  %3565 = vmatprep.subr.bf16.mxu0 %v3999_v63 }
 0x10c   : > { %3593 = vmatprep.subr.bf16.mxu1 %v4000_v0 }
 0x10d   : > { %v4982_v6 = vpop.f32.mrf.mxu0  ;;  %2829 = vmatmul.mubr.bf16.vlgmr.msra.gmra.mxu0 %v4332_v12  ;;  %v4007_v12 = vld [vmem:[%s5183_s2 + $0x2c0] ss:$12 sps:$4 sm:$0xff]  }
 0x10e   : > { %v4984_v7 = vpop.f32.mrf.mxu1  ;;  %2778 = vmatmul.mubr.bf16.vlgmr.msra.gmra.mxu1 %v4558_v35  ;;  %3566 = vmatpush3.bf16.msra.mxu0 %v4001_v1 }
 0x10f   : > { %3594 = vmatpush3.bf16.msra.mxu1 %v4002_v3  ;;  %v4994_v10 = vpop.f32.mrf.mxu0  ;;  %3567 = vmatprep.subr.bf16.mxu0 %v4003_v4 }
 0x110   : > { %v4996_v11 = vpop.f32.mrf.mxu1  ;;  %3595 = vmatprep.subr.bf16.mxu1 %v4004_v5  ;;  %2787 = vmatprep.mubr.bf16.mxu1 %v4573_v41 }
 0x111   : > { %2836 = vmatprep.mubr.bf16.mxu0 %v4364_v25  ;;  %v5006_v15 = vpop.f32.mrf.mxu0  ;;  %v4011_v25 = vld [vmem:[%s5183_s2 + $0x2a8] ss:$12 sps:$4 sm:$0xff]  }
 0x112   : > { %v5008_v16 = vpop.f32.mrf.mxu1  ;;  %3568 = vmatpush3.bf16.msra.mxu0 %v4005_v8 }
 0x113   : > { %3596 = vmatpush3.bf16.msra.mxu1 %v4006_v9  ;;  %v5016_v19 = vpop.f32.mrf.mxu0  ;;  %3569 = vmatprep.subr.bf16.mxu0 %v4007_v12 }
 0x114   : > { %v5018_v20 = vpop.f32.mrf.mxu1  ;;  %3597 = vmatprep.subr.bf16.mxu1 %v4008_v14 }
 0x115   : > { %2837 = vmatmul.mubr.bf16.gmra.mxu0 %v4380_v31  ;;  %v5030_v24 = vpop.f32.mrf.mxu0  ;;  %v4015_v31 = vld [vmem:[%s5183_s2 + $0x290] ss:$12 sps:$4 sm:$0xff]  }
 0x116   : > { %2788 = vmatmul.mubr.bf16.gmra.mxu1 %v4592_v47  ;;  %v5028_v23 = vpop.f32.mrf.mxu1  ;;  %3570 = vmatpush3.bf16.msra.mxu0 %v4009_v17 }
 0x117   : > { %3598 = vmatpush3.bf16.msra.mxu1 %v4010_v18  ;;  %3571 = vmatprep.subr.bf16.mxu0 %v4011_v25  ;;  %v5046_v32 = vpop.f32.mrf.mxu0 }
 0x118   : > { %3599 = vmatprep.subr.bf16.mxu1 %v4012_v22  ;;  %v5044_v29 = vpop.f32.mrf.mxu1  ;;  %2876 = vmatprep.mubr.bf16.mxu0 %v4273_v54  ;;  %v4019_v54 = vld [vmem:[%s5183_s2 + $0x278] ss:$12 sps:$4 sm:$0xff]  }
 0x119   : > { %2924 = vmatprep.mubr.bf16.mxu1 %v4478_v2  ;;  %v1570_v34 = vpop.f32.mrf.mxu0  ;;  %v4020_v2 = vld [vmem:[%s5183_s2 + $0x3f8] ss:$12 sps:$4 sm:$0xff]  }
 0x11a   : > { %v1621_v33 = vpop.f32.mrf.mxu1  ;;  %3572 = vmatpush3.bf16.msra.mxu0 %v4013_v26 }
 0x11b   : > { %3600 = vmatpush3.bf16.msra.mxu1 %v4014_v27  ;;  %3573 = vmatprep.subr.bf16.mxu0 %v4015_v31  ;;  %v1571_v39 = vpop.f32.mrf.mxu0 }
 0x11c   : > { %3601 = vmatprep.subr.bf16.mxu1 %v4016_v28  ;;  %v1622_v38 = vpop.f32.mrf.mxu1 }
 0x11e   : > { %3574 = vmatpush3.bf16.msra.mxu0 %v4017_v36 }
 0x11f   : > { %3602 = vmatpush3.bf16.msra.mxu1 %v4018_v37  ;;  %3575 = vmatprep.subr.bf16.mxu0 %v4019_v54 }
 0x120   : > { %3603 = vmatprep.subr.bf16.mxu1 %v4020_v2 }
 0x122   : > { %3576 = vmatpush3.bf16.msra.mxu0 %v4021_v40  ;;  %v749_v40 = vsub.s32 2, %v5106_v60 }
 0x123   : > { %3604 = vmatpush3.bf16.msra.mxu1 %v4022_v42  ;;  %3577 = vmatprep.subr.bf16.mxu0 %v4023_v43 }
 0x124   : > { %3605 = vmatprep.subr.bf16.mxu1 %v4024_v44 }
 0x126   : > { %3578 = vmatpush3.bf16.msra.mxu0 %v4025_v45 }
 0x127   : > { %3606 = vmatpush3.bf16.msra.mxu1 %v4026_v46  ;;  %3579 = vmatprep.subr.bf16.mxu0 %v4027_v48 }
 0x128   : > { %3607 = vmatprep.subr.bf16.mxu1 %v4028_v49 }
 0x12a   : > { %3580 = vmatpush3.bf16.msra.mxu0 %v4029_v50 }
 0x12b   : > { %3608 = vmatpush3.bf16.msra.mxu1 %v4030_v53 }
 0x12d   : > { %2877 = vmatmul.mubr.bf16.vlgmr.msra.gmra.mxu0 %v4334_v13 }
 0x12e   : > { %v5092_v51 = vpop.f32.mrf.mxu1  ;;  %2925 = vmatmul.mubr.bf16.vlgmr.msra.gmra.mxu1 %v4558_v35  ;;  %2884 = vmatprep.mubr.bf16.mxu0 %v4355_v21  ;;  %v741_v21 = vsub.s32 0, %v5106_v60 }
 0x12f   : > { %2932 = vmatprep.mubr.bf16.mxu1 %v4573_v41  ;;  %v745_v41 = vsub.s32 1, %v5106_v60 }
 0x130   : > { %v3470_v52 = vpop.f32.mrf.mxu1 }
 0x132   : > { %v5098_v55 = vpop.f32.mrf.mxu1 }
 0x134   : > { %v3473_v56 = vpop.f32.mrf.mxu1 }
 0x135   : > { %2885 = vmatmul.mubr.bf16.gmra.mxu0 %v4378_v30  ;;  %v737_v30 = vld [vmem:[%s5184_s3] sm:$0x7]  ;;  %v3474_v45 = vadd.f32 %v3473_v56, %v5098_v55 }
 0x136   : > { %2933 = vmatmul.mubr.bf16.gmra.mxu1 %v4592_v47  ;;  %v5102_v57 = vpop.f32.mrf.mxu1  ;;  %v742_v47 = vrot.slane %v737_v30, %v741_v21  ;;  %v746_v61 = vrot.slane %v737_v30, %v745_v41  ;;  %v750_v42 = vrot.slane %v737_v30, %v749_v40 }
 0x138   : > { %v5104_v58 = vpop.f32.mrf.mxu1  ;;  %v1557_v62 = vadd.f32 %v4982_v6, %v742_v47  ;;  %v1559_v63 = vadd.f32 %v4994_v10, %v746_v61  ;;  %v1561_v0 = vadd.f32 %v5006_v15, %v742_v47  ;;  %v1563_v8 = vadd.f32 %v5016_v19, %v746_v61 }
 0x139   : > { %v1569_v15 = vadd.f32 %v5046_v32, %v746_v61  ;;  %v3477_v59 = vadd.f32 %v5104_v58, %v5102_v57 }
 0x13a   : > { %v3478_v13 = vpop.f32.mrf.mxu1  ;;  %v1608_v4 = vadd.f32 %v4984_v7, %v1557_v62  ;;  %v1610_v5 = vadd.f32 %v4996_v11, %v1559_v63  ;;  %v1612_v18 = vadd.f32 %v5008_v16, %v1561_v0  ;;  %v1614_v7 = vadd.f32 %v5018_v20, %v1563_v8 }
 0x13b   : > { %v1567_v11 = vadd.f32 %v5030_v24, %v742_v47  ;;  %v1620_v34 = vadd.f32 %v5044_v29, %v1569_v15  ;;  %v1713_v13 = vadd.f32 %v3474_v45, %v750_v42  ;;  %v1718_v55 = vadd.f32 %v3477_v59, %v750_v42 }
 0x13c   : > { %v3479_v35 = vpop.f32.mrf.mxu1 }
 0x13d   : > { %v1618_v33 = vadd.f32 %v5028_v23, %v1567_v11  ;;  %v3471_v23 = vadd.f32 %v3470_v52, %v5092_v51 }
 0x13f   : > { %v1710_v44 = vadd.f32 %v3471_v23, %v750_v42 }
 0x14d   : > { %v1658_v1 = vpop.f32.mrf.mxu0 }
 0x14e   : > { %v3497_v3 = vpop.f32.mrf.mxu1  ;;  %v1659_v14 = vadd.f32 %v1658_v1, %v1608_v4 }
 0x14f   : > { %v1660_v9 = vpop.f32.mrf.mxu0 }
 0x150   : > { %v3498_v12 = vpop.f32.mrf.mxu1  ;;  %v1661_v17 = vadd.f32 %v1660_v9, %v1610_v5 }
 0x151   : > { %v1662_v6 = vpop.f32.mrf.mxu0  ;;  %v3499_v43 = vadd.f32 %v3498_v12, %v3497_v3 }
 0x152   : > { %v3500_v10 = vpop.f32.mrf.mxu1  ;;  %v3441_v19 = vpack.c.bf16 %v1661_v17, %v1659_v14  ;;  %v1663_v16 = vadd.f32 %v1662_v6, %v1612_v18 }
 0x153   : > { %v1664_v25 = vpop.f32.mrf.mxu0  ;;  %v1758_v48 = vadd.f32 %v3499_v43, %v1710_v44 }
 0x154   : > { %v3501_v22 = vpop.f32.mrf.mxu1  ;;  %1852 = vst [vmem:[%s5130_s15] sm:$0xff] %v3441_v19  ;;  %v1665_v26 = vadd.f32 %v1664_v25, %v1614_v7 }
 0x155   : > { %v1668_v27 = vpop.f32.mrf.mxu0  ;;  %v3502_v49 = vadd.f32 %v3501_v22, %v3500_v10 }
 0x156   : > { %v3503_v31 = vpop.f32.mrf.mxu1  ;;  %v3443_v28 = vpack.c.bf16 %v1665_v26, %v1663_v16  ;;  %v1669_v24 = vadd.f32 %v1668_v27, %v1618_v33  ;;  %v1858_v27 = vld [vmem:[%s5185_s4] sm:$0x7] }
 0x157   : > { %v1670_v20 = vpop.f32.mrf.mxu0  ;;  %v1761_v47 = vadd.f32 %v3502_v49, %v1713_v13 }
 0x158   : > { %v3504_v36 = vpop.f32.mrf.mxu1  ;;  %1854 = vst [vmem:[%s5130_s15 + $0xc] sm:$0xff] %v3443_v28  ;;  %v1671_v37 = vadd.f32 %v1670_v20, %v1620_v34  ;;  %v1867_v28 = vrot.slane %v1858_v27, %v745_v41 }
 0x159   : > { %v1672_v32 = vpop.f32.mrf.mxu0  ;;  %v3505_v51 = vadd.f32 %v3504_v36, %v3503_v31  ;;  %v1863_v31 = vrot.slane %v1858_v27, %v741_v21 }
 0x15a   : > { %v3506_v54 = vpop.f32.mrf.mxu1  ;;  %v3445_v2 = vpack.c.bf16 %v1671_v37, %v1669_v24 }
 0x15b   : > { %v1673_v38 = vpop.f32.mrf.mxu0  ;;  %v1766_v0 = vadd.f32 %v3505_v51, %v1718_v55 }
 0x15c   : > { %v3507_v39 = vpop.f32.mrf.mxu1  ;;  %1856 = vst [vmem:[%s5130_s15 + $0x18] sm:$0xff] %v3445_v2 }
 0x16d   : > { %v3525_v29 = vpop.f32.mrf.mxu0 }
 0x16f   : > { %v3526_v46 = vpop.f32.mrf.mxu0 }
 0x170   : > { %v3527_v50 = vadd.f32 %v3526_v46, %v3525_v29 }
 0x171   : > { %v3528_v53 = vpop.f32.mrf.mxu0 }
 0x172   : > { %v1806_v35 = vadd.f32 %v3527_v50, %v1758_v48 }
 0x173   : > { %v3529_v30 = vpop.f32.mrf.mxu0 }
 0x174   : > { %v3442_v52 = vpack.c.bf16 %v1806_v35, %v1806_v35  ;;  %v3530_v61 = vadd.f32 %v3529_v30, %v3528_v53 }
 0x175   : > { %v3531_v62 = vpop.f32.mrf.mxu0 }
 0x176   : > { %1853 = vst [vmem:[%s5130_s15 + $0x8] sm:$0xf] %v3442_v52  ;;  %v1809_v56 = vadd.f32 %v3530_v61, %v1761_v47 }
 0x177   : > { %v3532_v63 = vpop.f32.mrf.mxu0 }
 0x178   : > { %v3444_v1 = vpack.c.bf16 %v1809_v56, %v1809_v56  ;;  %v3533_v3 = vadd.f32 %v3532_v63, %v3531_v62 }
 0x179   : > { %v3534_v4 = vpop.f32.mrf.mxu0 }
 0x17a   : > { %1855 = vst [vmem:[%s5130_s15 + $0x14] sm:$0xf] %v3444_v1  ;;  %v1814_v5 = vadd.f32 %v3533_v3, %v1766_v0  ;;  %v1871_v1 = vrot.slane %v1858_v27, %v749_v40 }
 0x17b   : > { %v3535_v57 = vpop.f32.mrf.mxu0 }
 0x17c   : > { %v3446_v58 = vpack.c.bf16 %v1814_v5, %v1814_v5 }
 0x17e   : > { %1857 = vst [vmem:[%s5130_s15 + $0x20] sm:$0xf] %v3446_v58 }
 0x18e   : > { %v2677_v8 = vpop.f32.mrf.mxu1 }
 0x18f   : > { %v2678_v33 = vadd.f32 %v2677_v8, %v1863_v31 }
 0x190   : > { %v2679_v9 = vpop.f32.mrf.mxu1 }
 0x191   : > { %v2680_v34 = vadd.f32 %v2679_v9, %v1867_v28 }
 0x192   : > { %v2681_v12 = vpop.f32.mrf.mxu1 }
 0x193   : > { %v2682_v2 = vadd.f32 %v2681_v12, %v1863_v31 }
 0x194   : > { %v2683_v14 = vpop.f32.mrf.mxu1 }
 0x195   : > { %v2684_v38 = vadd.f32 %v2683_v14, %v1867_v28 }
 0x196   : > { %v2687_v17 = vpop.f32.mrf.mxu1 }
 0x197   : > { %v2688_v23 = vadd.f32 %v2687_v17, %v1863_v31 }
 0x198   : > { %v2689_v18 = vpop.f32.mrf.mxu1 }
 0x199   : > { %v2690_v44 = vadd.f32 %v2689_v18, %v1867_v28 }
 0x19a   : > { %v2691_v6 = vpop.f32.mrf.mxu1 }
 0x19c   : > { %v2692_v10 = vpop.f32.mrf.mxu1 }
 0x1ad   : > { %v2728_v7 = vpop.f32.mrf.mxu0 }
 0x1ae   : > { %v2729_v24 = vadd.f32 %v2728_v7, %v2678_v33 }
 0x1af   : > { %v2730_v11 = vpop.f32.mrf.mxu0 }
 0x1b0   : > { %v2731_v37 = vadd.f32 %v2730_v11, %v2680_v34 }
 0x1b1   : > { %v2732_v15 = vpop.f32.mrf.mxu0 }
 0x1b2   : > { %v2733_v43 = vadd.f32 %v2732_v15, %v2682_v2 }
 0x1b3   : > { %v2734_v19 = vpop.f32.mrf.mxu0 }
 0x1b4   : > { %v2735_v29 = vadd.f32 %v2734_v19, %v2684_v38 }
 0x1b5   : > { %v2738_v25 = vpop.f32.mrf.mxu0 }
 0x1b6   : > { %v2739_v35 = vadd.f32 %v2738_v25, %v2688_v23 }
 0x1b7   : > { %v2740_v22 = vpop.f32.mrf.mxu0 }
 0x1b8   : > { %v2741_v30 = vadd.f32 %v2740_v22, %v2690_v44 }
 0x1b9   : > { %v2742_v16 = vpop.f32.mrf.mxu0 }
 0x1bb   : > { %v2743_v26 = vpop.f32.mrf.mxu0 }
 0x1cd   : > { %v3553_v36 = vpop.f32.mrf.mxu0 }
 0x1ce   : > { %v2779_v20 = vpop.f32.mrf.mxu1 }
 0x1cf   : > { %v3554_v54 = vpop.f32.mrf.mxu0  ;;  %v2780_v39 = vadd.f32 %v2779_v20, %v2729_v24 }
 0x1d0   : > { %v2781_v32 = vpop.f32.mrf.mxu1  ;;  %v3555_v3 = vadd.f32 %v3554_v54, %v3553_v36 }
 0x1d1   : > { %v2782_v42 = vadd.f32 %v2781_v32, %v2731_v37  ;;  %v3556_v41 = vpop.f32.mrf.mxu0 }
 0x1d2   : > { %v2783_v21 = vpop.f32.mrf.mxu1  ;;  %v2831_v8 = vadd.f32 %v3555_v3, %v1871_v1 }
 0x1d3   : > { %v3447_v45 = vpack.c.bf16 %v2782_v42, %v2780_v39  ;;  %v3557_v48 = vpop.f32.mrf.mxu0  ;;  %v2784_v49 = vadd.f32 %v2783_v21, %v2733_v43 }
 0x1d4   : > { %v2785_v46 = vpop.f32.mrf.mxu1  ;;  %v3558_v9 = vadd.f32 %v3557_v48, %v3556_v41 }
 0x1d5   : > { %2973 = vst [vmem:[%s5162_s20] sm:$0xff] %v3447_v45  ;;  %v2786_v50 = vadd.f32 %v2785_v46, %v2735_v29  ;;  %v3559_v13 = vpop.f32.mrf.mxu0 }
 0x1d6   : > { %v2789_v53 = vpop.f32.mrf.mxu1  ;;  %v2834_v11 = vadd.f32 %v3558_v9, %v1871_v1 }
 0x1d7   : > { %v3449_v59 = vpack.c.bf16 %v2786_v50, %v2784_v49  ;;  %v3560_v51 = vpop.f32.mrf.mxu0  ;;  %v2790_v52 = vadd.f32 %v2789_v53, %v2739_v35 }
 0x1d8   : > { %v2791_v47 = vpop.f32.mrf.mxu1  ;;  %v3561_v15 = vadd.f32 %v3560_v51, %v3559_v13 }
 0x1d9   : > { %2975 = vst [vmem:[%s5162_s20 + $0xc] sm:$0xff] %v3449_v59  ;;  %v2792_v61 = vadd.f32 %v2791_v47, %v2741_v30  ;;  %v3562_v62 = vpop.f32.mrf.mxu0 }
 0x1da   : > { %v2793_v55 = vpop.f32.mrf.mxu1  ;;  %v2839_v28 = vadd.f32 %v3561_v15, %v1871_v1 }
 0x1db   : > { %v3451_v56 = vpack.c.bf16 %v2792_v61, %v2790_v52  ;;  %v3563_v63 = vpop.f32.mrf.mxu0 }
 0x1dc   : > { %v2794_v0 = vpop.f32.mrf.mxu1 }
 0x1dd   : > { %2977 = vst [vmem:[%s5162_s20 + $0x18] sm:$0xff] %v3451_v56 }
 0x1ed   : > { %v3581_v4 = vpop.f32.mrf.mxu0 }
 0x1ee   : > { %v3609_v5 = vpop.f32.mrf.mxu1 }
 0x1ef   : > { %v3582_v57 = vpop.f32.mrf.mxu0 }
 0x1f0   : > { %v3610_v58 = vpop.f32.mrf.mxu1  ;;  %v3583_v12 = vadd.f32 %v3582_v57, %v3581_v4 }
 0x1f1   : > { %v3584_v14 = vpop.f32.mrf.mxu0  ;;  %v3611_v6 = vadd.f32 %v3610_v58, %v3609_v5 }
 0x1f2   : > { %v3612_v17 = vpop.f32.mrf.mxu1  ;;  %v2879_v18 = vadd.f32 %v3583_v12, %v2831_v8 }
 0x1f3   : > { %v3585_v10 = vpop.f32.mrf.mxu0 }
 0x1f4   : > { %v3613_v7 = vpop.f32.mrf.mxu1  ;;  %v2927_v19 = vadd.f32 %v3611_v6, %v2879_v18  ;;  %v3586_v60 = vadd.f32 %v3585_v10, %v3584_v14 }
 0x1f5   : > { %v3587_v40 = vpop.f32.mrf.mxu0  ;;  %v3614_v26 = vadd.f32 %v3613_v7, %v3612_v17 }
 0x1f6   : > { %v3615_v25 = vpop.f32.mrf.mxu1  ;;  %v3448_v22 = vpack.c.bf16 %v2927_v19, %v2927_v19  ;;  %v2882_v16 = vadd.f32 %v3586_v60, %v2834_v11 }
 0x1f7   : > { %v3588_v27 = vpop.f32.mrf.mxu0 }
 0x1f8   : > { %v3616_v31 = vpop.f32.mrf.mxu1  ;;  %2974 = vst [vmem:[%s5162_s20 + $0x8] sm:$0xf] %v3448_v22  ;;  %v2930_v33 = vadd.f32 %v3614_v26, %v2882_v16  ;;  %v3589_v34 = vadd.f32 %v3588_v27, %v3587_v40 }
 0x1f9   : > { %v3590_v20 = vpop.f32.mrf.mxu0  ;;  %v3617_v32 = vadd.f32 %v3616_v31, %v3615_v25 }
 0x1fa   : > { %v3618_v36 = vpop.f32.mrf.mxu1  ;;  %v3450_v24 = vpack.c.bf16 %v2930_v33, %v2930_v33  ;;  %v2887_v37 = vadd.f32 %v3589_v34, %v2839_v28 }
 0x1fb   : > { %v3591_v54 = vpop.f32.mrf.mxu0 }
 0x1fc   : > { %v3619_v2 = vpop.f32.mrf.mxu1  ;;  %2976 = vst [vmem:[%s5162_s20 + $0x14] sm:$0xf] %v3450_v24  ;;  %v2935_v38 = vadd.f32 %v3617_v32, %v2887_v37 }
 0x1fe   : > { %v3452_v39 = vpack.c.bf16 %v2935_v38, %v2935_v38 }
 0x200   : > { %2978 = vst [vmem:[%s5162_s20 + $0x20] sm:$0xf] %v3452_v39 }
 0x201 PF: > { %s17_s23 = sadd.s32 1, %s4053_s23   ;;  %s5188_s21 = smov %s4049_s22 }
 0x202   : > { %p14_p5 = scmp.ge.s32.totalorder %s17_s23, 4   ;;  %s5189_s22 = smov %s5191_s24 }
 0x204   :  { %16 = sbr.rel (!%p14_p5) target bundleno = 2 (0x2), region = 82 }

// kernel: tile.38
= control target key start
LH: loop header
LB: loop body
LE: loop exit
PB: predicated region body
PF: predicated region fallthrough
CT: control target
= control target key end

     0   :  { %s28_s0 = inlined_call_operand.vmem [shape: f32[16], index: 0, kind: input, shape index: {}]   ;;  %s29_s1 = inlined_call_operand.vmem [shape: f32[11,16], index: 1, kind: output, shape index: {}]  }
   0x1   :  { %v4_v0 = vld [vmem:[%s28_s0] ss:$0 sm:$0xff] }
   0x2   :  { %5 = vst [vmem:[%s29_s1] sm:$0xff] %v4_v0  ;;  %8 = vst [vmem:[%s29_s1 + $0x8] sm:$0xff] %v4_v0 }

// kernel: tile.39
= control target key start
LH: loop header
LB: loop body
LE: loop exit
PB: predicated region body
PF: predicated region fallthrough
CT: control target
= control target key end

     0   :  { %s79_s10 = smov 112   ;;  %s80_s11 = smov 80   ;;  %vm4_vm0 = vcmask 130048   ;;  %vm10_vm1 = vcmask 1048448   ;;  %vm16_vm2 = vcmask 917248   ;;  %vm22_vm3 = vcmask 786048   ;;  %s126_s0 = inlined_call_operand.vmem [shape: f32[11,16], index: 0, kind: input, shape index: {}]   ;;  %s127_s1 = inlined_call_operand.vmem [shape: f32[1,176], index: 1, kind: output, shape index: {}]  }
   0x1   :  { %v64_v0 = vld [vmem:[%s126_s0 + $0x7] sm:$0x1]   ;;  %v66_v1 = vld [vmem:[%s126_s0 + $0x5] sm:$0x1]   ;;  %v65_v2 = vld [vmem:[%s126_s0 + $0x6] sm:$0x1]  }
   0x2   :  { %8 = vrot.lane.b32.xlu0 %v64_v0, %s79_s10  ;;  %20 = vrot.lane.b32.xlu1 %v66_v1, %s80_s11  ;;  %v67_v3 = vld [vmem:[%s126_s0 + $0x4] sm:$0x1]   ;;  %s37_s16 = smov 3  ;;  %s2_s17 = smov 3  ;;  %v68_v5 = vld [vmem:[%s126_s0 + $0x3] sm:$0x1]  }
   0x3   :  { %s81_s18 = smov 96   ;;  %s82_s19 = smov 64   ;;  %v3_v4 = vld [vmem:[%s126_s0] ss:$8 sm:%s2_s17]   ;;  %v69_v6 = vld [vmem:[%s126_s0 + $0x2] ss:$8 sm:%s37_s16]  }
   0x4   :  { %5 = vst.msk [vmem:[#allocation0] ss:$8 sm:$0x3] %vm4_vm0, %v3_v4   ;;  %s44_s26 = smov 3  ;;  %s83_s27 = smov 48   ;;  %vm28_vm4 = vcmask 654848  }
   0x5   :  { %s84_s28 = smov 32   ;;  %v70_v7 = vld [vmem:[%s126_s0 + $0x1] ss:$8 sm:%s44_s26]   ;;  %s85_s0 = smov 16   ;;  %vm34_vm5 = vcmask 523648   ;;  %vm41_vm6 = vcmask 392448  }
   0x6   :  { %14 = vrot.lane.b32.xlu0 %v65_v2, %s81_s18  ;;  %26 = vrot.lane.b32.xlu1 %v67_v3, %s82_s19  ;;  %vm48_vm7 = vcmask 261248  }
   0xa   :  { %32 = vrot.lane.b32.xlu0 %v68_v5, %s83_s27  ;;  %39 = vrot.lane.b32.xlu1 %v69_v6, %s84_s28 }
   0xe   :  { %46 = vrot.lane.b32.xlu0 %v70_v7, %s85_s0 }
  0x74   :  { %v9_v8 = vpop.permute.xlu0 %8   ;;  %v21_v9 = vpop.permute.xlu1 %20  }
  0x75   :  { %11 = vst.msk [vmem:[#allocation0] sm:$0x1] %vm10_vm1, %v9_v8  }
  0x78   :  { %v15_v10 = vpop.permute.xlu0 %14   ;;  %v27_v11 = vpop.permute.xlu1 %26  }
  0x79   :  { %17 = vst.msk [vmem:[#allocation0] sm:$0x1] %vm16_vm2, %v15_v10  }
  0x7a   :  { %23 = vst.msk [vmem:[#allocation0] sm:$0x1] %vm22_vm3, %v21_v9  }
  0x7b   :  { %29 = vst.msk [vmem:[#allocation0] sm:$0x1] %vm28_vm4, %v27_v11  }
  0x7c   :  { %v33_v12 = vpop.permute.xlu0 %32   ;;  %v40_v13 = vpop.permute.xlu1 %39  }
  0x7d   :  { %35 = vst.msk [vmem:[#allocation0] sm:$0x1] %vm34_vm5, %v33_v12  }
  0x7e   :  { %42 = vst.msk [vmem:[#allocation0] ss:$8 sm:$0x3] %vm41_vm6, %v40_v13  }
  0x80   :  { %v47_v14 = vpop.permute.xlu0 %46  }
  0x81   :  { %49 = vst.msk [vmem:[#allocation0] ss:$8 sm:$0x3] %vm48_vm7, %v47_v14  }
  0x88   :  { %v54_v15 = vld [vmem:[#allocation0] sm:$0x1]  ;;  %v59_v16 = vld [vmem:[#allocation0 + $0x8] sm:$0x1] }
  0x89   :  { %57 = vst [vmem:[%s127_s1] sm:$0x1] %v54_v15  ;;  %71 = vst [vmem:[%s127_s1 + $0x1] sm:$0x1] %v59_v16 }

// kernel: tile.43
= control target key start
LH: loop header
LB: loop body
LE: loop exit
PB: predicated region body
PF: predicated region fallthrough
CT: control target
= control target key end

     0   :  { %s22_s0 = inlined_call_operand.vmem [shape: f32[16], index: 0, kind: input, shape index: {}]   ;;  %s23_s1 = inlined_call_operand.vmem [shape: f32[2,16], index: 1, kind: output, shape index: {}]  }
   0x1   :  { %v4_v0 = vld [vmem:[%s22_s0] ss:$0 sm:$0xff] }
   0x2   :  { %5 = vst [vmem:[%s23_s1] sm:$0x3] %v4_v0 }

// kernel: tile.44
= control target key start
LH: loop header
LB: loop body
LE: loop exit
PB: predicated region body
PF: predicated region fallthrough
CT: control target
= control target key end

     0   :  { %vm8_vm0 = vcmask 130048   ;;  %vm14_vm1 = vcmask 261248   ;;  %s42_s0 = inlined_call_operand.vmem [shape: f32[2,16], index: 0, kind: input, shape index: {}]   ;;  %s43_s1 = inlined_call_operand.vmem [shape: f32[1,32], index: 1, kind: output, shape index: {}]  }
   0x1   :  { %v5_v0 = vld [vmem:[%s42_s0] sm:$0x3]  ;;  %s25_s0 = smov 16  }
   0x2   :  { %6 = vst [vmem:[#allocation1] sm:$0x3] %v5_v0 }
   0x9   :  { %v11_v1 = vld [vmem:[#allocation1 + $0x1] sm:$0x1]   ;;  %v7_v2 = vld [vmem:[#allocation1] sm:$0x1]  }
   0xa   :  { %12 = vrot.lane.b32.xlu0 %v11_v1, %s25_s0  ;;  %9 = vst.msk [vmem:[#allocation0] sm:$0x1] %vm8_vm0, %v7_v2  }
  0x7c   :  { %v13_v3 = vpop.permute.xlu0 %12  }
  0x7d   :  { %15 = vst.msk [vmem:[#allocation0] sm:$0x1] %vm14_vm1, %v13_v3  }
  0x84   :  { %v20_v4 = vld [vmem:[#allocation0] sm:$0x1] }
  0x85   :  { %23 = vst [vmem:[%s43_s1] sm:$0x1] %v20_v4 }

// kernel: esa_forward.4
= control target key start
LH: loop header
LB: loop body
LE: loop exit
PB: predicated region body
PF: predicated region fallthrough
CT: control target
= control target key end

     0   :  { %s3131_s27 = smov 0   ;;  %s3757_s0 = inlined_call_operand.vmem [shape: bf16[2,24,384], index: 0, kind: input, shape index: {}]   ;;  %s3758_s1 = inlined_call_operand.vmem [shape: bf16[3,11,24], index: 1, kind: input, shape index: {}]   ;;  %s3759_s2 = inlined_call_operand.vmem [shape: bf16[3,384,176], index: 2, kind: input, shape index: {}]   ;;  %s3760_s3 = inlined_call_operand.vmem [shape: f32[1,176], index: 3, kind: input, shape index: {}]   ;;  %s3761_s4 = inlined_call_operand.vmem [shape: bf16[3,2,2], index: 4, kind: input, shape index: {}]   ;;  %s3762_s5 = inlined_call_operand.vmem [shape: bf16[3,32,32], index: 5, kind: input, shape index: {}]   ;;  %s3763_s6 = inlined_call_operand.vmem [shape: f32[1,32], index: 6, kind: input, shape index: {}]   ;;  %s3764_s7 = inlined_call_operand.vmem [shape: bf16[32,384], index: 7, kind: input, shape index: {}]   ;;  %s3765_s8 = inlined_call_operand.vmem [shape: bf16[2,2,384], index: 8, kind: output, shape index: {}]  }
   0x1 LB: > { %s2404_s28 = sadd.s32 4294967295, %s3074_s27   ;;  %p2408_p0 = scmp.ge.s32.totalorder %s3074_s27, 1  ;;  %s3074_s27 = sphi %s3131_s27, %s18_s27  }
   0x2   : > { %p262_p1 = scmp.lt.s32.totalorder %s3074_s27, 3 }
   0x4   : > { %p263_p2 = pnand %p2408_p0, %p262_p1 }
   0x5   : > { %p295_p3 = scmp.lt.s32.totalorder (!%p263_p2), %s2404_s28, 1  ;;  %s3080_s30 = smov (!%p263_p2), 112  }
   0x6   : > { %266 = sbr.rel (%p263_p2) target bundleno = 1592 (0x638), region = 52  ;;  %s3081_s9 = smov (!%p263_p2), 64  }
   0x7   : > { %s3083_s11 = smov (!%p263_p2), 32   ;;  %s3084_s12 = smov (!%p263_p2), 48  }
   0xb   : > { %v3076_v0 = vmov 0.0   ;;  %v3077_v1 = vmov 0   ;;  %s3767_s28 = smov (!%p295_p3, %s2404_s28), 1  ;;  %vm3078_vm0 = vmmov 0   ;;  %vm346_vm1 = vcmask 1043456  }
   0xc   : > { %2734 = vmatprep.subr.bf16.mxu1 %v3076_v0  ;;  %388 = vmatprep.mubr.bf16.mxu0 %v3077_v1  ;;  %s2808_s29 = smul.u32 36, %s3767_s28  ;;  %v2835_v11 = vld [vmem:[%s3758_s1] sm:$0x3f]   ;;  %vm342_vm2 = vcmask 195584   ;;  %v2863_v12 = vld [vmem:[%s3759_s2 + $0x2f4] ss:$8 sps:$4 sm:$0xff]  }
   0xd   : > { %2738 = vmatprep.mubr.msk.bf16.mxu1 %vm3078_vm0, %v3076_v0  ;;  %v2839_v13 = vld [vmem:[%s3759_s2 + $0x1f4] ss:$8 sps:$4 sm:$0xff]   ;;  %v2836_v14 = vld [vmem:[%s3758_s1 + $0x8] sm:$0x3f]   ;;  %v2861_v15 = vld [vmem:[%s3759_s2 + $0x2f0] ss:$8 sps:$4 sm:$0xff]  }
   0xe   : > { %s299_s10 = scalar_lea.vmem %s3757_s0, %s2808_s29  ;;  %v2837_v16 = vld [vmem:[%s3759_s2 + $0x1f0] ss:$8 sps:$4 sm:$0xff]   ;;  %v2869_v17 = vld [vmem:[%s3759_s2 + $0x2e4] ss:$8 sps:$4 sm:$0xff]   ;;  %v2867_v19 = vld [vmem:[%s3759_s2 + $0x2e0] ss:$8 sps:$4 sm:$0xff]  }
   0xf   : > { %v309_v2 = vld [vmem:[%s299_s10 + $0x18] sm:$0xff]  ;;  %v2830_v3 = vld [vmem:[%s299_s10 + $0x20] ss:$0 sps:$4 sm:$0xff]   ;;  %v3151_v6 = vld [vmem:[%s299_s10 + $0x4] ss:$12 sps:$4 sm:$0xff]   ;;  %vm1783_vm3 = vcmask 1046528  }
  0x10   : > { %v3149_v4 = vcombine.high %v309_v2, %v309_v2  ;;  %v2414_v5 = vcombine.low %v309_v2, %v309_v2  ;;  %v3154_v7 = vsel %vm346_vm1, %v2830_v3, 0  ;;  %v3162_v9 = vld [vmem:[%s299_s10 + $0x8] ss:$12 sps:$4 sm:$0xff]   ;;  %v3166_v10 = vld [vmem:[%s299_s10] ss:$12 sps:$4 sm:$0xff]   ;;  %vm1791_vm4 = vcmask 391168  }
  0x11   : > { %2735 = vmatpush3.bf16.msra.mxu1 %v3154_v7  ;;  %v2842_v18 = vld [vmem:[%s3759_s2 + $0x1e4] ss:$8 sps:$4 sm:$0xff]   ;;  %v2840_v20 = vld [vmem:[%s3759_s2 + $0x1e0] ss:$8 sps:$4 sm:$0xff]   ;;  %v2875_v21 = vld [vmem:[%s3759_s2 + $0x2d4] ss:$8 sps:$4 sm:$0xff]  }
  0x12   : > { %2417 = vmatprep.subr.msk.bf16.mxu0 %vm346_vm1, %v3149_v4  ;;  %v3159_v8 = vsel %vm346_vm1, %v2414_v5, 0  ;;  %2736 = vmatprep.subr.bf16.mxu1 %v3076_v0  ;;  %v2845_v22 = vld [vmem:[%s3759_s2 + $0x1d4] ss:$8 sps:$4 sm:$0xff]   ;;  %v2873_v23 = vld [vmem:[%s3759_s2 + $0x2d0] ss:$8 sps:$4 sm:$0xff]   ;;  %vm1799_vm5 = vcmask 1047555  }
  0x13   : > { %369 = vmatpush1.bf16.msra.mxu0 %v3159_v8  ;;  %v2843_v24 = vld [vmem:[%s3759_s2 + $0x1d0] ss:$8 sps:$4 sm:$0xff]   ;;  %v2881_v25 = vld [vmem:[%s3759_s2 + $0x2c4] ss:$8 sps:$4 sm:$0xff]   ;;  %v2879_v27 = vld [vmem:[%s3759_s2 + $0x2c0] ss:$8 sps:$4 sm:$0xff]  }
  0x14   : > { %370 = vmatprep.subr.bf16.mxu0 %v3151_v6  ;;  %v2848_v26 = vld [vmem:[%s3759_s2 + $0x1c4] ss:$8 sps:$4 sm:$0xff]   ;;  %v2846_v28 = vld [vmem:[%s3759_s2 + $0x1c0] ss:$8 sps:$4 sm:$0xff]   ;;  %v2887_v29 = vld [vmem:[%s3759_s2 + $0x2b4] ss:$8 sps:$4 sm:$0xff]  }
  0x15   : > { %2737 = vmatpush3.bf16.msra.mxu1 %v3162_v9  ;;  %v2851_v30 = vld [vmem:[%s3759_s2 + $0x1b4] ss:$8 sps:$4 sm:$0xff]   ;;  %v2885_v31 = vld [vmem:[%s3759_s2 + $0x2b0] ss:$8 sps:$4 sm:$0xff]   ;;  %v2854_v33 = vld [vmem:[%s3759_s2 + $0x1a4] ss:$8 sps:$4 sm:$0xff]  }
  0x16   : > { %2742 = vmatprep.subr.bf16.mxu1 %v3076_v0  ;;  %v2849_v32 = vld [vmem:[%s3759_s2 + $0x1b0] ss:$8 sps:$4 sm:$0xff]   ;;  %v2852_v34 = vld [vmem:[%s3759_s2 + $0x1a0] ss:$8 sps:$4 sm:$0xff]   ;;  %v2857_v35 = vld [vmem:[%s3759_s2 + $0x194] ss:$8 sps:$4 sm:$0xff]  }
  0x17   : > { %371 = vmatpush1.bf16.msra.mxu0 %v3166_v10  ;;  %v2855_v36 = vld [vmem:[%s3759_s2 + $0x190] ss:$8 sps:$4 sm:$0xff]   ;;  %v2860_v37 = vld [vmem:[%s3759_s2 + $0x184] ss:$8 sps:$4 sm:$0xff]   ;;  %v2858_v38 = vld [vmem:[%s3759_s2 + $0x180] ss:$8 sps:$4 sm:$0xff]  }
  0x18   : > { %2423 = vmatprep.subr.msk.bf16.mxu0 %vm346_vm1, %v3149_v4  ;;  %2739 = vmatmul.mubr.msk.bf16.vlgmr.msra.gmra.mxu1 %vm342_vm2, %v2835_v11  ;;  %v2866_v39 = vld [vmem:[%s3759_s2 + $0x274] ss:$8 sps:$4 sm:$0xff]   ;;  %v2864_v40 = vld [vmem:[%s3759_s2 + $0x270] ss:$8 sps:$4 sm:$0xff]   ;;  %v2872_v41 = vld [vmem:[%s3759_s2 + $0x264] ss:$8 sps:$4 sm:$0xff]  }
  0x19   : > { %2743 = vmatpush3.bf16.msra.mxu1 %v3154_v7  ;;  %2746 = vmatprep.mubr.msk.bf16.mxu1 %vm3078_vm0, %v3076_v0  ;;  %v2870_v42 = vld [vmem:[%s3759_s2 + $0x260] ss:$8 sps:$4 sm:$0xff]   ;;  %v2878_v43 = vld [vmem:[%s3759_s2 + $0x254] ss:$8 sps:$4 sm:$0xff]   ;;  %v2876_v44 = vld [vmem:[%s3759_s2 + $0x250] ss:$8 sps:$4 sm:$0xff]  }
  0x1a   : > { %2418 = vmatmul.mubr.msk.bf16.vlgmr.msra.gmra.mxu0 %vm342_vm2, %v2835_v11  ;;  %2744 = vmatprep.subr.bf16.mxu1 %v3076_v0  ;;  %v2884_v45 = vld [vmem:[%s3759_s2 + $0x244] ss:$8 sps:$4 sm:$0xff]   ;;  %v2882_v46 = vld [vmem:[%s3759_s2 + $0x240] ss:$8 sps:$4 sm:$0xff]   ;;  %v2890_v47 = vld [vmem:[%s3759_s2 + $0x234] ss:$8 sps:$4 sm:$0xff]  }
  0x1b   : > { %515 = vmatpush1.bf16.msra.mxu0 %v3159_v8  ;;  %534 = vmatprep.mubr.bf16.mxu0 %v3077_v1  ;;  %v2893_v48 = vld [vmem:[%s3759_s2 + $0x2a4] ss:$8 sps:$4 sm:$0xff]   ;;  %v2888_v49 = vld [vmem:[%s3759_s2 + $0x230] ss:$8 sps:$4 sm:$0xff]   ;;  %v2891_v50 = vld [vmem:[%s3759_s2 + $0x2a0] ss:$8 sps:$4 sm:$0xff]  }
  0x1c   : > { %516 = vmatprep.subr.bf16.mxu0 %v3151_v6  ;;  %v2896_v51 = vld [vmem:[%s3759_s2 + $0x224] ss:$8 sps:$4 sm:$0xff]   ;;  %v2899_v52 = vld [vmem:[%s3759_s2 + $0x294] ss:$8 sps:$4 sm:$0xff]   ;;  %v2894_v53 = vld [vmem:[%s3759_s2 + $0x220] ss:$8 sps:$4 sm:$0xff]  }
  0x1d   : > { %2745 = vmatpush3.bf16.msra.mxu1 %v3162_v9  ;;  %v2897_v54 = vld [vmem:[%s3759_s2 + $0x290] ss:$8 sps:$4 sm:$0xff]   ;;  %v2902_v55 = vld [vmem:[%s3759_s2 + $0x214] ss:$8 sps:$4 sm:$0xff]   ;;  %v2905_v56 = vld [vmem:[%s3759_s2 + $0x284] ss:$8 sps:$4 sm:$0xff]  }
  0x1e   : > { %921 = vmatprep.subr.bf16.mxu1 %v2863_v12  ;;  %v2900_v57 = vld [vmem:[%s3759_s2 + $0x210] ss:$8 sps:$4 sm:$0xff]   ;;  %v2903_v58 = vld [vmem:[%s3759_s2 + $0x280] ss:$8 sps:$4 sm:$0xff]   ;;  %v2908_v59 = vld [vmem:[%s3759_s2 + $0x204] ss:$8 sps:$4 sm:$0xff]  }
  0x1f   : > { %517 = vmatpush1.bf16.msra.mxu0 %v3166_v10  ;;  %v2911_v60 = vld [vmem:[%s3759_s2 + $0x74] ss:$8 sps:$4 sm:$0xff]   ;;  %v2906_v61 = vld [vmem:[%s3759_s2 + $0x200] ss:$8 sps:$4 sm:$0xff]   ;;  %vm1801_vm6 = vcmask 1041408   ;;  %vm1810_vm7 = vcmask 392195  }
  0x20   : > { %878 = vmatprep.subr.bf16.mxu0 %v2839_v13  ;;  %2747 = vmatmul.mubr.msk.bf16.vlgmr.msra.gmra.mxu1 %vm342_vm2, %v2836_v14  ;;  %v2914_v62 = vld [vmem:[%s3759_s2 + $0x174] ss:$8 sps:$4 sm:$0xff]   ;;  %vm1812_vm8 = vcmask 386048   ;;  %vm1821_vm9 = vcmask 1040384   ;;  %s3079_s29 = smov 80   ;;  %s3082_s10 = smov 96  }
  0x21   : > { %922 = vmatpush1.bf16.msra.mxu1 %v2861_v15  ;;  %953 = vmatprep.mubr.bf16.mxu1 %v3077_v1  ;;  %vm1862_vm10 = vcmask 130048   ;;  %vm1866_vm11 = vcmask 15360   ;;  %vm1981_vm12 = vcmask 261120   ;;  %s2809_s25 = smul.u32 3, %s3767_s28 }
  0x22   : > { %2424 = vmatmul.mubr.msk.bf16.vlgmr.msra.gmra.mxu0 %vm342_vm2, %v2836_v14  ;;  %923 = vmatprep.subr.bf16.mxu1 %v2869_v17 }
  0x23   : > { %879 = vmatpush1.bf16.msra.mxu0 %v2837_v16 }
  0x24   : > { %880 = vmatprep.subr.bf16.mxu0 %v2842_v18 }
  0x25   : > { %924 = vmatpush1.bf16.msra.mxu1 %v2867_v19 }
  0x26   : > { %925 = vmatprep.subr.bf16.mxu1 %v2875_v21 }
  0x27   : > { %881 = vmatpush1.bf16.msra.mxu0 %v2840_v20 }
  0x28   : > { %882 = vmatprep.subr.bf16.mxu0 %v2845_v22  ;;  %v2909_v22 = vld [vmem:[%s3759_s2 + $0x70] ss:$8 sps:$4 sm:$0xff]  }
  0x29   : > { %926 = vmatpush1.bf16.msra.mxu1 %v2873_v23 }
  0x2a   : > { %927 = vmatprep.subr.bf16.mxu1 %v2881_v25  ;;  %v2917_v25 = vld [vmem:[%s3759_s2 + $0x64] ss:$8 sps:$4 sm:$0xff]  }
  0x2b   : > { %883 = vmatpush1.bf16.msra.mxu0 %v2843_v24 }
  0x2c   : > { %884 = vmatprep.subr.bf16.mxu0 %v2848_v26 }
  0x2d   : > { %928 = vmatpush1.bf16.msra.mxu1 %v2879_v27 }
  0x2e   : > { %929 = vmatprep.subr.bf16.mxu1 %v2887_v29 }
  0x2f   : > { %885 = vmatpush1.bf16.msra.mxu0 %v2846_v28 }
  0x30   : > { %886 = vmatprep.subr.bf16.mxu0 %v2851_v30  ;;  %v2912_v30 = vld [vmem:[%s3759_s2 + $0x170] ss:$8 sps:$4 sm:$0xff]  }
  0x31   : > { %930 = vmatpush1.bf16.msra.mxu1 %v2885_v31  ;;  %v2915_v31 = vld [vmem:[%s3759_s2 + $0x60] ss:$8 sps:$4 sm:$0xff]  }
  0x32   : > { %931 = vmatprep.subr.bf16.mxu1 %v2893_v48  ;;  %v2944_v48 = vld [vmem:[%s3759_s2 + $0x124] ss:$8 sps:$4 sm:$0xff]  }
  0x33   : > { %887 = vmatpush1.bf16.msra.mxu0 %v2849_v32  ;;  %v2920_v32 = vld [vmem:[%s3759_s2 + $0x164] ss:$8 sps:$4 sm:$0xff]  }
  0x34   : > { %888 = vmatprep.subr.bf16.mxu0 %v2854_v33  ;;  %v2923_v33 = vld [vmem:[%s3759_s2 + $0x54] ss:$8 sps:$4 sm:$0xff]  }
  0x35   : > { %932 = vmatpush1.bf16.msra.mxu1 %v2891_v50  ;;  %v2942_v50 = vld [vmem:[%s3759_s2 + $0x120] ss:$8 sps:$4 sm:$0xff]  }
  0x36   : > { %933 = vmatprep.subr.bf16.mxu1 %v2899_v52  ;;  %v2950_v52 = vld [vmem:[%s3759_s2 + $0x114] ss:$8 sps:$4 sm:$0xff]  }
  0x37   : > { %889 = vmatpush1.bf16.msra.mxu0 %v2852_v34  ;;  %v2918_v34 = vld [vmem:[%s3759_s2 + $0x160] ss:$8 sps:$4 sm:$0xff]  }
  0x38   : > { %890 = vmatprep.subr.bf16.mxu0 %v2857_v35  ;;  %v2921_v35 = vld [vmem:[%s3759_s2 + $0x50] ss:$8 sps:$4 sm:$0xff]  }
  0x39   : > { %934 = vmatpush1.bf16.msra.mxu1 %v2897_v54  ;;  %v2948_v54 = vld [vmem:[%s3759_s2 + $0x110] ss:$8 sps:$4 sm:$0xff]  }
  0x3a   : > { %935 = vmatprep.subr.bf16.mxu1 %v2905_v56  ;;  %v2956_v56 = vld [vmem:[%s3759_s2 + $0x104] ss:$8 sps:$4 sm:$0xff]  }
  0x3b   : > { %891 = vmatpush1.bf16.msra.mxu0 %v2855_v36  ;;  %v2926_v36 = vld [vmem:[%s3759_s2 + $0x154] ss:$8 sps:$4 sm:$0xff]  }
  0x3c   : > { %892 = vmatprep.subr.bf16.mxu0 %v2860_v37  ;;  %v2929_v37 = vld [vmem:[%s3759_s2 + $0x44] ss:$8 sps:$4 sm:$0xff]  }
  0x3d   : > { %936 = vmatpush1.bf16.msra.mxu1 %v2903_v58  ;;  %v2954_v58 = vld [vmem:[%s3759_s2 + $0x100] ss:$8 sps:$4 sm:$0xff]  }
  0x3e   : > { %1204 = vmatprep.subr.bf16.mxu1 %v2911_v60  ;;  %v2962_v60 = vld [vmem:[%s3759_s2 + $0xe4] ss:$8 sps:$4 sm:$0xff]  }
  0x3f   : > { %893 = vmatpush1.bf16.msra.mxu0 %v2858_v38  ;;  %v2924_v38 = vld [vmem:[%s3759_s2 + $0x150] ss:$8 sps:$4 sm:$0xff]  }
  0x40   : > { %894 = vmatprep.subr.bf16.mxu0 %v2866_v39  ;;  %v2927_v39 = vld [vmem:[%s3759_s2 + $0x40] ss:$8 sps:$4 sm:$0xff]  }
  0x43   : > { %895 = vmatpush2.bf16.msra.mxu0 %v2864_v40  ;;  %v2932_v40 = vld [vmem:[%s3759_s2 + $0x144] ss:$8 sps:$4 sm:$0xff]  }
  0x44   : > { %896 = vmatprep.subr.bf16.mxu0 %v2872_v41  ;;  %v2935_v41 = vld [vmem:[%s3759_s2 + $0x34] ss:$8 sps:$4 sm:$0xff]  }
  0x47   : > { %897 = vmatpush2.bf16.msra.mxu0 %v2870_v42  ;;  %v2930_v42 = vld [vmem:[%s3759_s2 + $0x140] ss:$8 sps:$4 sm:$0xff]  }
  0x48   : > { %898 = vmatprep.subr.bf16.mxu0 %v2878_v43  ;;  %v2933_v43 = vld [vmem:[%s3759_s2 + $0x30] ss:$8 sps:$4 sm:$0xff]  }
  0x4b   : > { %899 = vmatpush2.bf16.msra.mxu0 %v2876_v44  ;;  %v2938_v44 = vld [vmem:[%s3759_s2 + $0x134] ss:$8 sps:$4 sm:$0xff]  }
  0x4c   : > { %900 = vmatprep.subr.bf16.mxu0 %v2884_v45  ;;  %v2941_v45 = vld [vmem:[%s3759_s2 + $0x24] ss:$8 sps:$4 sm:$0xff]  }
  0x4f   : > { %901 = vmatpush2.bf16.msra.mxu0 %v2882_v46  ;;  %v2936_v46 = vld [vmem:[%s3759_s2 + $0x130] ss:$8 sps:$4 sm:$0xff]  }
  0x50   : > { %902 = vmatprep.subr.bf16.mxu0 %v2890_v47  ;;  %v2939_v47 = vld [vmem:[%s3759_s2 + $0x20] ss:$8 sps:$4 sm:$0xff]  }
  0x53   : > { %903 = vmatpush2.bf16.msra.mxu0 %v2888_v49  ;;  %v2947_v49 = vld [vmem:[%s3759_s2 + $0x14] ss:$8 sps:$4 sm:$0xff]  }
  0x54   : > { %904 = vmatprep.subr.bf16.mxu0 %v2896_v51  ;;  %v2945_v51 = vld [vmem:[%s3759_s2 + $0x10] ss:$8 sps:$4 sm:$0xff]  }
  0x57   : > { %905 = vmatpush2.bf16.msra.mxu0 %v2894_v53  ;;  %v2953_v53 = vld [vmem:[%s3759_s2 + $0x4] ss:$8 sps:$4 sm:$0xff]  }
  0x58   : > { %906 = vmatprep.subr.bf16.mxu0 %v2902_v55  ;;  %v2951_v55 = vld [vmem:[%s3759_s2] ss:$8 sps:$4 sm:$0xff]  }
  0x5b   : > { %907 = vmatpush2.bf16.msra.mxu0 %v2900_v57  ;;  %v2959_v57 = vld [vmem:[%s3759_s2 + $0xf4] ss:$8 sps:$4 sm:$0xff]  }
  0x5c   : > { %908 = vmatprep.subr.bf16.mxu0 %v2908_v59  ;;  %v2957_v59 = vld [vmem:[%s3759_s2 + $0xf0] ss:$8 sps:$4 sm:$0xff]  }
  0x5f   : > { %909 = vmatpush2.bf16.msra.mxu0 %v2906_v61  ;;  %v2960_v61 = vld [vmem:[%s3759_s2 + $0xe0] ss:$8 sps:$4 sm:$0xff]  }
  0x60   : > { %1247 = vmatprep.subr.bf16.mxu0 %v2914_v62 }
  0xd8   : > { %v3344_v63 = vpop.f32.mrf.mxu1 }
  0xda   : > { %v3346_v2 = vpop.f32.mrf.mxu0  ;;  %v2740_v3 = vpop.f32.mrf.mxu1 }
  0xdb   : > { %v2965_v3 = vld [vmem:[%s3759_s2 + $0xd4] ss:$8 sps:$4 sm:$0xff]  }
  0xdc   : > { %v392_v5 = vpop.f32.mrf.mxu0  ;;  %v3348_v11 = vpop.f32.mrf.mxu1 }
  0xdd   : > { %v442_v62 = vpack.c.bf16 %v3348_v11, %v3344_v63  ;;  %v2968_v63 = vld [vmem:[%s3759_s2 + $0xc4] ss:$8 sps:$4 sm:$0xff]   ;;  %v2966_v11 = vld [vmem:[%s3759_s2 + $0xc0] ss:$8 sps:$4 sm:$0xff]  }
  0xde   : > { %v3350_v12 = vpop.f32.mrf.mxu0  ;;  %v2741_v14 = vpop.f32.mrf.mxu1 }
  0xdf   : > { %v440_v13 = vpack.c.bf16 %v3350_v12, %v3346_v2  ;;  %v2974_v14 = vld [vmem:[%s3759_s2 + $0xa4] ss:$8 sps:$4 sm:$0xff]   ;;  %v2985_v12 = vld [vmem:[%s3759_s2 + $0x360] ss:$8 sps:$4 sm:$0xff]  }
  0xe0   : > { %v396_v15 = vpop.f32.mrf.mxu0  ;;  %v579_v16 = vpop.f32.mrf.mxu1  ;;  %v2987_v2 = vld [vmem:[%s3759_s2 + $0x364] ss:$8 sps:$4 sm:$0xff]  }
  0xe1   : > { %v441_v20 = vpack.c.bf16 %v396_v15, %v392_v5  ;;  %v2963_v5 = vld [vmem:[%s3759_s2 + $0xd0] ss:$8 sps:$4 sm:$0xff]   ;;  %v2977_v15 = vld [vmem:[%s3759_s2 + $0x94] ss:$8 sps:$4 sm:$0xff]  }
  0xe2   : > { %v536_v17 = vpop.f32.mrf.mxu0  ;;  %v2748_v18 = vpop.f32.mrf.mxu1 }
  0xe3   : > { %v2979_v18 = vld [vmem:[%s3759_s2 + $0x80] ss:$8 sps:$4 sm:$0xff]  }
  0xe4   : > { %v538_v19 = vpop.f32.mrf.mxu0  ;;  %v582_v21 = vpop.f32.mrf.mxu1 }
  0xe5   : > { %v588_v24 = vpack.c.bf16 %v582_v21, %v579_v16  ;;  %v2975_v16 = vld [vmem:[%s3759_s2 + $0x90] ss:$8 sps:$4 sm:$0xff]   ;;  %v2993_v21 = vld [vmem:[%s3759_s2 + $0x344] ss:$8 sps:$4 sm:$0xff]  }
  0xe6   : > { %v540_v23 = vpop.f32.mrf.mxu0  ;;  %v2749_v26 = vpop.f32.mrf.mxu1 }
  0xe7   : > { %v586_v27 = vpack.c.bf16 %v540_v23, %v536_v17  ;;  %954 = vmatmul.mubr.bf16.vlgmr.msra.gmra.mxu1 %v588_v24  ;;  %v2981_v17 = vld [vmem:[%s3759_s2 + $0x84] ss:$8 sps:$4 sm:$0xff]   ;;  %v2994_v23 = vld [vmem:[%s3759_s2 + $0x330] ss:$8 sps:$4 sm:$0xff]   ;;  %v3002_v26 = vld [vmem:[%s3759_s2 + $0x314] ss:$8 sps:$4 sm:$0xff]  }
  0xe8   : > { %v542_v28 = vpop.f32.mrf.mxu0  ;;  %1205 = vmatpush1.bf16.msra.mxu1 %v2909_v22  ;;  %1236 = vmatprep.mubr.bf16.mxu1 %v441_v20  ;;  %v2984_v20 = vld [vmem:[%s3759_s2 + $0x374] ss:$8 sps:$4 sm:$0xff]   ;;  %v2999_v24 = vld [vmem:[%s3759_s2 + $0x324] ss:$8 sps:$4 sm:$0xff]  }
  0xe9   : > { %v587_v29 = vpack.c.bf16 %v542_v28, %v538_v19  ;;  %1206 = vmatprep.subr.bf16.mxu1 %v2917_v25  ;;  %v2982_v19 = vld [vmem:[%s3759_s2 + $0x370] ss:$8 sps:$4 sm:$0xff]   ;;  %v2996_v22 = vld [vmem:[%s3759_s2 + $0x334] ss:$8 sps:$4 sm:$0xff]   ;;  %v2997_v25 = vld [vmem:[%s3759_s2 + $0x320] ss:$8 sps:$4 sm:$0xff]  }
  0xea   : > { %v3005_v28 = vld [vmem:[%s3759_s2 + $0x304] ss:$8 sps:$4 sm:$0xff]  }
  0xeb   : > { %910 = vmatprep.mubr.bf16.mxu0 %v587_v29  ;;  %v3003_v29 = vld [vmem:[%s3759_s2 + $0x300] ss:$8 sps:$4 sm:$0xff]  }
  0xec   : > { %911 = vmatmul.mubr.bf16.vlgmr.msra.gmra.mxu0 %v586_v27  ;;  %1207 = vmatpush1.bf16.msra.mxu1 %v2915_v31  ;;  %v3000_v27 = vld [vmem:[%s3759_s2 + $0x310] ss:$8 sps:$4 sm:$0xff]  }
  0xed   : > { %1248 = vmatpush1.bf16.msra.mxu0 %v2912_v30  ;;  %1208 = vmatprep.subr.bf16.mxu1 %v2923_v33  ;;  %v3008_v30 = vld [vmem:[%s3759_s2 + $0x3f4] ss:$8 sps:$4 sm:$0xff]   ;;  %v3006_v31 = vld [vmem:[%s3759_s2 + $0x3f0] ss:$8 sps:$4 sm:$0xff]   ;;  %v3009_v33 = vld [vmem:[%s3759_s2 + $0x3e0] ss:$8 sps:$4 sm:$0xff]  }
  0xee   : > { %1249 = vmatprep.subr.bf16.mxu0 %v2920_v32  ;;  %1279 = vmatprep.mubr.bf16.mxu0 %v3077_v1  ;;  %v3011_v32 = vld [vmem:[%s3759_s2 + $0x3e4] ss:$8 sps:$4 sm:$0xff]  }
  0xf0   : > { %1209 = vmatpush1.bf16.msra.mxu1 %v2921_v35  ;;  %v3012_v35 = vld [vmem:[%s3759_s2 + $0x3d0] ss:$8 sps:$4 sm:$0xff]  }
  0xf1   : > { %1250 = vmatpush1.bf16.msra.mxu0 %v2918_v34  ;;  %1210 = vmatprep.subr.bf16.mxu1 %v2929_v37  ;;  %v3014_v34 = vld [vmem:[%s3759_s2 + $0x3d4] ss:$8 sps:$4 sm:$0xff]   ;;  %v3018_v37 = vld [vmem:[%s3759_s2 + $0x470] ss:$8 sps:$4 sm:$0xff]  }
  0xf2   : > { %1251 = vmatprep.subr.bf16.mxu0 %v2926_v36  ;;  %v3017_v36 = vld [vmem:[%s3759_s2 + $0x3c4] ss:$8 sps:$4 sm:$0xff]  }
  0xf4   : > { %1211 = vmatpush1.bf16.msra.mxu1 %v2927_v39  ;;  %v3020_v39 = vld [vmem:[%s3759_s2 + $0x474] ss:$8 sps:$4 sm:$0xff]  }
  0xf5   : > { %1252 = vmatpush1.bf16.msra.mxu0 %v2924_v38  ;;  %1212 = vmatprep.subr.bf16.mxu1 %v2935_v41  ;;  %v3015_v38 = vld [vmem:[%s3759_s2 + $0x3c0] ss:$8 sps:$4 sm:$0xff]   ;;  %v3026_v41 = vld [vmem:[%s3759_s2 + $0x464] ss:$8 sps:$4 sm:$0xff]  }
  0xf6   : > { %1253 = vmatprep.subr.bf16.mxu0 %v2932_v40  ;;  %v3023_v40 = vld [vmem:[%s3759_s2 + $0x3b4] ss:$8 sps:$4 sm:$0xff]  }
  0xf8   : > { %1213 = vmatpush1.bf16.msra.mxu1 %v2933_v43  ;;  %v3021_v43 = vld [vmem:[%s3759_s2 + $0x3b0] ss:$8 sps:$4 sm:$0xff]  }
  0xf9   : > { %1254 = vmatpush1.bf16.msra.mxu0 %v2930_v42  ;;  %1214 = vmatprep.subr.bf16.mxu1 %v2941_v45  ;;  %v3024_v42 = vld [vmem:[%s3759_s2 + $0x460] ss:$8 sps:$4 sm:$0xff]   ;;  %v3029_v45 = vld [vmem:[%s3759_s2 + $0x3a4] ss:$8 sps:$4 sm:$0xff]  }
  0xfa   : > { %1255 = vmatprep.subr.bf16.mxu0 %v2938_v44  ;;  %v3032_v44 = vld [vmem:[%s3759_s2 + $0x454] ss:$8 sps:$4 sm:$0xff]  }
  0xfc   : > { %1215 = vmatpush1.bf16.msra.mxu1 %v2939_v47  ;;  %v3027_v47 = vld [vmem:[%s3759_s2 + $0x3a0] ss:$8 sps:$4 sm:$0xff]  }
  0xfd   : > { %1256 = vmatpush1.bf16.msra.mxu0 %v2936_v46  ;;  %1216 = vmatprep.subr.bf16.mxu1 %v2947_v49  ;;  %v3030_v46 = vld [vmem:[%s3759_s2 + $0x450] ss:$8 sps:$4 sm:$0xff]   ;;  %v3035_v49 = vld [vmem:[%s3759_s2 + $0x394] ss:$8 sps:$4 sm:$0xff]  }
  0xfe   : > { %1257 = vmatprep.subr.bf16.mxu0 %v2944_v48  ;;  %v3038_v48 = vld [vmem:[%s3759_s2 + $0x444] ss:$8 sps:$4 sm:$0xff]  }
 0x100   : > { %1217 = vmatpush1.bf16.msra.mxu1 %v2945_v51  ;;  %v3033_v51 = vld [vmem:[%s3759_s2 + $0x390] ss:$8 sps:$4 sm:$0xff]  }
 0x101   : > { %1258 = vmatpush1.bf16.msra.mxu0 %v2942_v50  ;;  %1218 = vmatprep.subr.bf16.mxu1 %v2953_v53  ;;  %v3036_v50 = vld [vmem:[%s3759_s2 + $0x440] ss:$8 sps:$4 sm:$0xff]   ;;  %v3041_v53 = vld [vmem:[%s3759_s2 + $0x384] ss:$8 sps:$4 sm:$0xff]  }
 0x102   : > { %1259 = vmatprep.subr.bf16.mxu0 %v2950_v52  ;;  %v3044_v52 = vld [vmem:[%s3759_s2 + $0x434] ss:$8 sps:$4 sm:$0xff]  }
 0x104   : > { %1219 = vmatpush1.bf16.msra.mxu1 %v2951_v55  ;;  %v3039_v55 = vld [vmem:[%s3759_s2 + $0x380] ss:$8 sps:$4 sm:$0xff]  }
 0x105   : > { %1260 = vmatpush1.bf16.msra.mxu0 %v2948_v54  ;;  %1220 = vmatprep.subr.bf16.mxu1 %v2959_v57  ;;  %v3042_v54 = vld [vmem:[%s3759_s2 + $0x430] ss:$8 sps:$4 sm:$0xff]   ;;  %v3045_v57 = vld [vmem:[%s3759_s2 + $0x420] ss:$8 sps:$4 sm:$0xff]  }
 0x106   : > { %1261 = vmatprep.subr.bf16.mxu0 %v2956_v56  ;;  %v3047_v56 = vld [vmem:[%s3759_s2 + $0x424] ss:$8 sps:$4 sm:$0xff]  }
 0x108   : > { %1221 = vmatpush2.bf16.msra.mxu1 %v2957_v59  ;;  %v3048_v59 = vld [vmem:[%s3759_s2 + $0x410] ss:$8 sps:$4 sm:$0xff]  }
 0x109   : > { %1262 = vmatpush1.bf16.msra.mxu0 %v2954_v58  ;;  %1222 = vmatprep.subr.bf16.mxu1 %v2962_v60  ;;  %v3050_v58 = vld [vmem:[%s3759_s2 + $0x414] ss:$8 sps:$4 sm:$0xff]   ;;  %v3053_v60 = vld [vmem:[%s3759_s2 + $0x404] ss:$8 sps:$4 sm:$0xff]  }
 0x10a   : > { %2573 = vmatprep.subr.msk.bf16.mxu0 %vm346_vm1, %v3149_v4  ;;  %v2978_v4 = vld [vmem:[%s3758_s1 + $0x10] sm:$0x3f]  }
 0x10c   : > { %1280 = vmatmul.mubr.bf16.vlgmr.msra.gmra.mxu0 %v442_v62  ;;  %1223 = vmatpush2.bf16.msra.mxu1 %v2960_v61  ;;  %v3051_v61 = vld [vmem:[%s3759_s2 + $0x400] ss:$8 sps:$4 sm:$0xff]  }
 0x10d   : > { %1314 = vmatpush1.bf16.msra.mxu0 %v3159_v8  ;;  %1224 = vmatprep.subr.bf16.mxu1 %v2965_v3  ;;  %v2971_v8 = vld [vmem:[%s3759_s2 + $0xb4] ss:$8 sps:$4 sm:$0xff]  }
 0x10e   : > { %1315 = vmatprep.subr.bf16.mxu0 %v3151_v6  ;;  %1333 = vmatprep.mubr.bf16.mxu0 %v3077_v1  ;;  %v2969_v6 = vld [vmem:[%s3759_s2 + $0xb0] ss:$8 sps:$4 sm:$0xff]  }
 0x110   : > { %1225 = vmatpush2.bf16.msra.mxu1 %v2963_v5 }
 0x111   : > { %1316 = vmatpush1.bf16.msra.mxu0 %v3166_v10  ;;  %1226 = vmatprep.subr.bf16.mxu1 %v2968_v63  ;;  %v2972_v10 = vld [vmem:[%s3759_s2 + $0xa0] ss:$8 sps:$4 sm:$0xff]  }
 0x112   : > { %1677 = vmatprep.subr.bf16.mxu0 %v2984_v20 }
 0x114   : > { %2574 = vmatmul.mubr.msk.bf16.vlgmr.msra.gmra.mxu0 %vm342_vm2, %v2978_v4  ;;  %1227 = vmatpush2.bf16.msra.mxu1 %v2966_v11 }
 0x115   : > { %1228 = vmatprep.subr.bf16.mxu1 %v2971_v8  ;;  %1678 = vmatpush1.bf16.msra.mxu0 %v2982_v19 }
 0x116   : > { %1679 = vmatprep.subr.bf16.mxu0 %v2987_v2 }
 0x118   : > { %1229 = vmatpush2.bf16.msra.mxu1 %v2969_v6 }
 0x119   : > { %1230 = vmatprep.subr.bf16.mxu1 %v2974_v14  ;;  %1680 = vmatpush1.bf16.msra.mxu0 %v2985_v12 }
 0x11c   : > { %1231 = vmatpush2.bf16.msra.mxu1 %v2972_v10 }
 0x11d   : > { %1232 = vmatprep.subr.bf16.mxu1 %v2977_v15 }
 0x120   : > { %1233 = vmatpush2.bf16.msra.mxu1 %v2975_v16 }
 0x121   : > { %1234 = vmatprep.subr.bf16.mxu1 %v2981_v17 }
 0x124   : > { %1235 = vmatpush2.bf16.msra.mxu1 %v2979_v18 }
 0x125   : > { %2750 = vmatprep.subr.bf16.mxu1 %v3076_v0 }
 0x127   : > { %1237 = vmatmul.mubr.bf16.vlgmr.msra.gmra.mxu1 %v440_v13  ;;  %v2988_v13 = vld [vmem:[%s3759_s2 + $0x350] ss:$8 sps:$4 sm:$0xff]  }
 0x128   : > { %2751 = vmatpush3.bf16.msra.mxu1 %v3154_v7  ;;  %2754 = vmatprep.mubr.msk.bf16.mxu1 %vm3078_vm0, %v3076_v0  ;;  %v2990_v7 = vld [vmem:[%s3759_s2 + $0x354] ss:$8 sps:$4 sm:$0xff]  }
 0x129   : > { %2752 = vmatprep.subr.bf16.mxu1 %v3076_v0  ;;  %1681 = vmatprep.subr.bf16.mxu0 %v2990_v7 }
 0x12a   : > { %1682 = vmatpush1.bf16.msra.mxu0 %v2988_v13 }
 0x12b   : > { %1683 = vmatprep.subr.bf16.mxu0 %v2993_v21 }
 0x12c   : > { %2753 = vmatpush3.bf16.msra.mxu1 %v3162_v9  ;;  %v2991_v9 = vld [vmem:[%s3759_s2 + $0x340] ss:$8 sps:$4 sm:$0xff]  }
 0x12d   : > { %1720 = vmatprep.subr.bf16.mxu1 %v3020_v39  ;;  %v1769_v39 = vlaneseq }
 0x12e   : > { %1684 = vmatpush1.bf16.msra.mxu0 %v2991_v9 }
 0x12f   : > { %2755 = vmatmul.mubr.msk.bf16.vlgmr.msra.gmra.mxu1 %vm342_vm2, %v2978_v4  ;;  %1685 = vmatprep.subr.bf16.mxu0 %v2996_v22 }
 0x130   : > { %1752 = vmatprep.mubr.bf16.mxu1 %v3077_v1  ;;  %1721 = vmatpush1.bf16.msra.mxu1 %v3018_v37 }
 0x131   : > { %1722 = vmatprep.subr.bf16.mxu1 %v3026_v41 }
 0x132   : > { %1686 = vmatpush1.bf16.msra.mxu0 %v2994_v23 }
 0x133   : > { %1687 = vmatprep.subr.bf16.mxu0 %v2999_v24 }
 0x134   : > { %1723 = vmatpush1.bf16.msra.mxu1 %v3024_v42 }
 0x135   : > { %1724 = vmatprep.subr.bf16.mxu1 %v3032_v44 }
 0x136   : > { %1688 = vmatpush1.bf16.msra.mxu0 %v2997_v25 }
 0x137   : > { %1689 = vmatprep.subr.bf16.mxu0 %v3002_v26 }
 0x138   : > { %1725 = vmatpush1.bf16.msra.mxu1 %v3030_v46 }
 0x139   : > { %1726 = vmatprep.subr.bf16.mxu1 %v3038_v48 }
 0x13a   : > { %1690 = vmatpush1.bf16.msra.mxu0 %v3000_v27 }
 0x13b   : > { %1691 = vmatprep.subr.bf16.mxu0 %v3005_v28 }
 0x13c   : > { %1727 = vmatpush1.bf16.msra.mxu1 %v3036_v50 }
 0x13d   : > { %1728 = vmatprep.subr.bf16.mxu1 %v3044_v52 }
 0x13e   : > { %1692 = vmatpush1.bf16.msra.mxu0 %v3003_v29 }
 0x13f   : > { %1693 = vmatprep.subr.bf16.mxu0 %v3008_v30 }
 0x140   : > { %1729 = vmatpush1.bf16.msra.mxu1 %v3042_v54 }
 0x141   : > { %1730 = vmatprep.subr.bf16.mxu1 %v3047_v56 }
 0x142   : > { %1694 = vmatpush2.bf16.msra.mxu0 %v3006_v31 }
 0x143   : > { %1695 = vmatprep.subr.bf16.mxu0 %v3011_v32 }
 0x144   : > { %1731 = vmatpush1.bf16.msra.mxu1 %v3045_v57 }
 0x145   : > { %1732 = vmatprep.subr.bf16.mxu1 %v3050_v58 }
 0x146   : > { %1696 = vmatpush2.bf16.msra.mxu0 %v3009_v33 }
 0x147   : > { %1697 = vmatprep.subr.bf16.mxu0 %v3014_v34 }
 0x148   : > { %1733 = vmatpush1.bf16.msra.mxu1 %v3048_v59 }
 0x149   : > { %1734 = vmatprep.subr.bf16.mxu1 %v3053_v60 }
 0x14a   : > { %1698 = vmatpush2.bf16.msra.mxu0 %v3012_v35 }
 0x14b   : > { %1699 = vmatprep.subr.bf16.mxu0 %v3017_v36 }
 0x14c   : > { %1735 = vmatpush1.bf16.msra.mxu1 %v3051_v61 }
 0x14d   : > { %2758 = vmatprep.subr.bf16.mxu1 %v3076_v0 }
 0x14e   : > { %1700 = vmatpush2.bf16.msra.mxu0 %v3015_v38 }
 0x14f   : > { %1701 = vmatprep.subr.bf16.mxu0 %v3023_v40  ;;  %v3666_v40 = vshrl.u32 %v1769_v39, 7 }
 0x151   : > { %v1771_v42 = vsub.s32 0, %v3666_v40 }
 0x152   : > { %1702 = vmatpush2.bf16.msra.mxu0 %v3021_v43  ;;  %v1767_v43 = vld [vmem:[%s3760_s3] sm:$0x3] }
 0x153   : > { %1703 = vmatprep.subr.bf16.mxu0 %v3029_v45  ;;  %v1775_v45 = vsub.s32 1, %v3666_v40  ;;  %v1772_v48 = vrot.slane %v1767_v43, %v1771_v42 }
 0x156   : > { %1704 = vmatpush2.bf16.msra.mxu0 %v3027_v47 }
 0x157   : > { %1705 = vmatprep.subr.bf16.mxu0 %v3035_v49 }
 0x15a   : > { %1706 = vmatpush2.bf16.msra.mxu0 %v3033_v51 }
 0x15b   : > { %1707 = vmatprep.subr.bf16.mxu0 %v3041_v53  ;;  %v1776_v53 = vrot.slane %v1767_v43, %v1775_v45 }
 0x15e   : > { %1708 = vmatpush2.bf16.msra.mxu0 %v3039_v55 }
 0x15f   : > { %2786 = vmatprep.subr.bf16.mxu0 %v3076_v0 }
 0x1a7   : > { %v955_v62 = vpop.f32.mrf.mxu1 }
 0x1a9   : > { %v957_v3 = vpop.f32.mrf.mxu1 }
 0x1ab   : > { %v959_v4 = vpop.f32.mrf.mxu1 }
 0x1ac   : > { %v912_v5 = vpop.f32.mrf.mxu0 }
 0x1ad   : > { %v956_v63 = vadd.f32 %v955_v62, %v912_v5  ;;  %v961_v10 = vpop.f32.mrf.mxu1 }
 0x1ae   : > { %v914_v11 = vpop.f32.mrf.mxu0 }
 0x1af   : > { %v958_v8 = vadd.f32 %v957_v3, %v914_v11 }
 0x1b0   : > { %v916_v6 = vpop.f32.mrf.mxu0 }
 0x1b1   : > { %v960_v14 = vadd.f32 %v959_v4, %v916_v6 }
 0x1b2   : > { %v918_v15 = vpop.f32.mrf.mxu0 }
 0x1b3   : > { %v962_v16 = vadd.f32 %v961_v10, %v918_v15 }
 0x1cc   : > { %v1281_v17 = vpop.f32.mrf.mxu0 }
 0x1ce   : > { %v1283_v18 = vpop.f32.mrf.mxu0 }
 0x1d0   : > { %v1285_v19 = vpop.f32.mrf.mxu0 }
 0x1d2   : > { %v1287_v20 = vpop.f32.mrf.mxu0 }
 0x1d4   : > { %v1335_v2 = vpop.f32.mrf.mxu0 }
 0x1d6   : > { %v1337_v12 = vpop.f32.mrf.mxu0 }
 0x1d8   : > { %v1339_v7 = vpop.f32.mrf.mxu0 }
 0x1d9   : > { %v1385_v13 = vpack.c.bf16 %v1339_v7, %v1335_v2 }
 0x1da   : > { %v1341_v9 = vpop.f32.mrf.mxu0 }
 0x1db   : > { %v1386_v21 = vpack.c.bf16 %v1341_v9, %v1337_v12 }
 0x1dd   : > { %1709 = vmatprep.mubr.bf16.mxu0 %v1386_v21 }
 0x1de   : > { %1710 = vmatmul.mubr.bf16.vlgmr.msra.gmra.mxu0 %v1385_v13 }
 0x1df   : > { %2788 = vmatprep.mubr.msk.bf16.mxu0 %vm3078_vm0, %v3076_v0 }
 0x1e7   : > { %v1238_v22 = vpop.f32.mrf.mxu1 }
 0x1e8   : > { %v1239_v23 = vadd.f32 %v1238_v22, %v956_v63 }
 0x1e9   : > { %v1240_v24 = vpop.f32.mrf.mxu1 }
 0x1ea   : > { %v1282_v25 = vadd.f32 %v1281_v17, %v1239_v23  ;;  %v1241_v26 = vadd.f32 %v1240_v24, %v958_v8 }
 0x1eb   : > { %v1242_v27 = vpop.f32.mrf.mxu1 }
 0x1ec   : > { %v1284_v28 = vadd.f32 %v1283_v18, %v1241_v26  ;;  %v1243_v29 = vadd.f32 %v1242_v27, %v960_v14 }
 0x1ed   : > { %v1244_v30 = vpop.f32.mrf.mxu1 }
 0x1ee   : > { %v1286_v31 = vadd.f32 %v1285_v19, %v1243_v29  ;;  %v1245_v32 = vadd.f32 %v1244_v30, %v962_v16 }
 0x1ef   : > { %v1378_v33 = vpop.f32.mrf.mxu1 }
 0x1f0   : > { %v1288_v34 = vadd.f32 %v1287_v20, %v1245_v32 }
 0x1f1   : > { %v2756_v35 = vpop.f32.mrf.mxu1 }
 0x1f3   : > { %v1381_v36 = vpop.f32.mrf.mxu1 }
 0x1f4   : > { %v1387_v37 = vpack.c.bf16 %v1381_v36, %v1378_v33 }
 0x1f5   : > { %v2757_v38 = vpop.f32.mrf.mxu1 }
 0x1f6   : > { %1753 = vmatmul.mubr.bf16.vlgmr.msra.gmra.mxu1 %v1387_v37 }
 0x1f7   : > { %2760 = vmatprep.mubr.msk.bf16.mxu1 %vm3078_vm0, %v3076_v0 }
 0x29e   : > { %v1711_v41 = vpop.f32.mrf.mxu0 }
 0x2a0   : > { %v1713_v44 = vpop.f32.mrf.mxu0 }
 0x2a2   : > { %v1715_v50 = vpop.f32.mrf.mxu0 }
 0x2a4   : > { %v1717_v59 = vpop.f32.mrf.mxu0 }
 0x2b6   : > { %v1754_v46 = vpop.f32.mrf.mxu1 }
 0x2b7   : > { %v1755_v47 = vadd.f32 %v1754_v46, %v1711_v41 }
 0x2b8   : > { %v1756_v49 = vpop.f32.mrf.mxu1 }
 0x2b9   : > { %v1763_v51 = vadd.f32 %v1755_v47, %v1282_v25  ;;  %v1757_v52 = vadd.f32 %v1756_v49, %v1713_v44 }
 0x2ba   : > { %v1758_v54 = vpop.f32.mrf.mxu1 }
 0x2bb   : > { %v1779_v55 = vadd.f32 %v1772_v48, %v1763_v51  ;;  %v1764_v56 = vadd.f32 %v1757_v52, %v1284_v28  ;;  %v1759_v57 = vadd.f32 %v1758_v54, %v1715_v50 }
 0x2bc   : > { %v1760_v58 = vpop.f32.mrf.mxu1 }
 0x2bd   : > { %v1784_v60 = vsel %vm1783_vm3, %v1779_v55, -inf  ;;  %v1780_v61 = vadd.f32 %v1776_v53, %v1764_v56  ;;  %v1765_v62 = vadd.f32 %v1759_v57, %v1286_v31  ;;  %v1761_v5 = vadd.f32 %v1760_v58, %v1717_v59  ;;  %v1865_v59 = vld [vmem:[%s3761_s4] sm:$0x1] }
 0x2be   : > { %v1785_v3 = vrot.slane %v1784_v60, 4  ;;  %v1800_v14 = vsel %vm1799_vm5, %v1779_v55, -inf }
 0x2bf   : > { %v1792_v63 = vsel %vm1791_vm4, %v1780_v61, -inf  ;;  %v1781_v4 = vadd.f32 %v1772_v48, %v1765_v62  ;;  %v1766_v6 = vadd.f32 %v1761_v5, %v1288_v34  ;;  %v1811_v19 = vsel %vm1810_vm7, %v1780_v61, -inf  ;;  %v2673_v61 = vld [vmem:[%s3761_s4 + $0x1] sm:$0x1]  ;;  %v3054_v62 = vld [vmem:[%s3762_s5 + $0x18] sm:$0xff]  }
 0x2c0   : > { %v1786_v11 = vmax.f32 %v1784_v60, %v1785_v3  ;;  %v1793_v8 = vrot.slane %v1792_v63, 4  ;;  %v2685_v60 = vld [vmem:[%s3761_s4 + $0x2] sm:$0x1]  ;;  %v3055_v3 = vld [vmem:[%s3762_s5 + $0x10] sm:$0xff]  }
 0x2c1   : > { %v1802_v10 = vsel %vm1801_vm6, %v1781_v4, -inf  ;;  %v1782_v18 = vadd.f32 %v1776_v53, %v1766_v6 }
 0x2c2   : > { %v1787_v15 = vrot.slane %v1786_v11, 2  ;;  %v1794_v16 = vmax.f32 %v1792_v63, %v1793_v8  ;;  %v1803_v17 = vmax.f32 %v1800_v14, %v1802_v10 }
 0x2c3   : > { %v1813_v2 = vsel %vm1812_vm8, %v1782_v18, -inf }
 0x2c4   : > { %v1804_v20 = vrot.slane %v1803_v17, 4  ;;  %v1795_v12 = vrot.slane %v1794_v16, 2  ;;  %v1814_v7 = vmax.f32 %v1811_v19, %v1813_v2  ;;  %v1788_v13 = vmax.f32 %v1786_v11, %v1787_v15  ;;  %v3056_v15 = vld [vmem:[%s3762_s5 + $0x8] sm:$0xff]   ;;  %v3057_v19 = vld [vmem:[%s3762_s5] sm:$0xff]  }
 0x2c5   : > { %v3058_v2 = vld [vmem:[%s3762_s5 + $0x28] sm:$0xff]  }
 0x2c6   : > { %v1805_v9 = vmax.f32 %v1803_v17, %v1804_v20  ;;  %v1815_v21 = vrot.slane %v1814_v7, 4  ;;  %v1796_v24 = vmax.f32 %v1794_v16, %v1795_v12  ;;  %v1789_v25 = vrot.slane %v1788_v13, 1 }
 0x2c8   : > { %v1806_v22 = vrot.slane %v1805_v9, 2  ;;  %v1816_v23 = vmax.f32 %v1814_v7, %v1815_v21  ;;  %v1797_v29 = vrot.slane %v1796_v24, 1  ;;  %v1790_v31 = vmax.f32 %v1788_v13, %v1789_v25  ;;  %v3059_v7 = vld [vmem:[%s3762_s5 + $0x20] sm:$0xff]   ;;  %v3062_v21 = vld [vmem:[%s3764_s7 + $0x1c] ss:$12 sps:$4 sm:$0xff]  }
 0x2c9   : > { %v3067_v25 = vld [vmem:[%s3764_s7 + $0x8] ss:$12 sps:$4 sm:$0xff]  }
 0x2ca   : > { %v1807_v26 = vmax.f32 %v1805_v9, %v1806_v22  ;;  %v1817_v27 = vrot.slane %v1816_v23, 2  ;;  %v1798_v35 = vmax.f32 %v1796_v24, %v1797_v29  ;;  %v3060_v9 = vld [vmem:[%s3764_s7 + $0x18] ss:$12 sps:$4 sm:$0xff]   ;;  %v3063_v22 = vld [vmem:[%s3764_s7 + $0x20] ss:$12 sps:$4 sm:$0xff]  }
 0x2cb   : > { %v3064_v24 = vld [vmem:[%s3764_s7] ss:$12 sps:$4 sm:$0xff]  }
 0x2cc   : > { %v1808_v28 = vrot.slane %v1807_v26, 1  ;;  %v1818_v30 = vmax.f32 %v1816_v23, %v1817_v27  ;;  %v3066_v23 = vld [vmem:[%s3764_s7 + $0x4] ss:$12 sps:$4 sm:$0xff]  }
 0x2ce   : > { %v1809_v32 = vmax.f32 %v1807_v26, %v1808_v28  ;;  %v1819_v33 = vrot.slane %v1818_v30, 1 }
 0x2d0   : > { %v1822_v34 = vsel %vm1821_vm9, %v1790_v31, %v1809_v32  ;;  %v1820_v36 = vmax.f32 %v1818_v30, %v1819_v33 }
 0x2d1   : > { %1833 = vrot.lane.b32.xlu1 %v1822_v34, %s3079_s29  ;;  %1825 = vrot.lane.b32.xlu0 %v1822_v34, %s3080_s30  ;;  %s303_s30 = scalar_lea.vmem %s3765_s8, %s2809_s25 }
 0x2d2   : > { %v1823_v37 = vsel %vm1821_vm9, %v1798_v35, %v1820_v36  ;;  %v2694_v35 = vld [vmem:[%s3763_s6] ss:$0 sm:$0xff] }
 0x2d5   : > { %1837 = vrot.lane.b32.xlu1 %v1822_v34, %s3081_s9  ;;  %1829 = vrot.lane.b32.xlu0 %v1822_v34, %s3082_s10 }
 0x2d9   : > { %1854 = vrot.lane.b32.xlu1 %v1823_v37, %s3083_s11  ;;  %1850 = vrot.lane.b32.xlu0 %v1823_v37, %s3084_s12 }
 0x2dd   : > { %1845 = vrot.lane.b32.xlu1 %v1822_v34, %s3083_s11  ;;  %1841 = vrot.lane.b32.xlu0 %v1822_v34, %s3084_s12 }
 0x343   : > { %v1834_v38 = vpop.permute.xlu1 %1833  ;;  %v1826_v39 = vpop.permute.xlu0 %1825 }
 0x344   : > { %v1828_v41 = vmax.f32 %v1822_v34, %v1826_v39 }
 0x347   : > { %v1830_v42 = vpop.permute.xlu0 %1829  ;;  %v1838_v44 = vpop.permute.xlu1 %1837 }
 0x348   : > { %v1832_v43 = vmax.f32 %v1828_v41, %v1830_v42 }
 0x34a   : > { %v1836_v45 = vmax.f32 %v1832_v43, %v1834_v38  ;;  %v3085_v43 = vmov 1966171168  }
 0x34b   : > { %v1851_v47 = vpop.permute.xlu0 %1850  ;;  %v1855_v49 = vpop.permute.xlu1 %1854 }
 0x34c   : > { %v1840_v46 = vmax.f32 %v1836_v45, %v1838_v44  ;;  %v2328_v44 = vunpack.c.l.s4 %v3085_v43 }
 0x34e   : > { %v1853_v48 = vmax.f32 %v1840_v46, %v1851_v47  ;;  %v2329_v45 = vunpack.c.0.s8 %v2328_v44 }
 0x34f   : > { %v1842_v51 = vpop.permute.xlu0 %1841  ;;  %v1846_v53 = vpop.permute.xlu1 %1845 }
 0x350   : > { %v1857_v50 = vmax.f32 %v1853_v48, %v1855_v49  ;;  %v1844_v52 = vmax.f32 %v1840_v46, %v1842_v51  ;;  %v2332_v49 = vsub.s32 %v2329_v45, %v3666_v40 }
 0x352   : > { %1859 = vrot.lane.b32.xlu0 %v1857_v50, %s3082_s10  ;;  %v1848_v54 = vmax.f32 %v1844_v52, %v1846_v53 }
 0x3c4   : > { %v1860_v55 = vpop.permute.xlu0 %1859 }
 0x3c5   : > { %v1863_v56 = vsel %vm1862_vm10, %v1848_v54, %v1860_v55 }
 0x3c6   : > { %v1864_v57 = vpack.c.bf16 %v1863_v56, %v1863_v56 }
 0x3c8   : > { %v1871_v58 = vsel %vm1821_vm9, %v1864_v57, 0 }
 0x3c9   : > { %2759 = vmatpush3.bf16.msra.mxu1 %v1871_v58  ;;  %2787 = vmatpush3.bf16.msra.mxu0 %v1871_v58 }
 0x3ca   : > { %2764 = vmatprep.subr.bf16.mxu1 %v3076_v0  ;;  %2251 = vmatprep.subr.bf16.mxu0 %v3062_v21 }
 0x3cc   : > { %2761 = vmatmul.mubr.msk.bf16.vlgmr.msra.gmra.mxu1 %vm1866_vm11, %v1865_v59  ;;  %2789 = vmatmul.mubr.msk.bf16.vlgmr.msra.gmra.mxu0 %vm1866_vm11, %v2685_v60 }
 0x3cd   : > { %2765 = vmatpush3.bf16.msra.mxu1 %v1871_v58  ;;  %2766 = vmatprep.mubr.msk.bf16.mxu1 %vm3078_vm0, %v3076_v0 }
 0x3ce   : > { %2770 = vmatprep.subr.bf16.mxu1 %v3076_v0  ;;  %2271 = vmatprep.mubr.bf16.mxu0 %v3077_v1 }
 0x3cf   : > { %2252 = vmatpush1.bf16.msra.mxu0 %v3060_v9 }
 0x3d0   : > { %2253 = vmatprep.subr.bf16.mxu0 %v3066_v23 }
 0x3d3   : > { %2254 = vmatpush1.bf16.msra.mxu0 %v3064_v24 }
 0x3d4   : > { %2767 = vmatmul.mubr.msk.bf16.vlgmr.msra.gmra.mxu1 %vm1866_vm11, %v2673_v61 }
 0x3d5   : > { %2774 = vmatprep.mubr.msk.bf16.mxu1 %vm3078_vm0, %v3076_v0  ;;  %2771 = vmatpush3.bf16.msra.mxu1 %v3054_v62 }
 0x3d6   : > { %2772 = vmatprep.subr.bf16.mxu1 %v3076_v0 }
 0x3d9   : > { %2773 = vmatpush3.bf16.msra.mxu1 %v3055_v3 }
 0x3da   : > { %2778 = vmatprep.subr.bf16.mxu1 %v3076_v0 }
 0x48c   : > { %v1907_v1 = vpop.f32.mrf.mxu1  ;;  %v2119_v5 = vpop.f32.mrf.mxu0 }
 0x48d   : > { %v1913_v12 = vpack.c.bf16 %v1907_v1, %v1907_v1  ;;  %v2125_v13 = vpack.c.bf16 %v2119_v5, %v2119_v5 }
 0x48e   : > { %v2762_v63 = vpop.f32.mrf.mxu1  ;;  %v2790_v4 = vpop.f32.mrf.mxu0 }
 0x490   : > { %v1910_v11 = vpop.f32.mrf.mxu1  ;;  %v2122_v8 = vpop.f32.mrf.mxu0 }
 0x492   : > { %v2763_v6 = vpop.f32.mrf.mxu1  ;;  %v2791_v14 = vpop.f32.mrf.mxu0 }
 0x494   : > { %v1957_v10 = vpop.f32.mrf.mxu1 }
 0x495   : > { %v1963_v16 = vpack.c.bf16 %v1957_v10, %v1957_v10 }
 0x496   : > { %v2768_v17 = vpop.f32.mrf.mxu1 }
 0x497   : > { %2775 = vmatmul.mubr.msk.bf16.vlgmr.msra.gmra.mxu1 %vm1981_vm12, %v1963_v16 }
 0x498   : > { %v1960_v18 = vpop.f32.mrf.mxu1  ;;  %2779 = vmatpush3.bf16.msra.mxu1 %v3056_v15  ;;  %2782 = vmatprep.mubr.msk.bf16.mxu1 %vm3078_vm0, %v3076_v0 }
 0x499   : > { %2780 = vmatprep.subr.bf16.mxu1 %v3076_v0 }
 0x49a   : > { %v2769_v20 = vpop.f32.mrf.mxu1 }
 0x49c   : > { %2781 = vmatpush3.bf16.msra.mxu1 %v3057_v19 }
 0x49d   : > { %2792 = vmatprep.subr.bf16.mxu1 %v3076_v0 }
 0x49f   : > { %2783 = vmatmul.mubr.msk.bf16.vlgmr.msra.gmra.mxu1 %vm1981_vm12, %v1913_v12 }
 0x4a0   : > { %2793 = vmatpush3.bf16.msra.mxu1 %v3058_v2  ;;  %2796 = vmatprep.mubr.msk.bf16.mxu1 %vm3078_vm0, %v3076_v0 }
 0x4a1   : > { %2794 = vmatprep.subr.bf16.mxu1 %v3076_v0 }
 0x4a4   : > { %2795 = vmatpush3.bf16.msra.mxu1 %v3059_v7 }
 0x4a5   : > { %2800 = vmatprep.subr.bf16.mxu1 %v3076_v0 }
 0x4a7   : > { %2797 = vmatmul.mubr.msk.bf16.vlgmr.msra.gmra.mxu1 %vm1981_vm12, %v2125_v13 }
 0x4a8   : > { %2804 = vmatprep.mubr.msk.bf16.mxu1 %vm3078_vm0, %v3076_v0  ;;  %2801 = vmatpush3.bf16.msra.mxu1 %v3063_v22 }
 0x4a9   : > { %2802 = vmatprep.subr.bf16.mxu1 %v3076_v0 }
 0x4ac   : > { %2803 = vmatpush3.bf16.msra.mxu1 %v3067_v25 }
 0x557   : > { %v2019_v26 = vpop.f32.mrf.mxu1 }
 0x559   : > { %v2776_v27 = vpop.f32.mrf.mxu1 }
 0x55b   : > { %v2022_v28 = vpop.f32.mrf.mxu1 }
 0x55d   : > { %v2777_v29 = vpop.f32.mrf.mxu1 }
 0x55f   : > { %v2074_v30 = vpop.f32.mrf.mxu1 }
 0x560   : > { %v2075_v0 = vadd.f32 %v2074_v30, %v2019_v26 }
 0x561   : > { %v2784_v31 = vpop.f32.mrf.mxu1 }
 0x563   : > { %v2077_v32 = vpop.f32.mrf.mxu1 }
 0x565   : > { %v2785_v33 = vpop.f32.mrf.mxu1 }
 0x567   : > { %v2180_v34 = vpop.f32.mrf.mxu1 }
 0x568   : > { %v2186_v36 = vadd.f32 %v2180_v34, %v2075_v0 }
 0x569   : > { %v2798_v37 = vpop.f32.mrf.mxu1 }
 0x56a   : > { %v2194_v38 = vadd.f32 %v2694_v35, %v2186_v36 }
 0x56b   : > { %v2183_v39 = vpop.f32.mrf.mxu1 }
 0x56c   : > { %v2195_v41 = vpack.c.bf16 %v2194_v38, %v2194_v38 }
 0x56d   : > { %v2799_v42 = vpop.f32.mrf.mxu1 }
 0x56e   : > { %2701 = vmatmul.mubr.msk.bf16.vlgmr.msra.gmra.mxu0 %vm1981_vm12, %v2195_v41  ;;  %2805 = vmatmul.mubr.msk.bf16.vlgmr.msra.gmra.mxu1 %vm1981_vm12, %v2195_v41 }
 0x62e   : > { %v2273_v46 = vpop.f32.mrf.mxu0  ;;  %v2314_v47 = vpop.f32.mrf.mxu1 }
 0x62f   : > { %v2322_v48 = vpack.c.bf16 %v2314_v47, %v2314_v47 }
 0x630   : > { %v2275_v50 = vpop.f32.mrf.mxu0  ;;  %v2806_v51 = vpop.f32.mrf.mxu1 }
 0x631   : > { %v2703_v52 = vpack.c.bf16 %v2275_v50, %v2273_v46  ;;  %v2340_v55 = vrot.slane %v2322_v48, %v2332_v49 }
 0x632   : > { %v2277_v53 = vpop.f32.mrf.mxu0  ;;  %v2317_v54 = vpop.f32.mrf.mxu1 }
 0x633   : > { %v2333_v56 = vrot.slane %v2703_v52, %v2332_v49 }
 0x634   : > { %v2278_v57 = vpop.f32.mrf.mxu0  ;;  %v2807_v58 = vpop.f32.mrf.mxu1 }
 0x635   : > { %v2341_v59 = vcombine.low %v2333_v56, %v2340_v55 }
 0x637   : > { %2704 = vst.sshfl [vmem:[%s303_s30] sm:$0x15 pattern:$0x73625140] %v2341_v59 }
 0x638 PF: > { %s18_s27 = sadd.s32 1, %s3074_s27  }
 0x639   : > { %p15_p4 = scmp.ge.s32.totalorder %s18_s27, 4  }
 0x63b   :  { %17 = sbr.rel (!%p15_p4) target bundleno = 1 (0x1), region = 90 }

// kernel: tile.48
= control target key start
LH: loop header
LB: loop body
LE: loop exit
PB: predicated region body
PF: predicated region fallthrough
CT: control target
= control target key end

     0   :  { %s34_s0 = inlined_call_operand.vmem [shape: f32[32], index: 0, kind: input, shape index: {}]   ;;  %s35_s1 = inlined_call_operand.vmem [shape: f32[24,32], index: 1, kind: output, shape index: {}]  }
   0x1   :  { %v4_v0 = vld [vmem:[%s34_s0] ss:$0 sm:$0xff] }
   0x2   :  { %5 = vst [vmem:[%s35_s1] sm:$0xff] %v4_v0  ;;  %10 = vst [vmem:[%s35_s1 + $0x8] sm:$0xff] %v4_v0 }
   0x3   :  { %11 = vst [vmem:[%s35_s1 + $0x10] sm:$0xff] %v4_v0 }

// kernel: tile.49
= control target key start
LH: loop header
LB: loop body
LE: loop exit
PB: predicated region body
PF: predicated region fallthrough
CT: control target
= control target key end

     0   :  { %s84_s8 = smov 96   ;;  %vm3_vm0 = vcmask 261120   ;;  %s86_s15 = smov 64   ;;  %vm10_vm1 = vcmask 1048320   ;;  %vm17_vm2 = vcmask 785920   ;;  %vm24_vm3 = vcmask 523520   ;;  %s127_s0 = inlined_call_operand.vmem [shape: f32[24,32], index: 0, kind: input, shape index: {}]   ;;  %s128_s1 = inlined_call_operand.vmem [shape: f32[1,768], index: 1, kind: output, shape index: {}]  }
   0x1   :  { %v73_v0 = vld [vmem:[%s127_s0 + $0x3] ss:$4 sm:$0x3f]   ;;  %v74_v1 = vld [vmem:[%s127_s0 + $0x2] ss:$4 sm:$0x3f]  }
   0x2   :  { %8 = vrot.lane.b32.xlu0 %v73_v0, %s84_s8  ;;  %v75_v2 = vld [vmem:[%s127_s0 + $0x1] ss:$4 sm:$0x3f]   ;;  %v2_v3 = vld [vmem:[%s127_s0] ss:$4 sm:$0x3f]  }
   0x3   :  { %s85_s0 = smov 32   ;;  %4 = vst.msk [vmem:[#allocation0] ss:$8 sm:$0xf] %vm3_vm0, %v2_v3  }
   0x4   :  { %22 = vrot.lane.b32.xlu1 %v75_v2, %s85_s0  ;;  %5 = vst.msk [vmem:[#allocation0] ss:$8 sm:$0x30] %vm3_vm0, %v2_v3  }
   0x6   :  { %15 = vrot.lane.b32.xlu0 %v74_v1, %s86_s15 }
  0x74   :  { %v9_v4 = vpop.permute.xlu0 %8  }
  0x75   :  { %11 = vst.msk [vmem:[#allocation0] ss:$8 sm:$0xf] %vm10_vm1, %v9_v4   ;;  %12 = vst.msk [vmem:[#allocation0] ss:$8 sm:$0x30] %vm10_vm1, %v9_v4  }
  0x76   :  { %v23_v5 = vpop.permute.xlu1 %22  }
  0x78   :  { %v16_v6 = vpop.permute.xlu0 %15  }
  0x79   :  { %18 = vst.msk [vmem:[#allocation0] ss:$8 sm:$0xf] %vm17_vm2, %v16_v6   ;;  %19 = vst.msk [vmem:[#allocation0] ss:$8 sm:$0x30] %vm17_vm2, %v16_v6  }
  0x7a   :  { %25 = vst.msk [vmem:[#allocation0] ss:$8 sm:$0xf] %vm24_vm3, %v23_v5   ;;  %26 = vst.msk [vmem:[#allocation0] ss:$8 sm:$0x30] %vm24_vm3, %v23_v5  }
  0x81   :  { %v31_v7 = vld [vmem:[#allocation0] sm:$0x1]  ;;  %v36_v8 = vld [vmem:[#allocation0 + $0x8] sm:$0x1]  ;;  %v42_v9 = vld [vmem:[#allocation0 + $0x10] sm:$0x1] }
  0x82   :  { %34 = vst [vmem:[%s128_s1] sm:$0x1] %v31_v7  ;;  %76 = vst [vmem:[%s128_s1 + $0x1] sm:$0x1] %v36_v8  ;;  %v49_v10 = vld [vmem:[#allocation0 + $0x18] sm:$0x1] }
  0x83   :  { %77 = vst [vmem:[%s128_s1 + $0x2] sm:$0x1] %v42_v9  ;;  %v56_v11 = vld [vmem:[#allocation0 + $0x20] sm:$0x1]  ;;  %v63_v12 = vld [vmem:[#allocation0 + $0x28] sm:$0x1] }
  0x84   :  { %78 = vst [vmem:[%s128_s1 + $0x3] sm:$0x1] %v49_v10  ;;  %79 = vst [vmem:[%s128_s1 + $0x4] sm:$0x1] %v56_v11 }
  0x85   :  { %80 = vst [vmem:[%s128_s1 + $0x5] sm:$0x1] %v63_v12 }

// kernel: esa_forward.5
= control target key start
LH: loop header
LB: loop body
LE: loop exit
PB: predicated region body
PF: predicated region fallthrough
CT: control target
= control target key end

     0   :  { %s2627_s21 = smov 0   ;;  %s2629_s22 = smov 0   ;;  %s3231_s0 = inlined_call_operand.vmem [shape: bf16[24,2], index: 0, kind: input, shape index: {}]   ;;  %s3232_s1 = inlined_call_operand.vmem [shape: bf16[2,2,384], index: 1, kind: input, shape index: {}]   ;;  %s3233_s2 = inlined_call_operand.vmem [shape: bf16[2,24,384], index: 2, kind: input, shape index: {}]   ;;  %s3234_s3 = inlined_call_operand.vmem [shape: f32[2,24,768], index: 3, kind: input, shape index: {}]   ;;  %s3235_s4 = inlined_call_operand.vmem [shape: bf16[384,768], index: 4, kind: input, shape index: {}]   ;;  %s3236_s5 = inlined_call_operand.vmem [shape: f32[1,768], index: 5, kind: input, shape index: {}]   ;;  %s3237_s6 = inlined_call_operand.vmem [shape: f32[2,24,768], index: 6, kind: output, shape index: {}]  }
   0x1   :  { %s2631_s23 = smov 0  }
   0x2 LB: > { %s28_s24 = sadd.s32 1, %s2584_s22  ;;  %p2061_p0 = scmp.ge.s32.totalorder %s2588_s23, 1  ;;  %s2588_s23 = sphi %s2631_s23, %s16_s23   ;;  %s2584_s22 = sphi %s2629_s22, %s3239_s22   ;;  %s2580_s21 = sphi %s2627_s21, %s3238_s21  }
   0x3   : > { %p30_p1 = scmp.ge.s32.totalorder %s28_s24, 2  ;;  %p272_p2 = scmp.lt.s32.totalorder %s2588_s23, 3 }
   0x5   : > { %s3241_s24 = smov (%p30_p1, %s28_s24), 0  ;;  %p273_p3 = pnand %p2061_p0, %p272_p2 }
   0x6   : > { %p337_p4 = scmp.lt.s32.totalorder (!%p273_p3), %s2580_s21, 1 }
   0x7   : > { %276 = sbr.rel (%p273_p3) target bundleno = 580 (0x244), region = 44 }
   0xc   : > { %v414_v0 = vlaneseq  ;;  %v2590_v1 = vmov 1966171168   ;;  %v2591_v3 = vmov 0   ;;  %s3243_s21 = smov (!%p337_p4, %s2580_s21), 1  ;;  %v2278_v6 = vld [vmem:[%s3235_s4 + $0x154] ss:$24 sps:$4 sm:$0xff]  }
   0xd   : > { %v412_v2 = vunpack.c.l.s4 %v2590_v1  ;;  %475 = vmatprep.mubr.bf16.mxu1 %v2591_v3  ;;  %v2280_v7 = vld [vmem:[%s3235_s4 + $0x150] ss:$24 sps:$4 sm:$0xff]   ;;  %s2247_s29 = smul.u32 3, %s3243_s21  ;;  %v2281_v8 = vld [vmem:[%s3235_s4 + $0x124] ss:$24 sps:$4 sm:$0xff]   ;;  %1444 = vmatprep.subr.bf16.mxu0 %v2278_v6  ;;  %vm433_vm0 = vcmask 1040384  }
   0xe   : > { %v2648_v4 = vshrl.u32 %v414_v0, 7  ;;  %1445 = vmatpush1.bf16.msra.mxu0 %v2280_v7  ;;  %v2283_v10 = vld [vmem:[%s3235_s4 + $0x120] ss:$24 sps:$4 sm:$0xff]   ;;  %v2284_v11 = vld [vmem:[%s3235_s4 + $0xf4] ss:$24 sps:$4 sm:$0xff]   ;;  %vm426_vm1 = vcmask 15360  }
   0xf   : > { %v413_v5 = vunpack.c.0.s8 %v412_v2  ;;  %s340_s10 = scalar_lea.vmem %s3232_s1, %s2247_s29  ;;  %1446 = vmatprep.subr.bf16.mxu0 %v2281_v8  ;;  %v2286_v18 = vld [vmem:[%s3235_s4 + $0xf0] ss:$24 sps:$4 sm:$0xff]   ;;  %v2287_v19 = vld [vmem:[%s3235_s4 + $0xc4] ss:$24 sps:$4 sm:$0xff]   ;;  %v2289_v22 = vld [vmem:[%s3235_s4 + $0xc0] ss:$24 sps:$4 sm:$0xff]  }
  0x10   : > { %v2067_v12 = vld.sshfl [vmem:[%s340_s10] sm:$0x13 pattern:$0x75316420]  ;;  %v2290_v23 = vld [vmem:[%s3235_s4 + $0x94] ss:$24 sps:$4 sm:$0xff]  }
  0x11   : > { %v416_v9 = vsub.s32 %v413_v5, %v2648_v4  ;;  %v410_v13 = vcombine.high %v2067_v12, %v2067_v12  ;;  %v2276_v20 = vld [vmem:[%s3231_s0] sm:$0xff]   ;;  %v2277_v24 = vld [vmem:[%s3231_s0 + $0x8] ss:$0 sps:$4 sm:$0xff]   ;;  %v2316_v27 = vld [vmem:[%s3235_s4 + $0x454] ss:$24 sps:$4 sm:$0xff]   ;;  %s2248_s9 = smul.u32 36, %s3243_s21 }
  0x12   : > { %1447 = vmatpush1.bf16.msra.mxu0 %v2283_v10  ;;  %v2292_v25 = vld [vmem:[%s3235_s4 + $0x90] ss:$24 sps:$4 sm:$0xff]   ;;  %v2293_v26 = vld [vmem:[%s3235_s4 + $0x64] ss:$24 sps:$4 sm:$0xff]   ;;  %v2295_v28 = vld [vmem:[%s3235_s4 + $0x60] ss:$24 sps:$4 sm:$0xff]  }
  0x13   : > { %v417_v14 = vrot.slane %v2067_v12, %v416_v9  ;;  %v424_v15 = vrot.slane %v410_v13, %v416_v9  ;;  %1448 = vmatprep.subr.bf16.mxu0 %v2284_v11  ;;  %v2296_v29 = vld [vmem:[%s3235_s4 + $0x34] ss:$24 sps:$4 sm:$0xff]   ;;  %v2298_v30 = vld [vmem:[%s3235_s4 + $0x30] ss:$24 sps:$4 sm:$0xff]   ;;  %v2299_v31 = vld [vmem:[%s3235_s4 + $0x4] ss:$24 sps:$4 sm:$0xff]   ;;  %s2825_s12 = scalar_lea.vmem %s3233_s2, %s2248_s9 }
  0x14   : > { %v2314_v32 = vld [vmem:[%s3235_s4 + $0x450] ss:$24 sps:$4 sm:$0xff]   ;;  %v2301_v33 = vld [vmem:[%s3235_s4] ss:$24 sps:$4 sm:$0xff]   ;;  %v2322_v34 = vld [vmem:[%s3235_s4 + $0x424] ss:$24 sps:$4 sm:$0xff]  }
  0x15   : > { %v425_v16 = vcombine.high %v417_v14, %v417_v14  ;;  %v435_v17 = vsel %vm433_vm0, %v417_v14, 0  ;;  %2068 = vmatprep.subr.msk.bf16.mxu1 %vm433_vm0, %v424_v15  ;;  %v2302_v35 = vld [vmem:[%s3235_s4 + $0x2d4] ss:$24 sps:$4 sm:$0xff]   ;;  %v2320_v36 = vld [vmem:[%s3235_s4 + $0x420] ss:$24 sps:$4 sm:$0xff]   ;;  %s2249_s27 = smul.u32 144, %s3243_s21 }
  0x16   : > { %458 = vmatpush1.bf16.msra.mxu1 %v435_v17  ;;  %1449 = vmatpush1.bf16.msra.mxu0 %v2286_v18  ;;  %v2304_v37 = vld [vmem:[%s3235_s4 + $0x2d0] ss:$24 sps:$4 sm:$0xff]   ;;  %v2305_v38 = vld [vmem:[%s3235_s4 + $0x2a4] ss:$24 sps:$4 sm:$0xff]   ;;  %v2307_v39 = vld [vmem:[%s3235_s4 + $0x2a0] ss:$24 sps:$4 sm:$0xff]  }
  0x17   : > { %2246 = vmatprep.subr.msk.bf16.mxu1 %vm433_vm0, %v425_v16  ;;  %v441_v21 = vsel %vm433_vm0, %v425_v16, 0  ;;  %1450 = vmatprep.subr.bf16.mxu0 %v2287_v19  ;;  %v2308_v40 = vld [vmem:[%s3235_s4 + $0x274] ss:$24 sps:$4 sm:$0xff]   ;;  %v2310_v41 = vld [vmem:[%s3235_s4 + $0x270] ss:$24 sps:$4 sm:$0xff]   ;;  %v379_v6 = vld [vmem:[%s2825_s12] sm:$0xff]  ;;  %s3168_s30 = scalar_lea.vmem %s3234_s3, %s2249_s27  ;;  %s3174_s8 = scalar_lea.vmem %s3237_s6, %s2249_s27 }
  0x18   : > { %v2311_v42 = vld [vmem:[%s3235_s4 + $0x244] ss:$24 sps:$4 sm:$0xff]   ;;  %v2313_v43 = vld [vmem:[%s3235_s4 + $0x240] ss:$24 sps:$4 sm:$0xff]   ;;  %v2317_v44 = vld [vmem:[%s3235_s4 + $0x214] ss:$24 sps:$4 sm:$0xff]   ;;  %v386_v9 = vunpack.c.h.bf16 %v379_v6  ;;  %v385_v11 = vunpack.c.l.bf16 %v379_v6 }
  0x19   : > { %2069 = vmatmul.mubr.msk.bf16.vlgmr.msra.gmra.mxu1 %vm426_vm1, %v2276_v20  ;;  %v2319_v45 = vld [vmem:[%s3235_s4 + $0x210] ss:$24 sps:$4 sm:$0xff]   ;;  %v2323_v46 = vld [vmem:[%s3235_s4 + $0x1e4] ss:$24 sps:$4 sm:$0xff]   ;;  %v2325_v47 = vld [vmem:[%s3235_s4 + $0x1e0] ss:$24 sps:$4 sm:$0xff]  }
  0x1a   : > { %2241 = vmatpush3.bf16.msra.mxu1 %v441_v21  ;;  %485 = vmatprep.mubr.bf16.mxu1 %v2591_v3  ;;  %v2328_v48 = vld [vmem:[%s3235_s4 + $0x3f4] ss:$24 sps:$4 sm:$0xff]   ;;  %v2326_v49 = vld [vmem:[%s3235_s4 + $0x3f0] ss:$24 sps:$4 sm:$0xff]   ;;  %v2334_v52 = vld [vmem:[%s3235_s4 + $0x3c4] ss:$24 sps:$4 sm:$0xff]  }
  0x1b   : > { %1451 = vmatpush1.bf16.msra.mxu0 %v2289_v22  ;;  %1495 = vmatprep.subr.bf16.mxu1 %v2316_v27  ;;  %v2329_v50 = vld [vmem:[%s3235_s4 + $0x1b4] ss:$24 sps:$4 sm:$0xff]   ;;  %v2331_v51 = vld [vmem:[%s3235_s4 + $0x1b0] ss:$24 sps:$4 sm:$0xff]   ;;  %v2332_v53 = vld [vmem:[%s3235_s4 + $0x3c0] ss:$24 sps:$4 sm:$0xff]  }
  0x1c   : > { %1452 = vmatprep.subr.bf16.mxu0 %v2290_v23  ;;  %v2335_v54 = vld [vmem:[%s3235_s4 + $0x184] ss:$24 sps:$4 sm:$0xff]   ;;  %v2337_v55 = vld [vmem:[%s3235_s4 + $0x180] ss:$24 sps:$4 sm:$0xff]   ;;  %v2340_v56 = vld [vmem:[%s3235_s4 + $0x394] ss:$24 sps:$4 sm:$0xff]  }
  0x1d   : > { %v2338_v57 = vld [vmem:[%s3235_s4 + $0x390] ss:$24 sps:$4 sm:$0xff]   ;;  %v2343_v58 = vld [vmem:[%s3235_s4 + $0x45c] ss:$24 sps:$4 sm:$0xff]   ;;  %v2344_v60 = vld [vmem:[%s3235_s4 + $0x360] ss:$24 sps:$4 sm:$0xff]  }
  0x1e   : > { %v2346_v59 = vld [vmem:[%s3235_s4 + $0x364] ss:$24 sps:$4 sm:$0xff]   ;;  %v2352_v61 = vld [vmem:[%s3235_s4 + $0x334] ss:$24 sps:$4 sm:$0xff]   ;;  %v2350_v62 = vld [vmem:[%s3235_s4 + $0x330] ss:$24 sps:$4 sm:$0xff]  }
  0x1f   : > { %1453 = vmatpush1.bf16.msra.mxu0 %v2292_v25  ;;  %v2358_v63 = vld [vmem:[%s3235_s4 + $0x304] ss:$24 sps:$4 sm:$0xff]   ;;  %v2356_v0 = vld [vmem:[%s3235_s4 + $0x300] ss:$24 sps:$4 sm:$0xff]   ;;  %v381_v2 = vld [vmem:[%s2825_s12 + $0xc] sm:$0xff] }
  0x20   : > { %1454 = vmatprep.subr.bf16.mxu0 %v2293_v26  ;;  %v2364_v1 = vld [vmem:[%s3235_s4 + $0x15c] ss:$24 sps:$4 sm:$0xff]   ;;  %v388_v8 = vunpack.c.l.bf16 %v381_v2  ;;  %v389_v10 = vunpack.c.h.bf16 %v381_v2  ;;  %v2341_v22 = vld [vmem:[%s3235_s4 + $0x458] ss:$24 sps:$4 sm:$0xff]   ;;  %v2349_v26 = vld [vmem:[%s3235_s4 + $0x42c] ss:$24 sps:$4 sm:$0xff]  }
  0x21   : > { %2070 = vmatmul.mubr.msk.bf16.gmra.mxu1 %vm426_vm1, %v2277_v24  ;;  %v383_v15 = vld [vmem:[%s2825_s12 + $0x18] sm:$0xff]  ;;  %v2383_v2 = vld [vmem:[%s3235_s4 + $0x308] ss:$24 sps:$4 sm:$0xff]  }
  0x22   : > { %2242 = vmatprep.mubr.msk.bf16.mxu1 %vm426_vm1, %v2276_v20  ;;  %v392_v18 = vunpack.c.h.bf16 %v383_v15  ;;  %v2391_v6 = vld [vmem:[%s3235_s4 + $0x164] ss:$24 sps:$4 sm:$0xff]  }
  0x23   : > { %1455 = vmatpush1.bf16.msra.mxu0 %v2295_v28 }
  0x24   : > { %1456 = vmatprep.subr.bf16.mxu0 %v2296_v29 }
  0x27   : > { %1457 = vmatpush1.bf16.msra.mxu0 %v2298_v30  ;;  %v2347_v30 = vld [vmem:[%s3235_s4 + $0x428] ss:$24 sps:$4 sm:$0xff]  }
  0x28   : > { %1458 = vmatprep.subr.bf16.mxu0 %v2299_v31 }
  0x29   : > { %2243 = vmatmul.mubr.msk.bf16.vlgmr.msra.gmra.mxu1 %vm426_vm1, %v2277_v24  ;;  %v391_v24 = vunpack.c.l.bf16 %v383_v15  ;;  %v2398_v15 = vld [vmem:[%s3235_s4 + $0x38] ss:$24 sps:$4 sm:$0xff]  }
  0x2a   : > { %1496 = vmatpush1.bf16.msra.mxu1 %v2314_v32  ;;  %1527 = vmatprep.mubr.bf16.mxu1 %v2591_v3 }
  0x2b   : > { %1459 = vmatpush1.bf16.msra.mxu0 %v2301_v33  ;;  %1497 = vmatprep.subr.bf16.mxu1 %v2322_v34  ;;  %v2355_v33 = vld [vmem:[%s3235_s4 + $0x3fc] ss:$24 sps:$4 sm:$0xff]  }
  0x2c   : > { %1460 = vmatprep.subr.bf16.mxu0 %v2302_v35  ;;  %v382_v35 = vld [vmem:[%s2825_s12 + $0x14] sm:$0xf] }
  0x2e   : > { %1498 = vmatpush1.bf16.msra.mxu1 %v2320_v36  ;;  %v2353_v36 = vld [vmem:[%s3235_s4 + $0x3f8] ss:$24 sps:$4 sm:$0xff]  }
  0x2f   : > { %1461 = vmatpush2.bf16.msra.mxu0 %v2304_v37  ;;  %1499 = vmatprep.subr.bf16.mxu1 %v2328_v48 }
  0x30   : > { %1462 = vmatprep.subr.bf16.mxu0 %v2305_v38  ;;  %v384_v38 = vld [vmem:[%s2825_s12 + $0x8] ss:$24 sps:$4 sm:$0xff]  }
  0x32   : > { %1500 = vmatpush1.bf16.msra.mxu1 %v2326_v49  ;;  %v2362_v49 = vld [vmem:[%s3235_s4 + $0x158] ss:$24 sps:$4 sm:$0xff]  }
  0x33   : > { %1463 = vmatpush2.bf16.msra.mxu0 %v2307_v39  ;;  %1501 = vmatprep.subr.bf16.mxu1 %v2334_v52  ;;  %v2365_v52 = vld [vmem:[%s3235_s4 + $0x398] ss:$24 sps:$4 sm:$0xff]  }
  0x34   : > { %1464 = vmatprep.subr.bf16.mxu0 %v2308_v40  ;;  %v2361_v40 = vld [vmem:[%s3235_s4 + $0x3cc] ss:$24 sps:$4 sm:$0xff]  }
  0x36   : > { %1502 = vmatpush1.bf16.msra.mxu1 %v2332_v53  ;;  %v2370_v53 = vld [vmem:[%s3235_s4 + $0x12c] ss:$24 sps:$4 sm:$0xff]  }
  0x37   : > { %1465 = vmatpush2.bf16.msra.mxu0 %v2310_v41  ;;  %1503 = vmatprep.subr.bf16.mxu1 %v2340_v56  ;;  %v387_v41 = vunpack.c.l.bf16 %v384_v38 }
  0x38   : > { %1466 = vmatprep.subr.bf16.mxu0 %v2311_v42  ;;  %v390_v42 = vunpack.c.l.bf16 %v382_v35  ;;  %v2430_v35 = vld [vmem:[%s3235_s4 + $0x24c] ss:$24 sps:$4 sm:$0xff]  }
  0x3a   : > { %1504 = vmatpush1.bf16.msra.mxu1 %v2338_v57  ;;  %v2371_v57 = vld [vmem:[%s3235_s4 + $0x368] ss:$24 sps:$4 sm:$0xff]  }
  0x3b   : > { %1467 = vmatpush2.bf16.msra.mxu0 %v2313_v43  ;;  %1505 = vmatprep.subr.bf16.mxu1 %v2346_v59  ;;  %v2379_v59 = vld [vmem:[%s3235_s4 + $0x33c] ss:$24 sps:$4 sm:$0xff]  }
  0x3c   : > { %1468 = vmatprep.subr.bf16.mxu0 %v2317_v44  ;;  %v2359_v44 = vld [vmem:[%s3235_s4 + $0x3c8] ss:$24 sps:$4 sm:$0xff]  }
  0x3e   : > { %1506 = vmatpush1.bf16.msra.mxu1 %v2344_v60  ;;  %v2374_v60 = vld [vmem:[%s3235_s4 + $0xf8] ss:$24 sps:$4 sm:$0xff]  }
  0x3f   : > { %1469 = vmatpush2.bf16.msra.mxu0 %v2319_v45  ;;  %1507 = vmatprep.subr.bf16.mxu1 %v2352_v61 }
  0x40   : > { %1470 = vmatprep.subr.bf16.mxu0 %v2323_v46  ;;  %v2367_v46 = vld [vmem:[%s3235_s4 + $0x39c] ss:$24 sps:$4 sm:$0xff]  }
  0x42   : > { %1508 = vmatpush1.bf16.msra.mxu1 %v2350_v62  ;;  %v2377_v62 = vld [vmem:[%s3235_s4 + $0x338] ss:$24 sps:$4 sm:$0xff]  }
  0x43   : > { %1471 = vmatpush2.bf16.msra.mxu0 %v2325_v47  ;;  %1509 = vmatprep.subr.bf16.mxu1 %v2358_v63  ;;  %v2382_v63 = vld [vmem:[%s3235_s4 + $0xcc] ss:$24 sps:$4 sm:$0xff]  }
  0x44   : > { %1472 = vmatprep.subr.bf16.mxu0 %v2329_v50  ;;  %v393_v50 = vunpack.c.h.bf16 %v384_v38  ;;  %v2428_v38 = vld [vmem:[%s3235_s4 + $0x248] ss:$24 sps:$4 sm:$0xff]  }
  0x46   : > { %1510 = vmatpush1.bf16.msra.mxu1 %v2356_v0  ;;  %v2385_v0 = vld [vmem:[%s3235_s4 + $0x30c] ss:$24 sps:$4 sm:$0xff]  }
  0x47   : > { %1473 = vmatpush2.bf16.msra.mxu0 %v2331_v51  ;;  %1546 = vmatprep.subr.bf16.mxu1 %v2364_v1  ;;  %v2380_v1 = vld [vmem:[%s3235_s4 + $0xc8] ss:$24 sps:$4 sm:$0xff]  }
  0x48   : > { %1474 = vmatprep.subr.bf16.mxu0 %v2335_v54  ;;  %v2373_v54 = vld [vmem:[%s3235_s4 + $0x36c] ss:$24 sps:$4 sm:$0xff]  }
  0x4b   : > { %1475 = vmatpush2.bf16.msra.mxu0 %v2337_v55  ;;  %v2368_v55 = vld [vmem:[%s3235_s4 + $0x128] ss:$24 sps:$4 sm:$0xff]  }
  0x4c   : > { %1597 = vmatprep.subr.bf16.mxu0 %v2343_v58  ;;  %v2376_v58 = vld [vmem:[%s3235_s4 + $0xfc] ss:$24 sps:$4 sm:$0xff]  }
  0xd9   : > { %v477_v5 = vpop.f32.mrf.mxu1 }
  0xda   : > { %v478_v19 = vadd.f32 %v477_v5, %v385_v11  ;;  %v2388_v5 = vld [vmem:[%s3235_s4 + $0x9c] ss:$24 sps:$4 sm:$0xff]   ;;  %v2392_v11 = vld [vmem:[%s3235_s4 + $0x68] ss:$24 sps:$4 sm:$0xff]  }
  0xdb   : > { %v479_v7 = vpop.f32.mrf.mxu1 }
  0xdc   : > { %v480_v16 = vadd.f32 %v479_v7, %v386_v9  ;;  %v2386_v7 = vld [vmem:[%s3235_s4 + $0x98] ss:$24 sps:$4 sm:$0xff]   ;;  %v2394_v9 = vld [vmem:[%s3235_s4 + $0x6c] ss:$24 sps:$4 sm:$0xff]  }
  0xdd   : > { %v481_v12 = vpop.f32.mrf.mxu1 }
  0xde   : > { %v482_v13 = vadd.f32 %v481_v12, %v388_v8  ;;  %v2389_v8 = vld [vmem:[%s3235_s4 + $0x160] ss:$24 sps:$4 sm:$0xff]   ;;  %v2395_v12 = vld [vmem:[%s3235_s4 + $0x130] ss:$24 sps:$4 sm:$0xff]  }
  0xdf   : > { %v483_v14 = vpop.f32.mrf.mxu1 }
  0xe0   : > { %v484_v17 = vadd.f32 %v483_v14, %v389_v10  ;;  %v2835_v23 = vpack.c.bf16 %v482_v13, %v478_v19  ;;  %v2397_v10 = vld [vmem:[%s3235_s4 + $0x134] ss:$24 sps:$4 sm:$0xff]   ;;  %v2403_v14 = vld [vmem:[%s3235_s4 + $0x104] ss:$24 sps:$4 sm:$0xff]   ;;  %v2404_v19 = vld [vmem:[%s3235_s4 + $0x8] ss:$24 sps:$4 sm:$0xff]  }
  0xe1   : > { %v487_v20 = vpop.f32.mrf.mxu1  ;;  %v2400_v13 = vld [vmem:[%s3235_s4 + $0x3c] ss:$24 sps:$4 sm:$0xff]  }
  0xe2   : > { %v2830_v21 = vpack.c.bf16 %v484_v17, %v480_v16  ;;  %v488_v31 = vadd.f32 %v487_v20, %v391_v24  ;;  %v2401_v16 = vld [vmem:[%s3235_s4 + $0x100] ss:$24 sps:$4 sm:$0xff]   ;;  %v2406_v17 = vld [vmem:[%s3235_s4 + $0xc] ss:$24 sps:$4 sm:$0xff]   ;;  %v2407_v20 = vld [vmem:[%s3235_s4 + $0xd0] ss:$24 sps:$4 sm:$0xff]  }
  0xe3   : > { %v489_v25 = vpop.f32.mrf.mxu1  ;;  %v2415_v24 = vld [vmem:[%s3235_s4 + $0xa4] ss:$24 sps:$4 sm:$0xff]  }
  0xe4   : > { %v490_v27 = vadd.f32 %v489_v25, %v392_v18  ;;  %1476 = vmatprep.mubr.bf16.mxu0 %v2830_v21  ;;  %v2855_v37 = vpack.c.bf16 %v488_v31, %v488_v31  ;;  %v2409_v18 = vld [vmem:[%s3235_s4 + $0xd4] ss:$24 sps:$4 sm:$0xff]   ;;  %v2410_v25 = vld [vmem:[%s3235_s4 + $0x2d8] ss:$24 sps:$4 sm:$0xff]  }
  0xe5   : > { %v491_v28 = vpop.f32.mrf.mxu1  ;;  %1477 = vmatmul.mubr.bf16.vlgmr.msra.gmra.mxu0 %v2835_v23  ;;  %v2424_v31 = vld [vmem:[%s3235_s4 + $0x27c] ss:$24 sps:$4 sm:$0xff]  }
  0xe6   : > { %v2842_v29 = vpack.c.bf16 %v490_v27, %v490_v27  ;;  %1598 = vmatpush1.bf16.msra.mxu0 %v2341_v22  ;;  %v2412_v22 = vld [vmem:[%s3235_s4 + $0x2dc] ss:$24 sps:$4 sm:$0xff]   ;;  %v2416_v28 = vld [vmem:[%s3235_s4 + $0x2a8] ss:$24 sps:$4 sm:$0xff]  }
  0xe7   : > { %v492_v32 = vpop.f32.mrf.mxu1  ;;  %1599 = vmatprep.subr.bf16.mxu0 %v2349_v26  ;;  %v2418_v26 = vld [vmem:[%s3235_s4 + $0x2ac] ss:$24 sps:$4 sm:$0xff]  }
  0xe8   : > { %1486 = vmatprep.mubr.bf16.mxu0 %v2842_v29  ;;  %v2421_v27 = vld [vmem:[%s3235_s4 + $0x74] ss:$24 sps:$4 sm:$0xff]   ;;  %v2427_v32 = vld [vmem:[%s3235_s4 + $0x44] ss:$24 sps:$4 sm:$0xff]  }
  0xe9   : > { %v2244_v34 = vpop.f32.mrf.mxu1 }
  0xea   : > { %1600 = vmatpush1.bf16.msra.mxu0 %v2347_v30  ;;  %v537_v56 = vadd.f32 %v2244_v34, %v393_v50  ;;  %v2419_v30 = vld [vmem:[%s3235_s4 + $0x70] ss:$24 sps:$4 sm:$0xff]   ;;  %v2425_v34 = vld [vmem:[%s3235_s4 + $0x40] ss:$24 sps:$4 sm:$0xff]  }
  0xeb   : > { %v528_v39 = vpop.f32.mrf.mxu1  ;;  %1601 = vmatprep.subr.bf16.mxu0 %v2355_v33  ;;  %v2422_v33 = vld [vmem:[%s3235_s4 + $0x278] ss:$24 sps:$4 sm:$0xff]  }
  0xec   : > { %v529_v47 = vadd.f32 %v528_v39, %v387_v41  ;;  %v2900_v61 = vpack.c.bf16 %v537_v56, %v537_v56  ;;  %v2431_v39 = vld [vmem:[%s3235_s4 + $0x10] ss:$24 sps:$4 sm:$0xff]   ;;  %v2439_v41 = vld [vmem:[%s3235_s4 + $0x2e4] ss:$24 sps:$4 sm:$0xff]  }
  0xed   : > { %v2245_v43 = vpop.f32.mrf.mxu1  ;;  %1487 = vmatmul.mubr.bf16.gmra.mxu0 %v2855_v37  ;;  %v2446_v50 = vld [vmem:[%s3235_s4 + $0x1b8] ss:$24 sps:$4 sm:$0xff]  }
  0xee   : > { %1602 = vmatpush1.bf16.msra.mxu0 %v2353_v36  ;;  %1629 = vmatprep.mubr.bf16.mxu0 %v2591_v3  ;;  %v2433_v36 = vld [vmem:[%s3235_s4 + $0x14] ss:$24 sps:$4 sm:$0xff]   ;;  %v2437_v43 = vld [vmem:[%s3235_s4 + $0x2e0] ss:$24 sps:$4 sm:$0xff]   ;;  %v2455_v56 = vld [vmem:[%s3235_s4 + $0x250] ss:$24 sps:$4 sm:$0xff]  }
  0xef   : > { %v531_v45 = vpop.f32.mrf.mxu1  ;;  %1603 = vmatprep.subr.bf16.mxu0 %v2361_v40  ;;  %v2436_v40 = vld [vmem:[%s3235_s4 + $0x21c] ss:$24 sps:$4 sm:$0xff]  }
  0xf0   : > { %v532_v48 = vadd.f32 %v531_v45, %v390_v42  ;;  %v2434_v42 = vld [vmem:[%s3235_s4 + $0x218] ss:$24 sps:$4 sm:$0xff]   ;;  %v2445_v45 = vld [vmem:[%s3235_s4 + $0x2b4] ss:$24 sps:$4 sm:$0xff]  }
  0xf2   : > { %v2872_v51 = vpack.c.bf16 %v532_v48, %v529_v47  ;;  %1604 = vmatpush1.bf16.msra.mxu0 %v2359_v44  ;;  %v2442_v44 = vld [vmem:[%s3235_s4 + $0x1ec] ss:$24 sps:$4 sm:$0xff]   ;;  %v2443_v47 = vld [vmem:[%s3235_s4 + $0x2b0] ss:$24 sps:$4 sm:$0xff]   ;;  %v2448_v48 = vld [vmem:[%s3235_s4 + $0x1bc] ss:$24 sps:$4 sm:$0xff]  }
  0xf3   : > { %1605 = vmatprep.subr.bf16.mxu0 %v2367_v46  ;;  %v2440_v46 = vld [vmem:[%s3235_s4 + $0x1e8] ss:$24 sps:$4 sm:$0xff]  }
  0xf4   : > { %1528 = vmatmul.mubr.bf16.vlgmr.msra.gmra.mxu1 %v2872_v51 }
  0xf5   : > { %1547 = vmatpush1.bf16.msra.mxu1 %v2362_v49  ;;  %1537 = vmatprep.mubr.bf16.mxu1 %v2591_v3  ;;  %v2451_v49 = vld [vmem:[%s3235_s4 + $0x284] ss:$24 sps:$4 sm:$0xff]  }
  0xf6   : > { %1606 = vmatpush1.bf16.msra.mxu0 %v2365_v52  ;;  %1548 = vmatprep.subr.bf16.mxu1 %v2370_v53  ;;  %v2449_v52 = vld [vmem:[%s3235_s4 + $0x280] ss:$24 sps:$4 sm:$0xff]   ;;  %v2454_v53 = vld [vmem:[%s3235_s4 + $0x18c] ss:$24 sps:$4 sm:$0xff]  }
  0xf7   : > { %1607 = vmatprep.subr.bf16.mxu0 %v2373_v54  ;;  %v2457_v54 = vld [vmem:[%s3235_s4 + $0x254] ss:$24 sps:$4 sm:$0xff]  }
  0xf9   : > { %1549 = vmatpush1.bf16.msra.mxu1 %v2368_v55  ;;  %v2452_v55 = vld [vmem:[%s3235_s4 + $0x188] ss:$24 sps:$4 sm:$0xff]  }
  0xfa   : > { %1608 = vmatpush1.bf16.msra.mxu0 %v2371_v57  ;;  %1550 = vmatprep.subr.bf16.mxu1 %v2376_v58  ;;  %v2460_v57 = vld [vmem:[%s3235_s4 + $0x464] ss:$24 sps:$4 sm:$0xff]  }
  0xfb   : > { %1609 = vmatprep.subr.bf16.mxu0 %v2379_v59  ;;  %v2463_v58 = vld [vmem:[%s3235_s4 + $0x224] ss:$24 sps:$4 sm:$0xff]   ;;  %v2458_v59 = vld [vmem:[%s3235_s4 + $0x460] ss:$24 sps:$4 sm:$0xff]  }
  0xfc   : > { %1538 = vmatmul.mubr.bf16.gmra.mxu1 %v2900_v61 }
  0xfd   : > { %1551 = vmatpush1.bf16.msra.mxu1 %v2374_v60  ;;  %1578 = vmatprep.mubr.bf16.mxu1 %v2830_v21  ;;  %v2461_v60 = vld [vmem:[%s3235_s4 + $0x220] ss:$24 sps:$4 sm:$0xff]  }
  0xfe   : > { %1610 = vmatpush1.bf16.msra.mxu0 %v2377_v62  ;;  %1552 = vmatprep.subr.bf16.mxu1 %v2382_v63  ;;  %v2466_v62 = vld [vmem:[%s3235_s4 + $0x434] ss:$24 sps:$4 sm:$0xff]  }
  0xff   : > { %1611 = vmatprep.subr.bf16.mxu0 %v2385_v0  ;;  %v2469_v63 = vld [vmem:[%s3235_s4 + $0x1f4] ss:$24 sps:$4 sm:$0xff]   ;;  %v2464_v0 = vld [vmem:[%s3235_s4 + $0x430] ss:$24 sps:$4 sm:$0xff]  }
 0x101   : > { %1553 = vmatpush1.bf16.msra.mxu1 %v2380_v1  ;;  %v2467_v1 = vld [vmem:[%s3235_s4 + $0x1f0] ss:$24 sps:$4 sm:$0xff]  }
 0x102   : > { %1612 = vmatpush1.bf16.msra.mxu0 %v2383_v2  ;;  %1554 = vmatprep.subr.bf16.mxu1 %v2388_v5  ;;  %v2472_v2 = vld [vmem:[%s3235_s4 + $0x404] ss:$24 sps:$4 sm:$0xff]  }
 0x103   : > { %1648 = vmatprep.subr.bf16.mxu0 %v2391_v6  ;;  %v2475_v5 = vld [vmem:[%s3235_s4 + $0x1c4] ss:$24 sps:$4 sm:$0xff]   ;;  %v2470_v6 = vld [vmem:[%s3235_s4 + $0x400] ss:$24 sps:$4 sm:$0xff]  }
 0x105   : > { %1555 = vmatpush1.bf16.msra.mxu1 %v2386_v7  ;;  %1630 = vmatmul.mubr.bf16.vlgmr.msra.gmra.mxu0 %v2872_v51  ;;  %v2473_v7 = vld [vmem:[%s3235_s4 + $0x1c0] ss:$24 sps:$4 sm:$0xff]  }
 0x106   : > { %1649 = vmatpush1.bf16.msra.mxu0 %v2389_v8  ;;  %1556 = vmatprep.subr.bf16.mxu1 %v2394_v9  ;;  %v2478_v8 = vld [vmem:[%s3235_s4 + $0x3d4] ss:$24 sps:$4 sm:$0xff]  }
 0x107   : > { %1650 = vmatprep.subr.bf16.mxu0 %v2397_v10  ;;  %1639 = vmatprep.mubr.bf16.mxu0 %v2591_v3  ;;  %v2481_v9 = vld [vmem:[%s3235_s4 + $0x194] ss:$24 sps:$4 sm:$0xff]   ;;  %v2476_v10 = vld [vmem:[%s3235_s4 + $0x3d0] ss:$24 sps:$4 sm:$0xff]  }
 0x109   : > { %1557 = vmatpush1.bf16.msra.mxu1 %v2392_v11  ;;  %v2479_v11 = vld [vmem:[%s3235_s4 + $0x190] ss:$24 sps:$4 sm:$0xff]  }
 0x10a   : > { %1651 = vmatpush1.bf16.msra.mxu0 %v2395_v12  ;;  %1558 = vmatprep.subr.bf16.mxu1 %v2400_v13  ;;  %v2484_v12 = vld [vmem:[%s3235_s4 + $0x3a4] ss:$24 sps:$4 sm:$0xff]   ;;  %v2482_v13 = vld [vmem:[%s3235_s4 + $0x3a0] ss:$24 sps:$4 sm:$0xff]  }
 0x10b   : > { %1652 = vmatprep.subr.bf16.mxu0 %v2403_v14  ;;  %v2487_v14 = vld [vmem:[%s3235_s4 + $0x374] ss:$24 sps:$4 sm:$0xff]  }
 0x10d   : > { %1559 = vmatpush1.bf16.msra.mxu1 %v2398_v15  ;;  %1640 = vmatmul.mubr.bf16.gmra.mxu0 %v2900_v61  ;;  %v2485_v15 = vld [vmem:[%s3235_s4 + $0x370] ss:$24 sps:$4 sm:$0xff]  }
 0x10e   : > { %1653 = vmatpush1.bf16.msra.mxu0 %v2401_v16  ;;  %1680 = vmatprep.mubr.bf16.mxu0 %v2830_v21  ;;  %v2413_v21 = vld [vmem:[%s3235_s4 + $0xa0] ss:$24 sps:$4 sm:$0xff]   ;;  %v2490_v16 = vld [vmem:[%s3235_s4 + $0x344] ss:$24 sps:$4 sm:$0xff]  }
 0x10f   : > { %1560 = vmatprep.subr.bf16.mxu1 %v2406_v17  ;;  %1654 = vmatprep.subr.bf16.mxu0 %v2409_v18  ;;  %v2488_v17 = vld [vmem:[%s3235_s4 + $0x340] ss:$24 sps:$4 sm:$0xff]  }
 0x111   : > { %1561 = vmatpush1.bf16.msra.mxu1 %v2404_v19 }
 0x112   : > { %1655 = vmatpush1.bf16.msra.mxu0 %v2407_v20  ;;  %1562 = vmatprep.subr.bf16.mxu1 %v2412_v22  ;;  %v696_v22 = vsub.s32 0, %v2648_v4 }
 0x113   : > { %1656 = vmatprep.subr.bf16.mxu0 %v2415_v24 }
 0x115   : > { %1563 = vmatpush2.bf16.msra.mxu1 %v2410_v25  ;;  %v700_v25 = vsub.s32 1, %v2648_v4 }
 0x116   : > { %1657 = vmatpush1.bf16.msra.mxu0 %v2413_v21  ;;  %1564 = vmatprep.subr.bf16.mxu1 %v2418_v26 }
 0x117   : > { %1658 = vmatprep.subr.bf16.mxu0 %v2421_v27 }
 0x119   : > { %1565 = vmatpush2.bf16.msra.mxu1 %v2416_v28 }
 0x11a   : > { %1659 = vmatpush1.bf16.msra.mxu0 %v2419_v30  ;;  %1566 = vmatprep.subr.bf16.mxu1 %v2424_v31 }
 0x11b   : > { %1660 = vmatprep.subr.bf16.mxu0 %v2427_v32 }
 0x11d   : > { %1567 = vmatpush2.bf16.msra.mxu1 %v2422_v33 }
 0x11e   : > { %1661 = vmatpush1.bf16.msra.mxu0 %v2425_v34  ;;  %1568 = vmatprep.subr.bf16.mxu1 %v2430_v35 }
 0x11f   : > { %1662 = vmatprep.subr.bf16.mxu0 %v2433_v36 }
 0x121   : > { %1569 = vmatpush2.bf16.msra.mxu1 %v2428_v38 }
 0x122   : > { %1663 = vmatpush1.bf16.msra.mxu0 %v2431_v39  ;;  %1570 = vmatprep.subr.bf16.mxu1 %v2436_v40 }
 0x123   : > { %1664 = vmatprep.subr.bf16.mxu0 %v2439_v41 }
 0x125   : > { %1571 = vmatpush2.bf16.msra.mxu1 %v2434_v42 }
 0x126   : > { %1665 = vmatpush2.bf16.msra.mxu0 %v2437_v43  ;;  %1572 = vmatprep.subr.bf16.mxu1 %v2442_v44 }
 0x127   : > { %1666 = vmatprep.subr.bf16.mxu0 %v2445_v45 }
 0x129   : > { %1573 = vmatpush2.bf16.msra.mxu1 %v2440_v46 }
 0x12a   : > { %1667 = vmatpush2.bf16.msra.mxu0 %v2443_v47  ;;  %1574 = vmatprep.subr.bf16.mxu1 %v2448_v48 }
 0x12b   : > { %1668 = vmatprep.subr.bf16.mxu0 %v2451_v49 }
 0x12d   : > { %1575 = vmatpush2.bf16.msra.mxu1 %v2446_v50 }
 0x12e   : > { %1669 = vmatpush2.bf16.msra.mxu0 %v2449_v52  ;;  %1576 = vmatprep.subr.bf16.mxu1 %v2454_v53 }
 0x12f   : > { %1670 = vmatprep.subr.bf16.mxu0 %v2457_v54 }
 0x131   : > { %1577 = vmatpush2.bf16.msra.mxu1 %v2452_v55 }
 0x132   : > { %1671 = vmatpush2.bf16.msra.mxu0 %v2455_v56  ;;  %1699 = vmatprep.subr.bf16.mxu1 %v2460_v57 }
 0x133   : > { %1672 = vmatprep.subr.bf16.mxu0 %v2463_v58 }
 0x134   : > { %1579 = vmatmul.mubr.bf16.vlgmr.msra.gmra.mxu1 %v2835_v23 }
 0x135   : > { %1588 = vmatprep.mubr.bf16.mxu1 %v2842_v29  ;;  %1700 = vmatpush1.bf16.msra.mxu1 %v2458_v59 }
 0x136   : > { %1673 = vmatpush2.bf16.msra.mxu0 %v2461_v60  ;;  %1701 = vmatprep.subr.bf16.mxu1 %v2466_v62 }
 0x137   : > { %1674 = vmatprep.subr.bf16.mxu0 %v2469_v63 }
 0x139   : > { %1702 = vmatpush1.bf16.msra.mxu1 %v2464_v0 }
 0x13a   : > { %1675 = vmatpush2.bf16.msra.mxu0 %v2467_v1  ;;  %1703 = vmatprep.subr.bf16.mxu1 %v2472_v2 }
 0x13b   : > { %1676 = vmatprep.subr.bf16.mxu0 %v2475_v5 }
 0x13c   : > { %1589 = vmatmul.mubr.bf16.gmra.mxu1 %v2855_v37 }
 0x13d   : > { %1704 = vmatpush1.bf16.msra.mxu1 %v2470_v6  ;;  %1731 = vmatprep.mubr.bf16.mxu1 %v2591_v3 }
 0x13e   : > { %1677 = vmatpush2.bf16.msra.mxu0 %v2473_v7  ;;  %1705 = vmatprep.subr.bf16.mxu1 %v2478_v8 }
 0x13f   : > { %1678 = vmatprep.subr.bf16.mxu0 %v2481_v9 }
 0x141   : > { %1706 = vmatpush1.bf16.msra.mxu1 %v2476_v10 }
 0x142   : > { %1679 = vmatpush2.bf16.msra.mxu0 %v2479_v11  ;;  %1707 = vmatprep.subr.bf16.mxu1 %v2484_v12 }
 0x145   : > { %1681 = vmatmul.mubr.bf16.vlgmr.msra.gmra.mxu0 %v2835_v23  ;;  %1708 = vmatpush1.bf16.msra.mxu1 %v2482_v13  ;;  %v2493_v23 = vld [vmem:[%s3235_s4 + $0x314] ss:$24 sps:$4 sm:$0xff]  }
 0x146   : > { %1690 = vmatprep.mubr.bf16.mxu0 %v2842_v29  ;;  %1709 = vmatprep.subr.bf16.mxu1 %v2487_v14  ;;  %v2491_v29 = vld [vmem:[%s3235_s4 + $0x310] ss:$24 sps:$4 sm:$0xff]  }
 0x149   : > { %1710 = vmatpush1.bf16.msra.mxu1 %v2485_v15 }
 0x14a   : > { %1711 = vmatprep.subr.bf16.mxu1 %v2490_v16  ;;  %v1858_v16 = vld [vmem:[%s3168_s30] sm:$0xff] }
 0x14d   : > { %1691 = vmatmul.mubr.bf16.gmra.mxu0 %v2855_v37  ;;  %1712 = vmatpush1.bf16.msra.mxu1 %v2488_v17  ;;  %v3153_v37 = vld [vmem:[%s3236_s5] sm:$0x3f] }
 0x14e   : > { %1713 = vmatprep.subr.bf16.mxu1 %v2493_v23  ;;  %v1859_v23 = vld [vmem:[%s3168_s30 + $0x8] sm:$0xff] }
 0x151   : > { %1714 = vmatpush1.bf16.msra.mxu1 %v2491_v29 }
 0x154   : > { %1732 = vmatmul.mubr.bf16.vlgmr.msra.gmra.mxu1 %v2872_v51  ;;  %v697_v51 = vrot.slane %v3153_v37, %v696_v22 }
 0x155   : > { %1741 = vmatprep.mubr.bf16.mxu1 %v2591_v3  ;;  %v701_v3 = vrot.slane %v3153_v37, %v700_v25 }
 0x15c   : > { %1742 = vmatmul.mubr.bf16.gmra.mxu1 %v2900_v61 }
 0x1a5   : > { %v1478_v18 = vpop.f32.mrf.mxu0 }
 0x1a6   : > { %v1479_v27 = vadd.f32 %v1478_v18, %v697_v51 }
 0x1a7   : > { %v1480_v19 = vpop.f32.mrf.mxu0 }
 0x1a8   : > { %v1481_v31 = vadd.f32 %v1480_v19, %v701_v3  ;;  %v1864_v19 = vld [vmem:[%s3168_s30 + $0x30] sm:$0xff] }
 0x1a9   : > { %v1482_v20 = vpop.f32.mrf.mxu0 }
 0x1aa   : > { %v1483_v34 = vadd.f32 %v1482_v20, %v697_v51 }
 0x1ab   : > { %v1484_v24 = vpop.f32.mrf.mxu0 }
 0x1ac   : > { %v1485_v39 = vadd.f32 %v1484_v24, %v701_v3  ;;  %v1865_v24 = vld [vmem:[%s3168_s30 + $0x38] sm:$0xff] }
 0x1ad   : > { %v1488_v21 = vpop.f32.mrf.mxu0 }
 0x1ae   : > { %v1489_v43 = vadd.f32 %v1488_v21, %v697_v51  ;;  %v1870_v51 = vld [vmem:[%s3168_s30 + $0x60] sm:$0xff] }
 0x1af   : > { %v1490_v26 = vpop.f32.mrf.mxu0 }
 0x1b0   : > { %v1491_v47 = vadd.f32 %v1490_v26, %v701_v3 }
 0x1b1   : > { %v1492_v61 = vpop.f32.mrf.mxu0 }
 0x1b2   : > { %v1871_v61 = vld [vmem:[%s3168_s30 + $0x68] sm:$0xff] }
 0x1b3   : > { %v1493_v28 = vpop.f32.mrf.mxu0 }
 0x1b4   : > { %v1529_v30 = vpop.f32.mrf.mxu1 }
 0x1b5   : > { %v1530_v32 = vadd.f32 %v1529_v30, %v1479_v27 }
 0x1b6   : > { %v1531_v33 = vpop.f32.mrf.mxu1 }
 0x1b7   : > { %v2217_v35 = vmul.f32 -1.442695, %v1530_v32  ;;  %v1532_v36 = vadd.f32 %v1531_v33, %v1481_v31  ;;  %v704_v31 = vsub.s32 2, %v2648_v4  ;;  %v708_v32 = vsub.s32 3, %v2648_v4 }
 0x1b8   : > { %v1533_v38 = vpop.f32.mrf.mxu1 }
 0x1b9   : > { %2494 = vpow2.f32 %v2217_v35  ;;  %v2218_v40 = vmul.f32 -1.442695, %v1532_v36  ;;  %v1534_v41 = vadd.f32 %v1533_v38, %v1483_v34  ;;  %v705_v33 = vrot.slane %v3153_v37, %v704_v31 }
 0x1ba   : > { %v1535_v42 = vpop.f32.mrf.mxu1  ;;  %v709_v34 = vrot.slane %v3153_v37, %v708_v32 }
 0x1bb   : > { %2496 = vpow2.f32 %v2218_v40  ;;  %v2223_v44 = vmul.f32 -1.442695, %v1534_v41  ;;  %v1536_v45 = vadd.f32 %v1535_v42, %v1485_v39 }
 0x1bc   : > { %v1539_v46 = vpop.f32.mrf.mxu1 }
 0x1bd   : > { %2498 = vpow2.f32 %v2223_v44  ;;  %v2224_v48 = vmul.f32 -1.442695, %v1536_v45  ;;  %v1540_v49 = vadd.f32 %v1539_v46, %v1489_v43 }
 0x1be   : > { %v1541_v50 = vpop.f32.mrf.mxu1 }
 0x1bf   : > { %2500 = vpow2.f32 %v2224_v48  ;;  %v2229_v52 = vmul.f32 -1.442695, %v1540_v49  ;;  %v1542_v53 = vadd.f32 %v1541_v50, %v1491_v47 }
 0x1c0   : > { %v1543_v54 = vpop.f32.mrf.mxu1 }
 0x1c1   : > { %2502 = vpow2.f32 %v2229_v52  ;;  %v2230_v55 = vmul.f32 -1.442695, %v1542_v53 }
 0x1c2   : > { %v1544_v56 = vpop.f32.mrf.mxu1 }
 0x1c3   : > { %2504 = vpow2.f32 %v2230_v55 }
 0x1c5   : > { %v1631_v57 = vpop.f32.mrf.mxu0 }
 0x1c6   : > { %v2495_v58 = vpop.eup %2494 }
 0x1c7   : > { %v1804_v59 = vadd.f32 1.0, %v2495_v58  ;;  %v1633_v60 = vpop.f32.mrf.mxu0 }
 0x1c8   : > { %v2497_v62 = vpop.eup %2496 }
 0x1c9   : > { %2506 = vrcp.f32 %v1804_v59  ;;  %v1805_v63 = vadd.f32 1.0, %v2497_v62  ;;  %v1635_v0 = vpop.f32.mrf.mxu0 }
 0x1ca   : > { %v2499_v1 = vpop.eup %2498 }
 0x1cb   : > { %2508 = vrcp.f32 %v1805_v63  ;;  %v1810_v2 = vadd.f32 1.0, %v2499_v1  ;;  %v3158_v5 = vpop.f32.mrf.mxu0 }
 0x1cc   : > { %v2501_v6 = vpop.eup %2500 }
 0x1cd   : > { %2510 = vrcp.f32 %v1810_v2  ;;  %v1811_v7 = vadd.f32 1.0, %v2501_v6  ;;  %v3161_v8 = vpop.f32.mrf.mxu0 }
 0x1ce   : > { %v2503_v9 = vpop.eup %2502 }
 0x1cf   : > { %2512 = vrcp.f32 %v1811_v7  ;;  %v1816_v10 = vadd.f32 1.0, %v2503_v9  ;;  %v3163_v11 = vpop.f32.mrf.mxu0 }
 0x1d0   : > { %v2505_v12 = vpop.eup %2504 }
 0x1d1   : > { %2514 = vrcp.f32 %v1816_v10  ;;  %v1817_v13 = vadd.f32 1.0, %v2505_v12  ;;  %v1645_v14 = vpop.f32.mrf.mxu0 }
 0x1d3   : > { %2516 = vrcp.f32 %v1817_v13  ;;  %v1646_v15 = vpop.f32.mrf.mxu0 }
 0x1d6   : > { %v2507_v17 = vpop.eup %2506 }
 0x1d7   : > { %v1876_v29 = vmul.f32 %v2507_v17, %v1858_v16 }
 0x1d8   : > { %v2509_v18 = vpop.eup %2508 }
 0x1d9   : > { %1894 = vst [vmem:[%s3174_s8] sm:$0xff] %v1876_v29  ;;  %v1877_v20 = vmul.f32 %v2509_v18, %v1859_v23 }
 0x1da   : > { %v2511_v22 = vpop.eup %2510 }
 0x1db   : > { %1895 = vst [vmem:[%s3174_s8 + $0x8] sm:$0xff] %v1877_v20  ;;  %v1882_v25 = vmul.f32 %v2511_v22, %v1864_v19 }
 0x1dc   : > { %v2513_v21 = vpop.eup %2512 }
 0x1dd   : > { %1900 = vst [vmem:[%s3174_s8 + $0x30] sm:$0xff] %v1882_v25  ;;  %v1883_v26 = vmul.f32 %v2513_v21, %v1865_v24 }
 0x1de   : > { %v2515_v3 = vpop.eup %2514 }
 0x1df   : > { %1901 = vst [vmem:[%s3174_s8 + $0x38] sm:$0xff] %v1883_v26  ;;  %v1888_v27 = vmul.f32 %v2515_v3, %v1870_v51  ;;  %v1860_v3 = vld [vmem:[%s3168_s30 + $0x10] sm:$0xff] }
 0x1e0   : > { %v2517_v28 = vpop.eup %2516 }
 0x1e1   : > { %1906 = vst [vmem:[%s3174_s8 + $0x60] sm:$0xff] %v1888_v27  ;;  %v1889_v30 = vmul.f32 %v2517_v28, %v1871_v61 }
 0x1e3   : > { %1907 = vst [vmem:[%s3174_s8 + $0x68] sm:$0xff] %v1889_v30 }
 0x1f4   : > { %v1580_v35 = vpop.f32.mrf.mxu1 }
 0x1f5   : > { %v1581_v36 = vadd.f32 %v1580_v35, %v705_v33 }
 0x1f6   : > { %v1582_v38 = vpop.f32.mrf.mxu1 }
 0x1f7   : > { %v1632_v39 = vadd.f32 %v1631_v57, %v1581_v36  ;;  %v1583_v40 = vadd.f32 %v1582_v38, %v709_v34 }
 0x1f8   : > { %v1584_v41 = vpop.f32.mrf.mxu1 }
 0x1f9   : > { %v2219_v42 = vmul.f32 -1.442695, %v1632_v39  ;;  %v1634_v43 = vadd.f32 %v1633_v60, %v1583_v40  ;;  %v1585_v44 = vadd.f32 %v1584_v41, %v705_v33  ;;  %v1866_v39 = vld [vmem:[%s3168_s30 + $0x40] sm:$0xff] }
 0x1fa   : > { %v1586_v45 = vpop.f32.mrf.mxu1 }
 0x1fb   : > { %2518 = vpow2.f32 %v2219_v42  ;;  %v2220_v46 = vmul.f32 -1.442695, %v1634_v43  ;;  %v1636_v47 = vadd.f32 %v1635_v0, %v1585_v44  ;;  %v1587_v48 = vadd.f32 %v1586_v45, %v709_v34 }
 0x1fc   : > { %v1590_v49 = vpop.f32.mrf.mxu1 }
 0x1fd   : > { %2520 = vpow2.f32 %v2220_v46  ;;  %v2225_v50 = vmul.f32 -1.442695, %v1636_v47  ;;  %v1638_v52 = vadd.f32 %v3158_v5, %v1587_v48  ;;  %v1591_v53 = vadd.f32 %v1590_v49, %v705_v33  ;;  %v1867_v46 = vld [vmem:[%s3168_s30 + $0x48] sm:$0xff] }
 0x1fe   : > { %v1592_v54 = vpop.f32.mrf.mxu1 }
 0x1ff   : > { %2522 = vpow2.f32 %v2225_v50  ;;  %v2226_v55 = vmul.f32 -1.442695, %v1638_v52  ;;  %v1642_v56 = vadd.f32 %v3161_v8, %v1591_v53  ;;  %v1593_v57 = vadd.f32 %v1592_v54, %v709_v34  ;;  %v1872_v54 = vld [vmem:[%s3168_s30 + $0x70] sm:$0xff] }
 0x200   : > { %v1594_v58 = vpop.f32.mrf.mxu1  ;;  %v712_v8 = vsub.s32 4, %v2648_v4 }
 0x201   : > { %2524 = vpow2.f32 %v2226_v55  ;;  %v2231_v59 = vmul.f32 -1.442695, %v1642_v56  ;;  %v1644_v60 = vadd.f32 %v3163_v11, %v1593_v57  ;;  %v716_v11 = vsub.s32 5, %v2648_v4 }
 0x202   : > { %v1595_v62 = vpop.f32.mrf.mxu1  ;;  %v713_v17 = vrot.slane %v3153_v37, %v712_v8 }
 0x203   : > { %2526 = vpow2.f32 %v2231_v59  ;;  %v2232_v63 = vmul.f32 -1.442695, %v1644_v60  ;;  %v717_v19 = vrot.slane %v3153_v37, %v716_v11  ;;  %v1861_v37 = vld [vmem:[%s3168_s30 + $0x18] sm:$0xff] }
 0x204   : > { %v1873_v60 = vld [vmem:[%s3168_s30 + $0x78] sm:$0xff] }
 0x205   : > { %2528 = vpow2.f32 %v2232_v63  ;;  %v1682_v0 = vpop.f32.mrf.mxu0 }
 0x206   : > { %v1683_v25 = vadd.f32 %v1682_v0, %v713_v17 }
 0x207   : > { %v1684_v1 = vpop.f32.mrf.mxu0 }
 0x208   : > { %v2519_v2 = vpop.eup %2518  ;;  %v1685_v51 = vadd.f32 %v1684_v1, %v717_v19 }
 0x209   : > { %v1806_v5 = vadd.f32 1.0, %v2519_v2  ;;  %v1686_v6 = vpop.f32.mrf.mxu0 }
 0x20a   : > { %v2521_v7 = vpop.eup %2520  ;;  %v1687_v27 = vadd.f32 %v1686_v6, %v713_v17 }
 0x20b   : > { %2530 = vrcp.f32 %v1806_v5  ;;  %v1807_v9 = vadd.f32 1.0, %v2521_v7  ;;  %v1688_v10 = vpop.f32.mrf.mxu0 }
 0x20c   : > { %v2523_v12 = vpop.eup %2522  ;;  %v1689_v32 = vadd.f32 %v1688_v10, %v717_v19 }
 0x20d   : > { %2532 = vrcp.f32 %v1807_v9  ;;  %v1812_v13 = vadd.f32 1.0, %v2523_v12  ;;  %v1692_v14 = vpop.f32.mrf.mxu0 }
 0x20e   : > { %v2525_v15 = vpop.eup %2524  ;;  %v1693_v40 = vadd.f32 %v1692_v14, %v713_v17 }
 0x20f   : > { %2534 = vrcp.f32 %v1812_v13  ;;  %v1813_v16 = vadd.f32 1.0, %v2525_v15  ;;  %v1694_v23 = vpop.f32.mrf.mxu0 }
 0x210   : > { %v2527_v29 = vpop.eup %2526  ;;  %v1695_v47 = vadd.f32 %v1694_v23, %v717_v19  ;;  %v1862_v23 = vld [vmem:[%s3168_s30 + $0x20] sm:$0xff] }
 0x211   : > { %2536 = vrcp.f32 %v1813_v16  ;;  %v1818_v18 = vadd.f32 1.0, %v2527_v29  ;;  %v1696_v20 = vpop.f32.mrf.mxu0 }
 0x212   : > { %v2529_v22 = vpop.eup %2528 }
 0x213   : > { %2538 = vrcp.f32 %v1818_v18  ;;  %v1819_v24 = vadd.f32 1.0, %v2529_v22  ;;  %v1697_v4 = vpop.f32.mrf.mxu0  ;;  %v1863_v18 = vld [vmem:[%s3168_s30 + $0x28] sm:$0xff]  ;;  %v1868_v22 = vld [vmem:[%s3168_s30 + $0x50] sm:$0xff] }
 0x214   : > { %v1733_v21 = vpop.f32.mrf.mxu1  ;;  %v1869_v4 = vld [vmem:[%s3168_s30 + $0x58] sm:$0xff] }
 0x215   : > { %2540 = vrcp.f32 %v1819_v24  ;;  %v1734_v26 = vadd.f32 %v1733_v21, %v1683_v25 }
 0x216   : > { %v1735_v61 = vpop.f32.mrf.mxu1 }
 0x217   : > { %v2221_v28 = vmul.f32 -1.442695, %v1734_v26  ;;  %v1736_v30 = vadd.f32 %v1735_v61, %v1685_v51  ;;  %v1874_v26 = vld [vmem:[%s3168_s30 + $0x80] sm:$0xff] }
 0x218   : > { %v2531_v31 = vpop.eup %2530  ;;  %v1737_v33 = vpop.f32.mrf.mxu1 }
 0x219   : > { %v1878_v34 = vmul.f32 %v2531_v31, %v1860_v3  ;;  %2542 = vpow2.f32 %v2221_v28  ;;  %v2222_v35 = vmul.f32 -1.442695, %v1736_v30  ;;  %v1738_v36 = vadd.f32 %v1737_v33, %v1687_v27  ;;  %v1875_v27 = vld [vmem:[%s3168_s30 + $0x88] sm:$0xff] }
 0x21a   : > { %v2533_v38 = vpop.eup %2532  ;;  %v1739_v41 = vpop.f32.mrf.mxu1 }
 0x21b   : > { %1896 = vst [vmem:[%s3174_s8 + $0x10] sm:$0xff] %v1878_v34  ;;  %v1879_v42 = vmul.f32 %v2533_v38, %v1861_v37  ;;  %2544 = vpow2.f32 %v2222_v35  ;;  %v2227_v43 = vmul.f32 -1.442695, %v1738_v36  ;;  %v1740_v44 = vadd.f32 %v1739_v41, %v1689_v32 }
 0x21c   : > { %v2535_v45 = vpop.eup %2534  ;;  %v1743_v48 = vpop.f32.mrf.mxu1 }
 0x21d   : > { %1897 = vst [vmem:[%s3174_s8 + $0x18] sm:$0xff] %v1879_v42  ;;  %v1884_v49 = vmul.f32 %v2535_v45, %v1866_v39  ;;  %2546 = vpow2.f32 %v2227_v43  ;;  %v2228_v50 = vmul.f32 -1.442695, %v1740_v44  ;;  %v1744_v52 = vadd.f32 %v1743_v48, %v1693_v40 }
 0x21e   : > { %v2537_v53 = vpop.eup %2536  ;;  %v1745_v55 = vpop.f32.mrf.mxu1 }
 0x21f   : > { %1902 = vst [vmem:[%s3174_s8 + $0x40] sm:$0xff] %v1884_v49  ;;  %v1885_v56 = vmul.f32 %v2537_v53, %v1867_v46  ;;  %2548 = vpow2.f32 %v2228_v50  ;;  %v2233_v57 = vmul.f32 -1.442695, %v1744_v52  ;;  %v1746_v58 = vadd.f32 %v1745_v55, %v1695_v47 }
 0x220   : > { %v2539_v59 = vpop.eup %2538  ;;  %v1747_v62 = vpop.f32.mrf.mxu1 }
 0x221   : > { %1903 = vst [vmem:[%s3174_s8 + $0x48] sm:$0xff] %v1885_v56  ;;  %v1890_v63 = vmul.f32 %v2539_v59, %v1872_v54  ;;  %2550 = vpow2.f32 %v2233_v57  ;;  %v2234_v0 = vmul.f32 -1.442695, %v1746_v58 }
 0x222   : > { %v2541_v1 = vpop.eup %2540  ;;  %v1748_v2 = vpop.f32.mrf.mxu1 }
 0x223   : > { %1908 = vst [vmem:[%s3174_s8 + $0x70] sm:$0xff] %v1890_v63  ;;  %v1891_v5 = vmul.f32 %v2541_v1, %v1873_v60  ;;  %2552 = vpow2.f32 %v2234_v0 }
 0x225   : > { %1909 = vst [vmem:[%s3174_s8 + $0x78] sm:$0xff] %v1891_v5 }
 0x226   : > { %v2543_v6 = vpop.eup %2542 }
 0x227   : > { %v1808_v7 = vadd.f32 1.0, %v2543_v6 }
 0x228   : > { %v2545_v9 = vpop.eup %2544 }
 0x229   : > { %2554 = vrcp.f32 %v1808_v7  ;;  %v1809_v8 = vadd.f32 1.0, %v2545_v9 }
 0x22a   : > { %v2547_v10 = vpop.eup %2546 }
 0x22b   : > { %2556 = vrcp.f32 %v1809_v8  ;;  %v1814_v12 = vadd.f32 1.0, %v2547_v10 }
 0x22c   : > { %v2549_v13 = vpop.eup %2548 }
 0x22d   : > { %2558 = vrcp.f32 %v1814_v12  ;;  %v1815_v11 = vadd.f32 1.0, %v2549_v13 }
 0x22e   : > { %v2551_v14 = vpop.eup %2550 }
 0x22f   : > { %2560 = vrcp.f32 %v1815_v11  ;;  %v1820_v15 = vadd.f32 1.0, %v2551_v14 }
 0x230   : > { %v2553_v16 = vpop.eup %2552 }
 0x231   : > { %2562 = vrcp.f32 %v1820_v15  ;;  %v1821_v17 = vadd.f32 1.0, %v2553_v16 }
 0x233   : > { %2564 = vrcp.f32 %v1821_v17 }
 0x236   : > { %v2555_v29 = vpop.eup %2554 }
 0x237   : > { %v1880_v19 = vmul.f32 %v2555_v29, %v1862_v23 }
 0x238   : > { %v2557_v20 = vpop.eup %2556 }
 0x239   : > { %1898 = vst [vmem:[%s3174_s8 + $0x20] sm:$0xff] %v1880_v19  ;;  %v1881_v24 = vmul.f32 %v2557_v20, %v1863_v18 }
 0x23a   : > { %v2559_v25 = vpop.eup %2558 }
 0x23b   : > { %1899 = vst [vmem:[%s3174_s8 + $0x28] sm:$0xff] %v1881_v24  ;;  %v1886_v21 = vmul.f32 %v2559_v25, %v1868_v22 }
 0x23c   : > { %v2561_v51 = vpop.eup %2560 }
 0x23d   : > { %1904 = vst [vmem:[%s3174_s8 + $0x50] sm:$0xff] %v1886_v21  ;;  %v1887_v3 = vmul.f32 %v2561_v51, %v1869_v4 }
 0x23e   : > { %v2563_v61 = vpop.eup %2562 }
 0x23f   : > { %1905 = vst [vmem:[%s3174_s8 + $0x58] sm:$0xff] %v1887_v3  ;;  %v1892_v28 = vmul.f32 %v2563_v61, %v1874_v26 }
 0x240   : > { %v2565_v30 = vpop.eup %2564 }
 0x241   : > { %1910 = vst [vmem:[%s3174_s8 + $0x80] sm:$0xff] %v1892_v28  ;;  %v1893_v31 = vmul.f32 %v2565_v30, %v1875_v27 }
 0x243   : > { %1911 = vst [vmem:[%s3174_s8 + $0x88] sm:$0xff] %v1893_v31 }
 0x244 PF: > { %s16_s23 = sadd.s32 1, %s2588_s23   ;;  %s3238_s21 = smov %s2584_s22 }
 0x245   : > { %p13_p5 = scmp.ge.s32.totalorder %s16_s23, 4   ;;  %s3239_s22 = smov %s3241_s24 }
 0x247   :  { %15 = sbr.rel (!%p13_p5) target bundleno = 2 (0x2), region = 83 }

</bundles_post_ra>
